<compile_context>
chip_gen: v5e
topology: v5e:2x2
jax: 0.10.0
libtpu: 0.0.40
codegen_flags: <defaults>
</compile_context>

<pallas_src>
import functools

import jax
import jax.numpy as jnp
from jax.experimental import pallas as pl
from jax.experimental.pallas import tpu as pltpu  # noqa: F401  (TPU backend)

HIDDEN = 16            # hidden_channels
NUM_CLASSES = 2
INPUT_DIM = 6          # input_dimension
EMB_DIM = 100          # EMBEDDING_DIMENSION
VOCAB = 3886           # MAX_SIZE_VOCAB
PAD_IDX = 1
NUM_NODE_FEATURES = 1
SLAB_W = 128           # lane width of both slabs


def _ceil8(n):
  return (n + 7) & ~7


def _make_layout(blocks):
  """blocks: list of (name, (rows, cols)). Returns ({name: (row, rows, cols)}, total_rows)."""
  off = {}
  r = 0
  for name, (nr, nc) in blocks:
    off[name] = (r, nr, nc)
    r += _ceil8(nr)
  return off, r


# Parameter slab layout (static: depends only on model constants).
_W_BLOCKS = [
    ("g1w", (NUM_NODE_FEATURES, HIDDEN)), ("g1b", (1, HIDDEN)),
    ("g2w", (HIDDEN, HIDDEN)), ("g2b", (1, HIDDEN)),
    ("g3w", (HIDDEN, HIDDEN)), ("g3b", (1, HIDDEN)),
    ("l1_wih", (INPUT_DIM, 4 * HIDDEN)), ("l1_whh", (HIDDEN, 4 * HIDDEN)),
    ("l1_b", (1, 4 * HIDDEN)),
    ("l2_wih", (HIDDEN, 4 * HIDDEN)), ("l2_whh", (HIDDEN, 4 * HIDDEN)),
    ("l2_b", (1, 4 * HIDDEN)),
    ("lin_w", (HIDDEN, HIDDEN)), ("lin_b", (1, HIDDEN)),
    ("r1_wih", (EMB_DIM, 8 * HIDDEN)),
    ("r1_whh_f", (HIDDEN, 4 * HIDDEN)), ("r1_whh_b", (HIDDEN, 4 * HIDDEN)),
    ("r1_b", (1, 8 * HIDDEN)),
    ("r2_wih", (2 * HIDDEN, 8 * HIDDEN)),
    ("r2_whh_f", (HIDDEN, 4 * HIDDEN)), ("r2_whh_b", (HIDDEN, 4 * HIDDEN)),
    ("r2_b", (1, 8 * HIDDEN)),
    ("fc_w", (2 * HIDDEN, HIDDEN)), ("fc_b", (1, HIDDEN)),
    ("fo_w", (3 * HIDDEN, NUM_CLASSES)), ("fo_b", (1, NUM_CLASSES)),
]
_W_LAYOUT, _W_ROWS = _make_layout(_W_BLOCKS)


# --------------------------- fused Pallas kernel -----------------------------

def _fused_forward_kernel(w_ref, act_ref, out_ref, *, wl, al,
                          T2, B2, B2P, T3, B3P, H, GP):
  f32 = jnp.float32
  bf16 = jnp.bfloat16

  def wf32(name):
    r, nr, nc = wl[name]
    return w_ref[r:r + nr, 0:nc]

  def wbf(name):
    return wf32(name).astype(bf16)

  def act(name, dtype=None):
    r, nr, nc = al[name]
    blk = act_ref[r:r + nr, 0:nc]
    return blk if dtype is None else blk.astype(dtype)

  def mm(a, b):
    return jnp.dot(a, b, preferred_element_type=f32)

  def cell(gates, c_prev):
    # One sigmoid over the whole (B, 4H) gate block; tanh only on g + tanh(c).
    sig = jax.nn.sigmoid(gates)
    i = sig[:, 0:H]
    f = sig[:, H:2 * H]
    o = sig[:, 3 * H:4 * H]
    g = jnp.tanh(gates[:, 2 * H:3 * H])
    c = f * c_prev + i * g
    h = o * jnp.tanh(c)
    return h, c

  # ---------------- branch 1: 3x GCNConv + global mean pool ------------------
  a = act("a", bf16)                                   # normalized adj (NP, NP)
  xg = act("xg")                                       # (NP, 1) f32
  pool = act("pool", bf16)                             # (GP, NP)
  xw = xg * wf32("g1w")                                # outer product, VPU only
  h = jnp.maximum(mm(a, xw.astype(bf16)) + wf32("g1b"), 0.0)
  h = jnp.maximum(mm(a, mm(h.astype(bf16), wbf("g2w")).astype(bf16)) + wf32("g2b"), 0.0)
  h = mm(a, mm(h.astype(bf16), wbf("g3w")).astype(bf16)) + wf32("g3b")
  x1 = mm(pool, h.astype(bf16))                        # (GP, H) f32
  # TODO(synk): F.dropout(x1, training=self.training) treated as identity.

  # ---------------- branch 2: 2-layer unidirectional LSTM (interleaved) ------
  l1_whh = wbf("l1_whh")
  l2_wih = wbf("l2_wih")
  l2_whh = wbf("l2_whh")
  xp1 = mm(act("x2", bf16), wbf("l1_wih")) + wf32("l1_b")      # (T2*B2P, 4H)
  l2_bias = jnp.broadcast_to(wf32("l2_b"), (B2P, 4 * H))       # hoisted broadcast
  h1 = jnp.zeros((B2P, H), f32)
  c1 = jnp.zeros((B2P, H), f32)
  h2 = jnp.zeros((B2P, H), f32)
  c2 = jnp.zeros((B2P, H), f32)
  last_rows = []
  for t in range(T2):
    # layer-1 step t, layer-2 step t issued right behind it.
    g1 = xp1[t * B2P:(t + 1) * B2P, :] + mm(h1.astype(bf16), l1_whh)
    h1, c1 = cell(g1, c1)
    g2 = mm(h1.astype(bf16), l2_wih) + l2_bias + mm(h2.astype(bf16), l2_whh)
    h2, c2 = cell(g2, c2)
    # PyTorch `out[:, -1, :]` with batch_first=False = last *batch* row each step
    # (faithful to the reference, which is almost certainly a bug there).
    last_rows.append(h2[B2 - 1:B2, :])
  if GP > T2:
    last_rows.append(jnp.zeros((GP - T2, H), f32))
  out_last = jnp.concatenate(last_rows, axis=0)                # (GP, H)
  x2f = mm(out_last.astype(bf16), wbf("lin_w")) + wf32("lin_b")
  # TODO(synk): F.dropout(x2) (active even at eval) treated as identity.

  # ---------------- branch 3: 2-layer bidirectional masked LSTM --------------
  msk = act("mask")                                            # (T3*B3P, 1) in {0,1}
  m_t = [msk[t * B3P:(t + 1) * B3P, :] for t in range(T3)]     # hoisted masks

  def sel(new, old, m):          # float-mask select: m*new + (1-m)*old
    return old + m * (new - old)

  xp = mm(act("emb", bf16), wbf("r1_wih")) + wf32("r1_b")      # (T3*B3P, 8H)
  r1_whh_f = wbf("r1_whh_f")
  r1_whh_b = wbf("r1_whh_b")
  h_f = jnp.zeros((B3P, H), f32)
  c_f = jnp.zeros((B3P, H), f32)
  h_b = jnp.zeros((B3P, H), f32)
  c_b = jnp.zeros((B3P, H), f32)
  outs_f = [None] * T3
  outs_b = [None] * T3
  # NOTE: layer 2 cannot interleave with layer 1 here: its forward step 0 needs
  # layer-1 *backward* output at t=0, produced only on layer-1's last iteration.
  for s in range(T3):
    tf = s
    tb = T3 - 1 - s
    gf = xp[tf * B3P:(tf + 1) * B3P, 0:4 * H] + mm(h_f.astype(bf16), r1_whh_f)
    hn, cn = cell(gf, c_f)
    h_f = sel(hn, h_f, m_t[tf])
    c_f = sel(cn, c_f, m_t[tf])
    gb = xp[tb * B3P:(tb + 1) * B3P, 4 * H:8 * H] + mm(h_b.astype(bf16), r1_whh_b)
    hn, cn = cell(gb, c_b)
    h_b = sel(hn, h_b, m_t[tb])
    c_b = sel(cn, c_b, m_t[tb])
    outs_f[tf] = h_f
    outs_b[tb] = h_b
  l1f = jnp.concatenate(outs_f, axis=0).astype(bf16)           # (T3*B3P, H)
  l1b = jnp.concatenate(outs_b, axis=0).astype(bf16)
  # TODO(synk): nn.LSTM inter-layer dropout (training-only) treated as identity.

  r2_wih = wbf("r2_wih")
  xp2 = mm(l1f, r2_wih[0:H, :]) + mm(l1b, r2_wih[H:2 * H, :]) + wf32("r2_b")
  r2_whh_f = wbf("r2_whh_f")
  r2_whh_b = wbf("r2_whh_b")
  h_f = jnp.zeros((B3P, H), f32)
  c_f = jnp.zeros((B3P, H), f32)
  h_b = jnp.zeros((B3P, H), f32)
  c_b = jnp.zeros((B3P, H), f32)
  for s in range(T3):
    tf = s
    tb = T3 - 1 - s
    gf = xp2[tf * B3P:(tf + 1) * B3P, 0:4 * H] + mm(h_f.astype(bf16), r2_whh_f)
    hn, cn = cell(gf, c_f)
    h_f = sel(hn, h_f, m_t[tf])
    c_f = sel(cn, c_f, m_t[tf])
    gb = xp2[tb * B3P:(tb + 1) * B3P, 4 * H:8 * H] + mm(h_b.astype(bf16), r2_whh_b)
    hn, cn = cell(gb, c_b)
    h_b = sel(hn, h_b, m_t[tb])
    c_b = sel(cn, c_b, m_t[tb])
  # torch.cat((hidden[-1], hidden[-2]), 1) = [layer-2 bwd | layer-2 fwd];
  # concat avoided by splitting fc_w into two row blocks.
  fc_w = wbf("fc_w")
  x3 = (mm(h_b.astype(bf16), fc_w[0:H, :]) +
        mm(h_f.astype(bf16), fc_w[H:2 * H, :]) + wf32("fc_b"))
  # TODO(synk): F.dropout(hidden) treated as identity.

  # ---------------- fuse: fc_out(cat([x1, x2, x3], 1)) -----------------------
  fo_w = wf32("fo_w")
  out = (mm(x1, fo_w[0:H, :]) + mm(x2f, fo_w[H:2 * H, :]) +
         mm(x3, fo_w[2 * H:3 * H, :]) + wf32("fo_b"))
  out_ref[...] = out.astype(out_ref.dtype)


# --------------------------- wrapper / glue -----------------------------------

@jax.jit
def my_model_forward(params, xg, a_norm, pool_mat, x2, text, text_lengths):
  T2, B2, d_in = x2.shape
  T3, B3 = text.shape
  G, N = pool_mat.shape
  H = HIDDEN
  assert T2 == G and B3 == G, "row counts of the three branches must match"

  NP = _ceil8(N)
  GP = _ceil8(G)
  B2P = _ceil8(B2)
  B3P = _ceil8(B3)
  assert GP == B3P

  # Activation slab layout (8-row-aligned sub-blocks, 128 lanes wide).
  a_blocks = [
      ("a", (NP, NP)),
      ("xg", (NP, NUM_NODE_FEATURES)),
      ("pool", (GP, NP)),
      ("x2", (T2 * B2P, d_in)),
      ("emb", (T3 * B3P, EMB_DIM)),
      ("mask", (T3 * B3P, 1)),
  ]
  al, a_rows = _make_layout(a_blocks)

  # Embedding gather stays in XLA; only the needed (T*B, 100) rows enter VMEM.
  emb_g = jnp.take(params["emb"], text, axis=0)                # (T3, B3, 100)
  # TODO(synk): F.dropout(embedded) treated as identity.

  # Pad batch dims to the 8-row sublane tile.
  x2p = jnp.zeros((T2, B2P, d_in), jnp.float32).at[:, :B2, :].set(x2)
  embp = jnp.zeros((T3, B3P, EMB_DIM), jnp.float32).at[:, :B3, :].set(emb_g)
  valid = (jnp.arange(T3)[:, None] < text_lengths[None, :]).astype(jnp.float32)
  validp = jnp.zeros((T3, B3P), jnp.float32).at[:, :B3].set(valid)

  slab = jnp.zeros((a_rows, SLAB_W), jnp.float32)
  slab = slab.at[al["a"][0]:al["a"][0] + N, 0:N].set(a_norm)
  slab = slab.at[al["xg"][0]:al["xg"][0] + N, 0:NUM_NODE_FEATURES].set(xg)
  slab = slab.at[al["pool"][0]:al["pool"][0] + G, 0:N].set(pool_mat)
  slab = slab.at[al["x2"][0]:al["x2"][0] + T2 * B2P, 0:d_in].set(
      x2p.reshape(T2 * B2P, d_in))
  slab = slab.at[al["emb"][0]:al["emb"][0] + T3 * B3P, 0:EMB_DIM].set(
      embp.reshape(T3 * B3P, EMB_DIM))
  slab = slab.at[al["mask"][0]:al["mask"][0] + T3 * B3P, 0:1].set(
      validp.reshape(T3 * B3P, 1))

  kernel = functools.partial(
      _fused_forward_kernel, wl=_W_LAYOUT, al=al,
      T2=T2, B2=B2, B2P=B2P, T3=T3, B3P=B3P, H=H, GP=GP)

  out = pl.pallas_call(
      kernel,
      out_shape=jax.ShapeDtypeStruct((GP, NUM_CLASSES), jnp.float32),
  )(params["w_slab"], slab)
  return out[:G]


def gcn_norm_adj(edge_index, num_nodes):
  """Dense D^{-1/2} (A + I) D^{-1/2}; messages flow src -> dst."""
  A = jnp.zeros((num_nodes, num_nodes), jnp.float32)
  A = A.at[edge_index[1], edge_index[0]].set(1.0)
  A = A + jnp.eye(num_nodes, dtype=jnp.float32)
  deg = A.sum(axis=1)
  dinv = jnp.where(deg > 0, 1.0 / jnp.sqrt(deg), 0.0)
  return dinv[:, None] * A * dinv[None, :]


def mean_pool_matrix(batch, num_graphs):
  onehot = (batch[None, :] == jnp.arange(num_graphs)[:, None]).astype(jnp.float32)
  counts = onehot.sum(axis=1, keepdims=True)
  return onehot / jnp.maximum(counts, 1.0)


def init_params(key):
  """Parameters packed once into a single 8-row-aligned f32 slab."""
  def nrm(k, shape, scale=0.1):
    return scale * jax.random.normal(k, shape, dtype=jnp.float32)

  ks = iter(jax.random.split(key, 32))
  slab = jnp.zeros((_W_ROWS, SLAB_W), jnp.float32)
  for name, shape in _W_BLOCKS:
    r, nr, nc = _W_LAYOUT[name]
    slab = slab.at[r:r + nr, 0:nc].set(nrm(next(ks), shape))
  emb = nrm(next(ks), (VOCAB, EMB_DIM))
  emb = emb.at[PAD_IDX].set(0.0)          # nn.Embedding padding_idx row
  return {"w_slab": slab, "emb": emb}


# --------------------------------- main --------------------------------------

if __name__ == "__main__":
  key = jax.random.PRNGKey(0)
  pkey, dkey = jax.random.split(key)
  params = init_params(pkey)

  # Graph data: 12 nodes, 4 graphs of 3 fully-connected nodes each.
  num_graphs = 4
  nodes_per = 3
  N = num_graphs * nodes_per
  x = jax.random.normal(jax.random.fold_in(dkey, 0), (N, NUM_NODE_FEATURES),
                        dtype=jnp.float32)
  src, dst = [], []
  for gi in range(num_graphs):
    base = gi * nodes_per
    for a in range(nodes_per):
      for b in range(nodes_per):
        if a != b:
          src.append(base + a)
          dst.append(base + b)
  edge_index = jnp.array([src, dst], dtype=jnp.int32)          # (2, 24)
  batch = jnp.repeat(jnp.arange(num_graphs, dtype=jnp.int32), nodes_per)

  a_norm = gcn_norm_adj(edge_index, N)
  pool_mat = mean_pool_matrix(batch, num_graphs)

  # x2 sequence: seq-major (seq_len=num_graphs, batch=3, input_dim=6)
  x2 = jax.random.normal(jax.random.fold_in(dkey, 1), (num_graphs, 3, INPUT_DIM),
                         dtype=jnp.float32)

  # text: (T_text=8, B_text=num_graphs) token ids, padded past each length
  T_text = 8
  text_lengths = jnp.array([8, 6, 5, 3], dtype=jnp.int32)
  ids = jax.random.randint(jax.random.fold_in(dkey, 2), (T_text, num_graphs), 2, VOCAB)
  pad_mask = jnp.arange(T_text)[:, None] >= text_lengths[None, :]
  text = jnp.where(pad_mask, PAD_IDX, ids).astype(jnp.int32)

  out = my_model_forward(params, x, a_norm, pool_mat, x2, text, text_lengths)
  out = jax.block_until_ready(out)
  assert out.shape == (num_graphs, NUM_CLASSES), out.shape
  print("KERNEL_OK")
</pallas_src>

<mosaic_0001>
module attributes {stable_mosaic.version = 11 : i64} {
  func.func @_fused_forward_kernel(%arg0: memref<472x128xf32, #tpu.memory_space<vmem>>, %arg1: memref<200x128xf32, #tpu.memory_space<vmem>>, %arg2: memref<8x2xf32, #tpu.memory_space<vmem>>) attributes {dimension_semantics = [], scalar_prefetch = 0 : i64, scratch_operands = 0 : i64, tpu.core_type = #tpu.core_type<tc>} {
    %c0 = arith.constant 0 : index
    %c0_0 = arith.constant 0 : index
    %0 = vector.load %arg1[%c0, %c0_0] : memref<200x128xf32, #tpu.memory_space<vmem>>, vector<16x16xf32>
    %1 = arith.truncf %0 : vector<16x16xf32> to vector<16x16xbf16>
    %c16 = arith.constant 16 : index
    %c0_1 = arith.constant 0 : index
    %2 = vector.load %arg1[%c16, %c0_1] : memref<200x128xf32, #tpu.memory_space<vmem>>, vector<16x1xf32>
    %c32 = arith.constant 32 : index
    %c0_2 = arith.constant 0 : index
    %3 = vector.load %arg1[%c32, %c0_2] : memref<200x128xf32, #tpu.memory_space<vmem>>, vector<8x16xf32>
    %4 = arith.truncf %3 : vector<8x16xf32> to vector<8x16xbf16>
    %c0_3 = arith.constant 0 : index
    %c0_4 = arith.constant 0 : index
    %5 = vector.load %arg0[%c0_3, %c0_4] : memref<472x128xf32, #tpu.memory_space<vmem>>, vector<1x16xf32>
    %6 = vector.broadcast %2 : vector<16x1xf32> to vector<16x16xf32>
    %7 = vector.broadcast %5 : vector<1x16xf32> to vector<16x16xf32>
    %8 = arith.mulf %6, %7 : vector<16x16xf32>
    %9 = arith.truncf %8 : vector<16x16xf32> to vector<16x16xbf16>
    %cst = arith.constant dense<0.000000e+00> : vector<16x16xf32>
    %10 = tpu.matmul %1, %9, %cst {dimension_numbers = #tpu.dot_dimension_numbers<[1], [0], [0], [1], [0, 0, 1, 1], [], []>} : vector<16x16xbf16>, vector<16x16xbf16>, vector<16x16xf32> -> vector<16x16xf32>
    %c8 = arith.constant 8 : index
    %c0_5 = arith.constant 0 : index
    %11 = vector.load %arg0[%c8, %c0_5] : memref<472x128xf32, #tpu.memory_space<vmem>>, vector<1x16xf32>
    %12 = vector.broadcast %11 : vector<1x16xf32> to vector<16x16xf32>
    %13 = arith.addf %10, %12 : vector<16x16xf32>
    %cst_6 = arith.constant 0.000000e+00 : f32
    %14 = vector.broadcast %cst_6 : f32 to vector<16x16xf32>
    %15 = arith.maximumf %13, %14 : vector<16x16xf32>
    %16 = arith.truncf %15 : vector<16x16xf32> to vector<16x16xbf16>
    %c16_7 = arith.constant 16 : index
    %c0_8 = arith.constant 0 : index
    %17 = vector.load %arg0[%c16_7, %c0_8] : memref<472x128xf32, #tpu.memory_space<vmem>>, vector<16x16xf32>
    %18 = arith.truncf %17 : vector<16x16xf32> to vector<16x16xbf16>
    %cst_9 = arith.constant dense<0.000000e+00> : vector<16x16xf32>
    %19 = tpu.matmul %16, %18, %cst_9 {dimension_numbers = #tpu.dot_dimension_numbers<[1], [0], [0], [1], [0, 0, 1, 1], [], []>} : vector<16x16xbf16>, vector<16x16xbf16>, vector<16x16xf32> -> vector<16x16xf32>
    %20 = arith.truncf %19 : vector<16x16xf32> to vector<16x16xbf16>
    %cst_10 = arith.constant dense<0.000000e+00> : vector<16x16xf32>
    %21 = tpu.matmul %1, %20, %cst_10 {dimension_numbers = #tpu.dot_dimension_numbers<[1], [0], [0], [1], [0, 0, 1, 1], [], []>} : vector<16x16xbf16>, vector<16x16xbf16>, vector<16x16xf32> -> vector<16x16xf32>
    %c32_11 = arith.constant 32 : index
    %c0_12 = arith.constant 0 : index
    %22 = vector.load %arg0[%c32_11, %c0_12] : memref<472x128xf32, #tpu.memory_space<vmem>>, vector<1x16xf32>
    %23 = vector.broadcast %22 : vector<1x16xf32> to vector<16x16xf32>
    %24 = arith.addf %21, %23 : vector<16x16xf32>
    %cst_13 = arith.constant 0.000000e+00 : f32
    %25 = vector.broadcast %cst_13 : f32 to vector<16x16xf32>
    %26 = arith.maximumf %24, %25 : vector<16x16xf32>
    %27 = arith.truncf %26 : vector<16x16xf32> to vector<16x16xbf16>
    %c40 = arith.constant 40 : index
    %c0_14 = arith.constant 0 : index
    %28 = vector.load %arg0[%c40, %c0_14] : memref<472x128xf32, #tpu.memory_space<vmem>>, vector<16x16xf32>
    %29 = arith.truncf %28 : vector<16x16xf32> to vector<16x16xbf16>
    %cst_15 = arith.constant dense<0.000000e+00> : vector<16x16xf32>
    %30 = tpu.matmul %27, %29, %cst_15 {dimension_numbers = #tpu.dot_dimension_numbers<[1], [0], [0], [1], [0, 0, 1, 1], [], []>} : vector<16x16xbf16>, vector<16x16xbf16>, vector<16x16xf32> -> vector<16x16xf32>
    %31 = arith.truncf %30 : vector<16x16xf32> to vector<16x16xbf16>
    %cst_16 = arith.constant dense<0.000000e+00> : vector<16x16xf32>
    %32 = tpu.matmul %1, %31, %cst_16 {dimension_numbers = #tpu.dot_dimension_numbers<[1], [0], [0], [1], [0, 0, 1, 1], [], []>} : vector<16x16xbf16>, vector<16x16xbf16>, vector<16x16xf32> -> vector<16x16xf32>
    %c56 = arith.constant 56 : index
    %c0_17 = arith.constant 0 : index
    %33 = vector.load %arg0[%c56, %c0_17] : memref<472x128xf32, #tpu.memory_space<vmem>>, vector<1x16xf32>
    %34 = vector.broadcast %33 : vector<1x16xf32> to vector<16x16xf32>
    %35 = arith.addf %32, %34 : vector<16x16xf32>
    %36 = arith.truncf %35 : vector<16x16xf32> to vector<16x16xbf16>
    %cst_18 = arith.constant dense<0.000000e+00> : vector<8x16xf32>
    %37 = tpu.matmul %4, %36, %cst_18 {dimension_numbers = #tpu.dot_dimension_numbers<[1], [0], [0], [1], [0, 0, 1, 1], [], []>} : vector<8x16xbf16>, vector<16x16xbf16>, vector<8x16xf32> -> vector<8x16xf32>
    %c72 = arith.constant 72 : index
    %c0_19 = arith.constant 0 : index
    %38 = vector.load %arg0[%c72, %c0_19] : memref<472x128xf32, #tpu.memory_space<vmem>>, vector<16x64xf32>
    %39 = arith.truncf %38 : vector<16x64xf32> to vector<16x64xbf16>
    %c96 = arith.constant 96 : index
    %c0_20 = arith.constant 0 : index
    %40 = vector.load %arg0[%c96, %c0_20] : memref<472x128xf32, #tpu.memory_space<vmem>>, vector<16x64xf32>
    %41 = arith.truncf %40 : vector<16x64xf32> to vector<16x64xbf16>
    %c112 = arith.constant 112 : index
    %c0_21 = arith.constant 0 : index
    %42 = vector.load %arg0[%c112, %c0_21] : memref<472x128xf32, #tpu.memory_space<vmem>>, vector<16x64xf32>
    %43 = arith.truncf %42 : vector<16x64xf32> to vector<16x64xbf16>
    %c40_22 = arith.constant 40 : index
    %c0_23 = arith.constant 0 : index
    %44 = vector.load %arg1[%c40_22, %c0_23] : memref<200x128xf32, #tpu.memory_space<vmem>>, vector<32x6xf32>
    %45 = arith.truncf %44 : vector<32x6xf32> to vector<32x6xbf16>
    %c64 = arith.constant 64 : index
    %c0_24 = arith.constant 0 : index
    %46 = vector.load %arg0[%c64, %c0_24] : memref<472x128xf32, #tpu.memory_space<vmem>>, vector<6x64xf32>
    %47 = arith.truncf %46 : vector<6x64xf32> to vector<6x64xbf16>
    %cst_25 = arith.constant dense<0.000000e+00> : vector<32x64xf32>
    %48 = tpu.matmul %45, %47, %cst_25 {dimension_numbers = #tpu.dot_dimension_numbers<[1], [0], [0], [1], [0, 0, 1, 1], [], []>} : vector<32x6xbf16>, vector<6x64xbf16>, vector<32x64xf32> -> vector<32x64xf32>
    %c88 = arith.constant 88 : index
    %c0_26 = arith.constant 0 : index
    %49 = vector.load %arg0[%c88, %c0_26] : memref<472x128xf32, #tpu.memory_space<vmem>>, vector<1x64xf32>
    %50 = vector.broadcast %49 : vector<1x64xf32> to vector<32x64xf32>
    %51 = arith.addf %48, %50 : vector<32x64xf32>
    %c128 = arith.constant 128 : index
    %c0_27 = arith.constant 0 : index
    %52 = vector.load %arg0[%c128, %c0_27] : memref<472x128xf32, #tpu.memory_space<vmem>>, vector<1x64xf32>
    %53 = vector.shape_cast %52 : vector<1x64xf32> to vector<1x64xf32>
    %54 = vector.broadcast %53 : vector<1x64xf32> to vector<8x64xf32>
    %cst_28 = arith.constant 0.000000e+00 : f32
    %55 = vector.broadcast %cst_28 : f32 to vector<8x16xf32>
    %cst_29 = arith.constant 0.000000e+00 : f32
    %56 = vector.broadcast %cst_29 : f32 to vector<8x16xf32>
    %cst_30 = arith.constant 0.000000e+00 : f32
    %57 = vector.broadcast %cst_30 : f32 to vector<8x16xf32>
    %cst_31 = arith.constant 0.000000e+00 : f32
    %58 = vector.broadcast %cst_31 : f32 to vector<8x16xf32>
    %59 = vector.extract_strided_slice %51 {offsets = [0, 0], sizes = [8, 64], strides = [1, 1]} : vector<32x64xf32> to vector<8x64xf32>
    %60 = arith.truncf %55 : vector<8x16xf32> to vector<8x16xbf16>
    %cst_32 = arith.constant dense<0.000000e+00> : vector<8x64xf32>
    %61 = tpu.matmul %60, %39, %cst_32 {dimension_numbers = #tpu.dot_dimension_numbers<[1], [0], [0], [1], [0, 0, 1, 1], [], []>} : vector<8x16xbf16>, vector<16x64xbf16>, vector<8x64xf32> -> vector<8x64xf32>
    %62 = arith.addf %59, %61 : vector<8x64xf32>
    %63 = arith.negf %62 : vector<8x64xf32>
    %64 = math.exp %63 : vector<8x64xf32>
    %cst_33 = arith.constant 1.000000e+00 : f32
    %65 = vector.broadcast %cst_33 : f32 to vector<8x64xf32>
    %66 = arith.addf %65, %64 : vector<8x64xf32>
    %67 = arith.divf %65, %66 : vector<8x64xf32>
    %68 = vector.extract_strided_slice %67 {offsets = [0, 0], sizes = [8, 16], strides = [1, 1]} : vector<8x64xf32> to vector<8x16xf32>
    %69 = vector.extract_strided_slice %67 {offsets = [0, 16], sizes = [8, 16], strides = [1, 1]} : vector<8x64xf32> to vector<8x16xf32>
    %70 = vector.extract_strided_slice %67 {offsets = [0, 48], sizes = [8, 16], strides = [1, 1]} : vector<8x64xf32> to vector<8x16xf32>
    %71 = vector.extract_strided_slice %62 {offsets = [0, 32], sizes = [8, 16], strides = [1, 1]} : vector<8x64xf32> to vector<8x16xf32>
    %72 = math.tanh %71 : vector<8x16xf32>
    %73 = arith.mulf %69, %56 : vector<8x16xf32>
    %74 = arith.mulf %68, %72 : vector<8x16xf32>
    %75 = arith.addf %73, %74 : vector<8x16xf32>
    %76 = math.tanh %75 : vector<8x16xf32>
    %77 = arith.mulf %70, %76 : vector<8x16xf32>
    %78 = arith.truncf %77 : vector<8x16xf32> to vector<8x16xbf16>
    %cst_34 = arith.constant dense<0.000000e+00> : vector<8x64xf32>
    %79 = tpu.matmul %78, %41, %cst_34 {dimension_numbers = #tpu.dot_dimension_numbers<[1], [0], [0], [1], [0, 0, 1, 1], [], []>} : vector<8x16xbf16>, vector<16x64xbf16>, vector<8x64xf32> -> vector<8x64xf32>
    %80 = arith.addf %79, %54 : vector<8x64xf32>
    %81 = arith.truncf %57 : vector<8x16xf32> to vector<8x16xbf16>
    %cst_35 = arith.constant dense<0.000000e+00> : vector<8x64xf32>
    %82 = tpu.matmul %81, %43, %cst_35 {dimension_numbers = #tpu.dot_dimension_numbers<[1], [0], [0], [1], [0, 0, 1, 1], [], []>} : vector<8x16xbf16>, vector<16x64xbf16>, vector<8x64xf32> -> vector<8x64xf32>
    %83 = arith.addf %80, %82 : vector<8x64xf32>
    %84 = arith.negf %83 : vector<8x64xf32>
    %85 = math.exp %84 : vector<8x64xf32>
    %cst_36 = arith.constant 1.000000e+00 : f32
    %86 = vector.broadcast %cst_36 : f32 to vector<8x64xf32>
    %87 = arith.addf %86, %85 : vector<8x64xf32>
    %88 = arith.divf %86, %87 : vector<8x64xf32>
    %89 = vector.extract_strided_slice %88 {offsets = [0, 0], sizes = [8, 16], strides = [1, 1]} : vector<8x64xf32> to vector<8x16xf32>
    %90 = vector.extract_strided_slice %88 {offsets = [0, 16], sizes = [8, 16], strides = [1, 1]} : vector<8x64xf32> to vector<8x16xf32>
    %91 = vector.extract_strided_slice %88 {offsets = [0, 48], sizes = [8, 16], strides = [1, 1]} : vector<8x64xf32> to vector<8x16xf32>
    %92 = vector.extract_strided_slice %83 {offsets = [0, 32], sizes = [8, 16], strides = [1, 1]} : vector<8x64xf32> to vector<8x16xf32>
    %93 = math.tanh %92 : vector<8x16xf32>
    %94 = arith.mulf %90, %58 : vector<8x16xf32>
    %95 = arith.mulf %89, %93 : vector<8x16xf32>
    %96 = arith.addf %94, %95 : vector<8x16xf32>
    %97 = math.tanh %96 : vector<8x16xf32>
    %98 = arith.mulf %91, %97 : vector<8x16xf32>
    %99 = vector.extract_strided_slice %98 {offsets = [2, 0], sizes = [1, 16], strides = [1, 1]} : vector<8x16xf32> to vector<1x16xf32>
    %100 = vector.extract_strided_slice %51 {offsets = [8, 0], sizes = [8, 64], strides = [1, 1]} : vector<32x64xf32> to vector<8x64xf32>
    %101 = arith.truncf %77 : vector<8x16xf32> to vector<8x16xbf16>
    %cst_37 = arith.constant dense<0.000000e+00> : vector<8x64xf32>
    %102 = tpu.matmul %101, %39, %cst_37 {dimension_numbers = #tpu.dot_dimension_numbers<[1], [0], [0], [1], [0, 0, 1, 1], [], []>} : vector<8x16xbf16>, vector<16x64xbf16>, vector<8x64xf32> -> vector<8x64xf32>
    %103 = arith.addf %100, %102 : vector<8x64xf32>
    %104 = arith.negf %103 : vector<8x64xf32>
    %105 = math.exp %104 : vector<8x64xf32>
    %cst_38 = arith.constant 1.000000e+00 : f32
    %106 = vector.broadcast %cst_38 : f32 to vector<8x64xf32>
    %107 = arith.addf %106, %105 : vector<8x64xf32>
    %108 = arith.divf %106, %107 : vector<8x64xf32>
    %109 = vector.extract_strided_slice %108 {offsets = [0, 0], sizes = [8, 16], strides = [1, 1]} : vector<8x64xf32> to vector<8x16xf32>
    %110 = vector.extract_strided_slice %108 {offsets = [0, 16], sizes = [8, 16], strides = [1, 1]} : vector<8x64xf32> to vector<8x16xf32>
    %111 = vector.extract_strided_slice %108 {offsets = [0, 48], sizes = [8, 16], strides = [1, 1]} : vector<8x64xf32> to vector<8x16xf32>
    %112 = vector.extract_strided_slice %103 {offsets = [0, 32], sizes = [8, 16], strides = [1, 1]} : vector<8x64xf32> to vector<8x16xf32>
    %113 = math.tanh %112 : vector<8x16xf32>
    %114 = arith.mulf %110, %75 : vector<8x16xf32>
    %115 = arith.mulf %109, %113 : vector<8x16xf32>
    %116 = arith.addf %114, %115 : vector<8x16xf32>
    %117 = math.tanh %116 : vector<8x16xf32>
    %118 = arith.mulf %111, %117 : vector<8x16xf32>
    %119 = arith.truncf %118 : vector<8x16xf32> to vector<8x16xbf16>
    %cst_39 = arith.constant dense<0.000000e+00> : vector<8x64xf32>
    %120 = tpu.matmul %119, %41, %cst_39 {dimension_numbers = #tpu.dot_dimension_numbers<[1], [0], [0], [1], [0, 0, 1, 1], [], []>} : vector<8x16xbf16>, vector<16x64xbf16>, vector<8x64xf32> -> vector<8x64xf32>
    %121 = arith.addf %120, %54 : vector<8x64xf32>
    %122 = arith.truncf %98 : vector<8x16xf32> to vector<8x16xbf16>
    %cst_40 = arith.constant dense<0.000000e+00> : vector<8x64xf32>
    %123 = tpu.matmul %122, %43, %cst_40 {dimension_numbers = #tpu.dot_dimension_numbers<[1], [0], [0], [1], [0, 0, 1, 1], [], []>} : vector<8x16xbf16>, vector<16x64xbf16>, vector<8x64xf32> -> vector<8x64xf32>
    %124 = arith.addf %121, %123 : vector<8x64xf32>
    %125 = arith.negf %124 : vector<8x64xf32>
    %126 = math.exp %125 : vector<8x64xf32>
    %cst_41 = arith.constant 1.000000e+00 : f32
    %127 = vector.broadcast %cst_41 : f32 to vector<8x64xf32>
    %128 = arith.addf %127, %126 : vector<8x64xf32>
    %129 = arith.divf %127, %128 : vector<8x64xf32>
    %130 = vector.extract_strided_slice %129 {offsets = [0, 0], sizes = [8, 16], strides = [1, 1]} : vector<8x64xf32> to vector<8x16xf32>
    %131 = vector.extract_strided_slice %129 {offsets = [0, 16], sizes = [8, 16], strides = [1, 1]} : vector<8x64xf32> to vector<8x16xf32>
    %132 = vector.extract_strided_slice %129 {offsets = [0, 48], sizes = [8, 16], strides = [1, 1]} : vector<8x64xf32> to vector<8x16xf32>
    %133 = vector.extract_strided_slice %124 {offsets = [0, 32], sizes = [8, 16], strides = [1, 1]} : vector<8x64xf32> to vector<8x16xf32>
    %134 = math.tanh %133 : vector<8x16xf32>
    %135 = arith.mulf %131, %96 : vector<8x16xf32>
    %136 = arith.mulf %130, %134 : vector<8x16xf32>
    %137 = arith.addf %135, %136 : vector<8x16xf32>
    %138 = math.tanh %137 : vector<8x16xf32>
    %139 = arith.mulf %132, %138 : vector<8x16xf32>
    %140 = vector.extract_strided_slice %139 {offsets = [2, 0], sizes = [1, 16], strides = [1, 1]} : vector<8x16xf32> to vector<1x16xf32>
    %141 = vector.extract_strided_slice %51 {offsets = [16, 0], sizes = [8, 64], strides = [1, 1]} : vector<32x64xf32> to vector<8x64xf32>
    %142 = arith.truncf %118 : vector<8x16xf32> to vector<8x16xbf16>
    %cst_42 = arith.constant dense<0.000000e+00> : vector<8x64xf32>
    %143 = tpu.matmul %142, %39, %cst_42 {dimension_numbers = #tpu.dot_dimension_numbers<[1], [0], [0], [1], [0, 0, 1, 1], [], []>} : vector<8x16xbf16>, vector<16x64xbf16>, vector<8x64xf32> -> vector<8x64xf32>
    %144 = arith.addf %141, %143 : vector<8x64xf32>
    %145 = arith.negf %144 : vector<8x64xf32>
    %146 = math.exp %145 : vector<8x64xf32>
    %cst_43 = arith.constant 1.000000e+00 : f32
    %147 = vector.broadcast %cst_43 : f32 to vector<8x64xf32>
    %148 = arith.addf %147, %146 : vector<8x64xf32>
    %149 = arith.divf %147, %148 : vector<8x64xf32>
    %150 = vector.extract_strided_slice %149 {offsets = [0, 0], sizes = [8, 16], strides = [1, 1]} : vector<8x64xf32> to vector<8x16xf32>
    %151 = vector.extract_strided_slice %149 {offsets = [0, 16], sizes = [8, 16], strides = [1, 1]} : vector<8x64xf32> to vector<8x16xf32>
    %152 = vector.extract_strided_slice %149 {offsets = [0, 48], sizes = [8, 16], strides = [1, 1]} : vector<8x64xf32> to vector<8x16xf32>
    %153 = vector.extract_strided_slice %144 {offsets = [0, 32], sizes = [8, 16], strides = [1, 1]} : vector<8x64xf32> to vector<8x16xf32>
    %154 = math.tanh %153 : vector<8x16xf32>
    %155 = arith.mulf %151, %116 : vector<8x16xf32>
    %156 = arith.mulf %150, %154 : vector<8x16xf32>
    %157 = arith.addf %155, %156 : vector<8x16xf32>
    %158 = math.tanh %157 : vector<8x16xf32>
    %159 = arith.mulf %152, %158 : vector<8x16xf32>
    %160 = arith.truncf %159 : vector<8x16xf32> to vector<8x16xbf16>
    %cst_44 = arith.constant dense<0.000000e+00> : vector<8x64xf32>
    %161 = tpu.matmul %160, %41, %cst_44 {dimension_numbers = #tpu.dot_dimension_numbers<[1], [0], [0], [1], [0, 0, 1, 1], [], []>} : vector<8x16xbf16>, vector<16x64xbf16>, vector<8x64xf32> -> vector<8x64xf32>
    %162 = arith.addf %161, %54 : vector<8x64xf32>
    %163 = arith.truncf %139 : vector<8x16xf32> to vector<8x16xbf16>
    %cst_45 = arith.constant dense<0.000000e+00> : vector<8x64xf32>
    %164 = tpu.matmul %163, %43, %cst_45 {dimension_numbers = #tpu.dot_dimension_numbers<[1], [0], [0], [1], [0, 0, 1, 1], [], []>} : vector<8x16xbf16>, vector<16x64xbf16>, vector<8x64xf32> -> vector<8x64xf32>
    %165 = arith.addf %162, %164 : vector<8x64xf32>
    %166 = arith.negf %165 : vector<8x64xf32>
    %167 = math.exp %166 : vector<8x64xf32>
    %cst_46 = arith.constant 1.000000e+00 : f32
    %168 = vector.broadcast %cst_46 : f32 to vector<8x64xf32>
    %169 = arith.addf %168, %167 : vector<8x64xf32>
    %170 = arith.divf %168, %169 : vector<8x64xf32>
    %171 = vector.extract_strided_slice %170 {offsets = [0, 0], sizes = [8, 16], strides = [1, 1]} : vector<8x64xf32> to vector<8x16xf32>
    %172 = vector.extract_strided_slice %170 {offsets = [0, 16], sizes = [8, 16], strides = [1, 1]} : vector<8x64xf32> to vector<8x16xf32>
    %173 = vector.extract_strided_slice %170 {offsets = [0, 48], sizes = [8, 16], strides = [1, 1]} : vector<8x64xf32> to vector<8x16xf32>
    %174 = vector.extract_strided_slice %165 {offsets = [0, 32], sizes = [8, 16], strides = [1, 1]} : vector<8x64xf32> to vector<8x16xf32>
    %175 = math.tanh %174 : vector<8x16xf32>
    %176 = arith.mulf %172, %137 : vector<8x16xf32>
    %177 = arith.mulf %171, %175 : vector<8x16xf32>
    %178 = arith.addf %176, %177 : vector<8x16xf32>
    %179 = math.tanh %178 : vector<8x16xf32>
    %180 = arith.mulf %173, %179 : vector<8x16xf32>
    %181 = vector.extract_strided_slice %180 {offsets = [2, 0], sizes = [1, 16], strides = [1, 1]} : vector<8x16xf32> to vector<1x16xf32>
    %182 = vector.extract_strided_slice %51 {offsets = [24, 0], sizes = [8, 64], strides = [1, 1]} : vector<32x64xf32> to vector<8x64xf32>
    %183 = arith.truncf %159 : vector<8x16xf32> to vector<8x16xbf16>
    %cst_47 = arith.constant dense<0.000000e+00> : vector<8x64xf32>
    %184 = tpu.matmul %183, %39, %cst_47 {dimension_numbers = #tpu.dot_dimension_numbers<[1], [0], [0], [1], [0, 0, 1, 1], [], []>} : vector<8x16xbf16>, vector<16x64xbf16>, vector<8x64xf32> -> vector<8x64xf32>
    %185 = arith.addf %182, %184 : vector<8x64xf32>
    %186 = arith.negf %185 : vector<8x64xf32>
    %187 = math.exp %186 : vector<8x64xf32>
    %cst_48 = arith.constant 1.000000e+00 : f32
    %188 = vector.broadcast %cst_48 : f32 to vector<8x64xf32>
    %189 = arith.addf %188, %187 : vector<8x64xf32>
    %190 = arith.divf %188, %189 : vector<8x64xf32>
    %191 = vector.extract_strided_slice %190 {offsets = [0, 0], sizes = [8, 16], strides = [1, 1]} : vector<8x64xf32> to vector<8x16xf32>
    %192 = vector.extract_strided_slice %190 {offsets = [0, 16], sizes = [8, 16], strides = [1, 1]} : vector<8x64xf32> to vector<8x16xf32>
    %193 = vector.extract_strided_slice %190 {offsets = [0, 48], sizes = [8, 16], strides = [1, 1]} : vector<8x64xf32> to vector<8x16xf32>
    %194 = vector.extract_strided_slice %185 {offsets = [0, 32], sizes = [8, 16], strides = [1, 1]} : vector<8x64xf32> to vector<8x16xf32>
    %195 = math.tanh %194 : vector<8x16xf32>
    %196 = arith.mulf %192, %157 : vector<8x16xf32>
    %197 = arith.mulf %191, %195 : vector<8x16xf32>
    %198 = arith.addf %196, %197 : vector<8x16xf32>
    %199 = math.tanh %198 : vector<8x16xf32>
    %200 = arith.mulf %193, %199 : vector<8x16xf32>
    %201 = arith.truncf %200 : vector<8x16xf32> to vector<8x16xbf16>
    %cst_49 = arith.constant dense<0.000000e+00> : vector<8x64xf32>
    %202 = tpu.matmul %201, %41, %cst_49 {dimension_numbers = #tpu.dot_dimension_numbers<[1], [0], [0], [1], [0, 0, 1, 1], [], []>} : vector<8x16xbf16>, vector<16x64xbf16>, vector<8x64xf32> -> vector<8x64xf32>
    %203 = arith.addf %202, %54 : vector<8x64xf32>
    %204 = arith.truncf %180 : vector<8x16xf32> to vector<8x16xbf16>
    %cst_50 = arith.constant dense<0.000000e+00> : vector<8x64xf32>
    %205 = tpu.matmul %204, %43, %cst_50 {dimension_numbers = #tpu.dot_dimension_numbers<[1], [0], [0], [1], [0, 0, 1, 1], [], []>} : vector<8x16xbf16>, vector<16x64xbf16>, vector<8x64xf32> -> vector<8x64xf32>
    %206 = arith.addf %203, %205 : vector<8x64xf32>
    %207 = arith.negf %206 : vector<8x64xf32>
    %208 = math.exp %207 : vector<8x64xf32>
    %cst_51 = arith.constant 1.000000e+00 : f32
    %209 = vector.broadcast %cst_51 : f32 to vector<8x64xf32>
    %210 = arith.addf %209, %208 : vector<8x64xf32>
    %211 = arith.divf %209, %210 : vector<8x64xf32>
    %212 = vector.extract_strided_slice %211 {offsets = [0, 0], sizes = [8, 16], strides = [1, 1]} : vector<8x64xf32> to vector<8x16xf32>
    %213 = vector.extract_strided_slice %211 {offsets = [0, 16], sizes = [8, 16], strides = [1, 1]} : vector<8x64xf32> to vector<8x16xf32>
    %214 = vector.extract_strided_slice %211 {offsets = [0, 48], sizes = [8, 16], strides = [1, 1]} : vector<8x64xf32> to vector<8x16xf32>
    %215 = vector.extract_strided_slice %206 {offsets = [0, 32], sizes = [8, 16], strides = [1, 1]} : vector<8x64xf32> to vector<8x16xf32>
    %216 = math.tanh %215 : vector<8x16xf32>
    %217 = arith.mulf %213, %178 : vector<8x16xf32>
    %218 = arith.mulf %212, %216 : vector<8x16xf32>
    %219 = arith.addf %217, %218 : vector<8x16xf32>
    %220 = math.tanh %219 : vector<8x16xf32>
    %221 = arith.mulf %214, %220 : vector<8x16xf32>
    %222 = vector.extract_strided_slice %221 {offsets = [2, 0], sizes = [1, 16], strides = [1, 1]} : vector<8x16xf32> to vector<1x16xf32>
    %cst_52 = arith.constant 0.000000e+00 : f32
    %223 = vector.broadcast %cst_52 : f32 to vector<4x16xf32>
    %224 = tpu.concatenate %99, %140, %181, %222, %223 in 0 : vector<1x16xf32>, vector<1x16xf32>, vector<1x16xf32>, vector<1x16xf32>, vector<4x16xf32> -> vector<8x16xf32>
    %225 = arith.truncf %224 : vector<8x16xf32> to vector<8x16xbf16>
    %c136 = arith.constant 136 : index
    %c0_53 = arith.constant 0 : index
    %226 = vector.load %arg0[%c136, %c0_53] : memref<472x128xf32, #tpu.memory_space<vmem>>, vector<16x16xf32>
    %227 = arith.truncf %226 : vector<16x16xf32> to vector<16x16xbf16>
    %cst_54 = arith.constant dense<0.000000e+00> : vector<8x16xf32>
    %228 = tpu.matmul %225, %227, %cst_54 {dimension_numbers = #tpu.dot_dimension_numbers<[1], [0], [0], [1], [0, 0, 1, 1], [], []>} : vector<8x16xbf16>, vector<16x16xbf16>, vector<8x16xf32> -> vector<8x16xf32>
    %c152 = arith.constant 152 : index
    %c0_55 = arith.constant 0 : index
    %229 = vector.load %arg0[%c152, %c0_55] : memref<472x128xf32, #tpu.memory_space<vmem>>, vector<1x16xf32>
    %230 = vector.broadcast %229 : vector<1x16xf32> to vector<8x16xf32>
    %231 = arith.addf %228, %230 : vector<8x16xf32>
    %c136_56 = arith.constant 136 : index
    %c0_57 = arith.constant 0 : index
    %232 = vector.load %arg1[%c136_56, %c0_57] : memref<200x128xf32, #tpu.memory_space<vmem>>, vector<64x1xf32>
    %233 = vector.extract_strided_slice %232 {offsets = [0, 0], sizes = [8, 1], strides = [1, 1]} : vector<64x1xf32> to vector<8x1xf32>
    %234 = vector.extract_strided_slice %232 {offsets = [8, 0], sizes = [8, 1], strides = [1, 1]} : vector<64x1xf32> to vector<8x1xf32>
    %235 = vector.extract_strided_slice %232 {offsets = [16, 0], sizes = [8, 1], strides = [1, 1]} : vector<64x1xf32> to vector<8x1xf32>
    %236 = vector.extract_strided_slice %232 {offsets = [24, 0], sizes = [8, 1], strides = [1, 1]} : vector<64x1xf32> to vector<8x1xf32>
    %237 = vector.extract_strided_slice %232 {offsets = [32, 0], sizes = [8, 1], strides = [1, 1]} : vector<64x1xf32> to vector<8x1xf32>
    %238 = vector.extract_strided_slice %232 {offsets = [40, 0], sizes = [8, 1], strides = [1, 1]} : vector<64x1xf32> to vector<8x1xf32>
    %239 = vector.extract_strided_slice %232 {offsets = [48, 0], sizes = [8, 1], strides = [1, 1]} : vector<64x1xf32> to vector<8x1xf32>
    %240 = vector.extract_strided_slice %232 {offsets = [56, 0], sizes = [8, 1], strides = [1, 1]} : vector<64x1xf32> to vector<8x1xf32>
    %c72_58 = arith.constant 72 : index
    %c0_59 = arith.constant 0 : index
    %241 = vector.load %arg1[%c72_58, %c0_59] : memref<200x128xf32, #tpu.memory_space<vmem>>, vector<64x100xf32>
    %242 = arith.truncf %241 : vector<64x100xf32> to vector<64x100xbf16>
    %c160 = arith.constant 160 : index
    %c0_60 = arith.constant 0 : index
    %243 = vector.load %arg0[%c160, %c0_60] : memref<472x128xf32, #tpu.memory_space<vmem>>, vector<100x128xf32>
    %244 = arith.truncf %243 : vector<100x128xf32> to vector<100x128xbf16>
    %cst_61 = arith.constant dense<0.000000e+00> : vector<64x128xf32>
    %245 = tpu.matmul %242, %244, %cst_61 {dimension_numbers = #tpu.dot_dimension_numbers<[1], [0], [0], [1], [0, 0, 1, 1], [], []>} : vector<64x100xbf16>, vector<100x128xbf16>, vector<64x128xf32> -> vector<64x128xf32>
    %c296 = arith.constant 296 : index
    %c0_62 = arith.constant 0 : index
    %246 = vector.load %arg0[%c296, %c0_62] : memref<472x128xf32, #tpu.memory_space<vmem>>, vector<1x128xf32>
    %247 = vector.broadcast %246 : vector<1x128xf32> to vector<64x128xf32>
    %248 = arith.addf %245, %247 : vector<64x128xf32>
    %c264 = arith.constant 264 : index
    %c0_63 = arith.constant 0 : index
    %249 = vector.load %arg0[%c264, %c0_63] : memref<472x128xf32, #tpu.memory_space<vmem>>, vector<16x64xf32>
    %250 = arith.truncf %249 : vector<16x64xf32> to vector<16x64xbf16>
    %c280 = arith.constant 280 : index
    %c0_64 = arith.constant 0 : index
    %251 = vector.load %arg0[%c280, %c0_64] : memref<472x128xf32, #tpu.memory_space<vmem>>, vector<16x64xf32>
    %252 = arith.truncf %251 : vector<16x64xf32> to vector<16x64xbf16>
    %cst_65 = arith.constant 0.000000e+00 : f32
    %253 = vector.broadcast %cst_65 : f32 to vector<8x16xf32>
    %cst_66 = arith.constant 0.000000e+00 : f32
    %254 = vector.broadcast %cst_66 : f32 to vector<8x16xf32>
    %cst_67 = arith.constant 0.000000e+00 : f32
    %255 = vector.broadcast %cst_67 : f32 to vector<8x16xf32>
    %cst_68 = arith.constant 0.000000e+00 : f32
    %256 = vector.broadcast %cst_68 : f32 to vector<8x16xf32>
    %257 = vector.extract_strided_slice %248 {offsets = [0, 0], sizes = [8, 64], strides = [1, 1]} : vector<64x128xf32> to vector<8x64xf32>
    %258 = arith.truncf %253 : vector<8x16xf32> to vector<8x16xbf16>
    %cst_69 = arith.constant dense<0.000000e+00> : vector<8x64xf32>
    %259 = tpu.matmul %258, %250, %cst_69 {dimension_numbers = #tpu.dot_dimension_numbers<[1], [0], [0], [1], [0, 0, 1, 1], [], []>} : vector<8x16xbf16>, vector<16x64xbf16>, vector<8x64xf32> -> vector<8x64xf32>
    %260 = arith.addf %257, %259 : vector<8x64xf32>
    %261 = arith.negf %260 : vector<8x64xf32>
    %262 = math.exp %261 : vector<8x64xf32>
    %cst_70 = arith.constant 1.000000e+00 : f32
    %263 = vector.broadcast %cst_70 : f32 to vector<8x64xf32>
    %264 = arith.addf %263, %262 : vector<8x64xf32>
    %265 = arith.divf %263, %264 : vector<8x64xf32>
    %266 = vector.extract_strided_slice %265 {offsets = [0, 0], sizes = [8, 16], strides = [1, 1]} : vector<8x64xf32> to vector<8x16xf32>
    %267 = vector.extract_strided_slice %265 {offsets = [0, 16], sizes = [8, 16], strides = [1, 1]} : vector<8x64xf32> to vector<8x16xf32>
    %268 = vector.extract_strided_slice %265 {offsets = [0, 48], sizes = [8, 16], strides = [1, 1]} : vector<8x64xf32> to vector<8x16xf32>
    %269 = vector.extract_strided_slice %260 {offsets = [0, 32], sizes = [8, 16], strides = [1, 1]} : vector<8x64xf32> to vector<8x16xf32>
    %270 = math.tanh %269 : vector<8x16xf32>
    %271 = arith.mulf %267, %254 : vector<8x16xf32>
    %272 = arith.mulf %266, %270 : vector<8x16xf32>
    %273 = arith.addf %271, %272 : vector<8x16xf32>
    %274 = math.tanh %273 : vector<8x16xf32>
    %275 = arith.mulf %268, %274 : vector<8x16xf32>
    %276 = arith.subf %275, %253 : vector<8x16xf32>
    %277 = vector.broadcast %233 : vector<8x1xf32> to vector<8x16xf32>
    %278 = arith.mulf %277, %276 : vector<8x16xf32>
    %279 = arith.addf %253, %278 : vector<8x16xf32>
    %280 = arith.subf %273, %254 : vector<8x16xf32>
    %281 = vector.broadcast %233 : vector<8x1xf32> to vector<8x16xf32>
    %282 = arith.mulf %281, %280 : vector<8x16xf32>
    %283 = arith.addf %254, %282 : vector<8x16xf32>
    %284 = vector.extract_strided_slice %248 {offsets = [56, 64], sizes = [8, 64], strides = [1, 1]} : vector<64x128xf32> to vector<8x64xf32>
    %285 = arith.truncf %255 : vector<8x16xf32> to vector<8x16xbf16>
    %cst_71 = arith.constant dense<0.000000e+00> : vector<8x64xf32>
    %286 = tpu.matmul %285, %252, %cst_71 {dimension_numbers = #tpu.dot_dimension_numbers<[1], [0], [0], [1], [0, 0, 1, 1], [], []>} : vector<8x16xbf16>, vector<16x64xbf16>, vector<8x64xf32> -> vector<8x64xf32>
    %287 = arith.addf %284, %286 : vector<8x64xf32>
    %288 = arith.negf %287 : vector<8x64xf32>
    %289 = math.exp %288 : vector<8x64xf32>
    %cst_72 = arith.constant 1.000000e+00 : f32
    %290 = vector.broadcast %cst_72 : f32 to vector<8x64xf32>
    %291 = arith.addf %290, %289 : vector<8x64xf32>
    %292 = arith.divf %290, %291 : vector<8x64xf32>
    %293 = vector.extract_strided_slice %292 {offsets = [0, 0], sizes = [8, 16], strides = [1, 1]} : vector<8x64xf32> to vector<8x16xf32>
    %294 = vector.extract_strided_slice %292 {offsets = [0, 16], sizes = [8, 16], strides = [1, 1]} : vector<8x64xf32> to vector<8x16xf32>
    %295 = vector.extract_strided_slice %292 {offsets = [0, 48], sizes = [8, 16], strides = [1, 1]} : vector<8x64xf32> to vector<8x16xf32>
    %296 = vector.extract_strided_slice %287 {offsets = [0, 32], sizes = [8, 16], strides = [1, 1]} : vector<8x64xf32> to vector<8x16xf32>
    %297 = math.tanh %296 : vector<8x16xf32>
    %298 = arith.mulf %294, %256 : vector<8x16xf32>
    %299 = arith.mulf %293, %297 : vector<8x16xf32>
    %300 = arith.addf %298, %299 : vector<8x16xf32>
    %301 = math.tanh %300 : vector<8x16xf32>
    %302 = arith.mulf %295, %301 : vector<8x16xf32>
    %303 = arith.subf %302, %255 : vector<8x16xf32>
    %304 = vector.broadcast %240 : vector<8x1xf32> to vector<8x16xf32>
    %305 = arith.mulf %304, %303 : vector<8x16xf32>
    %306 = arith.addf %255, %305 : vector<8x16xf32>
    %307 = arith.subf %300, %256 : vector<8x16xf32>
    %308 = vector.broadcast %240 : vector<8x1xf32> to vector<8x16xf32>
    %309 = arith.mulf %308, %307 : vector<8x16xf32>
    %310 = arith.addf %256, %309 : vector<8x16xf32>
    %311 = vector.extract_strided_slice %248 {offsets = [8, 0], sizes = [8, 64], strides = [1, 1]} : vector<64x128xf32> to vector<8x64xf32>
    %312 = arith.truncf %279 : vector<8x16xf32> to vector<8x16xbf16>
    %cst_73 = arith.constant dense<0.000000e+00> : vector<8x64xf32>
    %313 = tpu.matmul %312, %250, %cst_73 {dimension_numbers = #tpu.dot_dimension_numbers<[1], [0], [0], [1], [0, 0, 1, 1], [], []>} : vector<8x16xbf16>, vector<16x64xbf16>, vector<8x64xf32> -> vector<8x64xf32>
    %314 = arith.addf %311, %313 : vector<8x64xf32>
    %315 = arith.negf %314 : vector<8x64xf32>
    %316 = math.exp %315 : vector<8x64xf32>
    %cst_74 = arith.constant 1.000000e+00 : f32
    %317 = vector.broadcast %cst_74 : f32 to vector<8x64xf32>
    %318 = arith.addf %317, %316 : vector<8x64xf32>
    %319 = arith.divf %317, %318 : vector<8x64xf32>
    %320 = vector.extract_strided_slice %319 {offsets = [0, 0], sizes = [8, 16], strides = [1, 1]} : vector<8x64xf32> to vector<8x16xf32>
    %321 = vector.extract_strided_slice %319 {offsets = [0, 16], sizes = [8, 16], strides = [1, 1]} : vector<8x64xf32> to vector<8x16xf32>
    %322 = vector.extract_strided_slice %319 {offsets = [0, 48], sizes = [8, 16], strides = [1, 1]} : vector<8x64xf32> to vector<8x16xf32>
    %323 = vector.extract_strided_slice %314 {offsets = [0, 32], sizes = [8, 16], strides = [1, 1]} : vector<8x64xf32> to vector<8x16xf32>
    %324 = math.tanh %323 : vector<8x16xf32>
    %325 = arith.mulf %321, %283 : vector<8x16xf32>
    %326 = arith.mulf %320, %324 : vector<8x16xf32>
    %327 = arith.addf %325, %326 : vector<8x16xf32>
    %328 = math.tanh %327 : vector<8x16xf32>
    %329 = arith.mulf %322, %328 : vector<8x16xf32>
    %330 = arith.subf %329, %279 : vector<8x16xf32>
    %331 = vector.broadcast %234 : vector<8x1xf32> to vector<8x16xf32>
    %332 = arith.mulf %331, %330 : vector<8x16xf32>
    %333 = arith.addf %279, %332 : vector<8x16xf32>
    %334 = arith.subf %327, %283 : vector<8x16xf32>
    %335 = vector.broadcast %234 : vector<8x1xf32> to vector<8x16xf32>
    %336 = arith.mulf %335, %334 : vector<8x16xf32>
    %337 = arith.addf %283, %336 : vector<8x16xf32>
    %338 = vector.extract_strided_slice %248 {offsets = [48, 64], sizes = [8, 64], strides = [1, 1]} : vector<64x128xf32> to vector<8x64xf32>
    %339 = arith.truncf %306 : vector<8x16xf32> to vector<8x16xbf16>
    %cst_75 = arith.constant dense<0.000000e+00> : vector<8x64xf32>
    %340 = tpu.matmul %339, %252, %cst_75 {dimension_numbers = #tpu.dot_dimension_numbers<[1], [0], [0], [1], [0, 0, 1, 1], [], []>} : vector<8x16xbf16>, vector<16x64xbf16>, vector<8x64xf32> -> vector<8x64xf32>
    %341 = arith.addf %338, %340 : vector<8x64xf32>
    %342 = arith.negf %341 : vector<8x64xf32>
    %343 = math.exp %342 : vector<8x64xf32>
    %cst_76 = arith.constant 1.000000e+00 : f32
    %344 = vector.broadcast %cst_76 : f32 to vector<8x64xf32>
    %345 = arith.addf %344, %343 : vector<8x64xf32>
    %346 = arith.divf %344, %345 : vector<8x64xf32>
    %347 = vector.extract_strided_slice %346 {offsets = [0, 0], sizes = [8, 16], strides = [1, 1]} : vector<8x64xf32> to vector<8x16xf32>
    %348 = vector.extract_strided_slice %346 {offsets = [0, 16], sizes = [8, 16], strides = [1, 1]} : vector<8x64xf32> to vector<8x16xf32>
    %349 = vector.extract_strided_slice %346 {offsets = [0, 48], sizes = [8, 16], strides = [1, 1]} : vector<8x64xf32> to vector<8x16xf32>
    %350 = vector.extract_strided_slice %341 {offsets = [0, 32], sizes = [8, 16], strides = [1, 1]} : vector<8x64xf32> to vector<8x16xf32>
    %351 = math.tanh %350 : vector<8x16xf32>
    %352 = arith.mulf %348, %310 : vector<8x16xf32>
    %353 = arith.mulf %347, %351 : vector<8x16xf32>
    %354 = arith.addf %352, %353 : vector<8x16xf32>
    %355 = math.tanh %354 : vector<8x16xf32>
    %356 = arith.mulf %349, %355 : vector<8x16xf32>
    %357 = arith.subf %356, %306 : vector<8x16xf32>
    %358 = vector.broadcast %239 : vector<8x1xf32> to vector<8x16xf32>
    %359 = arith.mulf %358, %357 : vector<8x16xf32>
    %360 = arith.addf %306, %359 : vector<8x16xf32>
    %361 = arith.subf %354, %310 : vector<8x16xf32>
    %362 = vector.broadcast %239 : vector<8x1xf32> to vector<8x16xf32>
    %363 = arith.mulf %362, %361 : vector<8x16xf32>
    %364 = arith.addf %310, %363 : vector<8x16xf32>
    %365 = vector.extract_strided_slice %248 {offsets = [16, 0], sizes = [8, 64], strides = [1, 1]} : vector<64x128xf32> to vector<8x64xf32>
    %366 = arith.truncf %333 : vector<8x16xf32> to vector<8x16xbf16>
    %cst_77 = arith.constant dense<0.000000e+00> : vector<8x64xf32>
    %367 = tpu.matmul %366, %250, %cst_77 {dimension_numbers = #tpu.dot_dimension_numbers<[1], [0], [0], [1], [0, 0, 1, 1], [], []>} : vector<8x16xbf16>, vector<16x64xbf16>, vector<8x64xf32> -> vector<8x64xf32>
    %368 = arith.addf %365, %367 : vector<8x64xf32>
    %369 = arith.negf %368 : vector<8x64xf32>
    %370 = math.exp %369 : vector<8x64xf32>
    %cst_78 = arith.constant 1.000000e+00 : f32
    %371 = vector.broadcast %cst_78 : f32 to vector<8x64xf32>
    %372 = arith.addf %371, %370 : vector<8x64xf32>
    %373 = arith.divf %371, %372 : vector<8x64xf32>
    %374 = vector.extract_strided_slice %373 {offsets = [0, 0], sizes = [8, 16], strides = [1, 1]} : vector<8x64xf32> to vector<8x16xf32>
    %375 = vector.extract_strided_slice %373 {offsets = [0, 16], sizes = [8, 16], strides = [1, 1]} : vector<8x64xf32> to vector<8x16xf32>
    %376 = vector.extract_strided_slice %373 {offsets = [0, 48], sizes = [8, 16], strides = [1, 1]} : vector<8x64xf32> to vector<8x16xf32>
    %377 = vector.extract_strided_slice %368 {offsets = [0, 32], sizes = [8, 16], strides = [1, 1]} : vector<8x64xf32> to vector<8x16xf32>
    %378 = math.tanh %377 : vector<8x16xf32>
    %379 = arith.mulf %375, %337 : vector<8x16xf32>
    %380 = arith.mulf %374, %378 : vector<8x16xf32>
    %381 = arith.addf %379, %380 : vector<8x16xf32>
    %382 = math.tanh %381 : vector<8x16xf32>
    %383 = arith.mulf %376, %382 : vector<8x16xf32>
    %384 = arith.subf %383, %333 : vector<8x16xf32>
    %385 = vector.broadcast %235 : vector<8x1xf32> to vector<8x16xf32>
    %386 = arith.mulf %385, %384 : vector<8x16xf32>
    %387 = arith.addf %333, %386 : vector<8x16xf32>
    %388 = arith.subf %381, %337 : vector<8x16xf32>
    %389 = vector.broadcast %235 : vector<8x1xf32> to vector<8x16xf32>
    %390 = arith.mulf %389, %388 : vector<8x16xf32>
    %391 = arith.addf %337, %390 : vector<8x16xf32>
    %392 = vector.extract_strided_slice %248 {offsets = [40, 64], sizes = [8, 64], strides = [1, 1]} : vector<64x128xf32> to vector<8x64xf32>
    %393 = arith.truncf %360 : vector<8x16xf32> to vector<8x16xbf16>
    %cst_79 = arith.constant dense<0.000000e+00> : vector<8x64xf32>
    %394 = tpu.matmul %393, %252, %cst_79 {dimension_numbers = #tpu.dot_dimension_numbers<[1], [0], [0], [1], [0, 0, 1, 1], [], []>} : vector<8x16xbf16>, vector<16x64xbf16>, vector<8x64xf32> -> vector<8x64xf32>
    %395 = arith.addf %392, %394 : vector<8x64xf32>
    %396 = arith.negf %395 : vector<8x64xf32>
    %397 = math.exp %396 : vector<8x64xf32>
    %cst_80 = arith.constant 1.000000e+00 : f32
    %398 = vector.broadcast %cst_80 : f32 to vector<8x64xf32>
    %399 = arith.addf %398, %397 : vector<8x64xf32>
    %400 = arith.divf %398, %399 : vector<8x64xf32>
    %401 = vector.extract_strided_slice %400 {offsets = [0, 0], sizes = [8, 16], strides = [1, 1]} : vector<8x64xf32> to vector<8x16xf32>
    %402 = vector.extract_strided_slice %400 {offsets = [0, 16], sizes = [8, 16], strides = [1, 1]} : vector<8x64xf32> to vector<8x16xf32>
    %403 = vector.extract_strided_slice %400 {offsets = [0, 48], sizes = [8, 16], strides = [1, 1]} : vector<8x64xf32> to vector<8x16xf32>
    %404 = vector.extract_strided_slice %395 {offsets = [0, 32], sizes = [8, 16], strides = [1, 1]} : vector<8x64xf32> to vector<8x16xf32>
    %405 = math.tanh %404 : vector<8x16xf32>
    %406 = arith.mulf %402, %364 : vector<8x16xf32>
    %407 = arith.mulf %401, %405 : vector<8x16xf32>
    %408 = arith.addf %406, %407 : vector<8x16xf32>
    %409 = math.tanh %408 : vector<8x16xf32>
    %410 = arith.mulf %403, %409 : vector<8x16xf32>
    %411 = arith.subf %410, %360 : vector<8x16xf32>
    %412 = vector.broadcast %238 : vector<8x1xf32> to vector<8x16xf32>
    %413 = arith.mulf %412, %411 : vector<8x16xf32>
    %414 = arith.addf %360, %413 : vector<8x16xf32>
    %415 = arith.subf %408, %364 : vector<8x16xf32>
    %416 = vector.broadcast %238 : vector<8x1xf32> to vector<8x16xf32>
    %417 = arith.mulf %416, %415 : vector<8x16xf32>
    %418 = arith.addf %364, %417 : vector<8x16xf32>
    %419 = vector.extract_strided_slice %248 {offsets = [24, 0], sizes = [8, 64], strides = [1, 1]} : vector<64x128xf32> to vector<8x64xf32>
    %420 = arith.truncf %387 : vector<8x16xf32> to vector<8x16xbf16>
    %cst_81 = arith.constant dense<0.000000e+00> : vector<8x64xf32>
    %421 = tpu.matmul %420, %250, %cst_81 {dimension_numbers = #tpu.dot_dimension_numbers<[1], [0], [0], [1], [0, 0, 1, 1], [], []>} : vector<8x16xbf16>, vector<16x64xbf16>, vector<8x64xf32> -> vector<8x64xf32>
    %422 = arith.addf %419, %421 : vector<8x64xf32>
    %423 = arith.negf %422 : vector<8x64xf32>
    %424 = math.exp %423 : vector<8x64xf32>
    %cst_82 = arith.constant 1.000000e+00 : f32
    %425 = vector.broadcast %cst_82 : f32 to vector<8x64xf32>
    %426 = arith.addf %425, %424 : vector<8x64xf32>
    %427 = arith.divf %425, %426 : vector<8x64xf32>
    %428 = vector.extract_strided_slice %427 {offsets = [0, 0], sizes = [8, 16], strides = [1, 1]} : vector<8x64xf32> to vector<8x16xf32>
    %429 = vector.extract_strided_slice %427 {offsets = [0, 16], sizes = [8, 16], strides = [1, 1]} : vector<8x64xf32> to vector<8x16xf32>
    %430 = vector.extract_strided_slice %427 {offsets = [0, 48], sizes = [8, 16], strides = [1, 1]} : vector<8x64xf32> to vector<8x16xf32>
    %431 = vector.extract_strided_slice %422 {offsets = [0, 32], sizes = [8, 16], strides = [1, 1]} : vector<8x64xf32> to vector<8x16xf32>
    %432 = math.tanh %431 : vector<8x16xf32>
    %433 = arith.mulf %429, %391 : vector<8x16xf32>
    %434 = arith.mulf %428, %432 : vector<8x16xf32>
    %435 = arith.addf %433, %434 : vector<8x16xf32>
    %436 = math.tanh %435 : vector<8x16xf32>
    %437 = arith.mulf %430, %436 : vector<8x16xf32>
    %438 = arith.subf %437, %387 : vector<8x16xf32>
    %439 = vector.broadcast %236 : vector<8x1xf32> to vector<8x16xf32>
    %440 = arith.mulf %439, %438 : vector<8x16xf32>
    %441 = arith.addf %387, %440 : vector<8x16xf32>
    %442 = arith.subf %435, %391 : vector<8x16xf32>
    %443 = vector.broadcast %236 : vector<8x1xf32> to vector<8x16xf32>
    %444 = arith.mulf %443, %442 : vector<8x16xf32>
    %445 = arith.addf %391, %444 : vector<8x16xf32>
    %446 = vector.extract_strided_slice %248 {offsets = [32, 64], sizes = [8, 64], strides = [1, 1]} : vector<64x128xf32> to vector<8x64xf32>
    %447 = arith.truncf %414 : vector<8x16xf32> to vector<8x16xbf16>
    %cst_83 = arith.constant dense<0.000000e+00> : vector<8x64xf32>
    %448 = tpu.matmul %447, %252, %cst_83 {dimension_numbers = #tpu.dot_dimension_numbers<[1], [0], [0], [1], [0, 0, 1, 1], [], []>} : vector<8x16xbf16>, vector<16x64xbf16>, vector<8x64xf32> -> vector<8x64xf32>
    %449 = arith.addf %446, %448 : vector<8x64xf32>
    %450 = arith.negf %449 : vector<8x64xf32>
    %451 = math.exp %450 : vector<8x64xf32>
    %cst_84 = arith.constant 1.000000e+00 : f32
    %452 = vector.broadcast %cst_84 : f32 to vector<8x64xf32>
    %453 = arith.addf %452, %451 : vector<8x64xf32>
    %454 = arith.divf %452, %453 : vector<8x64xf32>
    %455 = vector.extract_strided_slice %454 {offsets = [0, 0], sizes = [8, 16], strides = [1, 1]} : vector<8x64xf32> to vector<8x16xf32>
    %456 = vector.extract_strided_slice %454 {offsets = [0, 16], sizes = [8, 16], strides = [1, 1]} : vector<8x64xf32> to vector<8x16xf32>
    %457 = vector.extract_strided_slice %454 {offsets = [0, 48], sizes = [8, 16], strides = [1, 1]} : vector<8x64xf32> to vector<8x16xf32>
    %458 = vector.extract_strided_slice %449 {offsets = [0, 32], sizes = [8, 16], strides = [1, 1]} : vector<8x64xf32> to vector<8x16xf32>
    %459 = math.tanh %458 : vector<8x16xf32>
    %460 = arith.mulf %456, %418 : vector<8x16xf32>
    %461 = arith.mulf %455, %459 : vector<8x16xf32>
    %462 = arith.addf %460, %461 : vector<8x16xf32>
    %463 = math.tanh %462 : vector<8x16xf32>
    %464 = arith.mulf %457, %463 : vector<8x16xf32>
    %465 = arith.subf %464, %414 : vector<8x16xf32>
    %466 = vector.broadcast %237 : vector<8x1xf32> to vector<8x16xf32>
    %467 = arith.mulf %466, %465 : vector<8x16xf32>
    %468 = arith.addf %414, %467 : vector<8x16xf32>
    %469 = arith.subf %462, %418 : vector<8x16xf32>
    %470 = vector.broadcast %237 : vector<8x1xf32> to vector<8x16xf32>
    %471 = arith.mulf %470, %469 : vector<8x16xf32>
    %472 = arith.addf %418, %471 : vector<8x16xf32>
    %473 = vector.extract_strided_slice %248 {offsets = [32, 0], sizes = [8, 64], strides = [1, 1]} : vector<64x128xf32> to vector<8x64xf32>
    %474 = arith.truncf %441 : vector<8x16xf32> to vector<8x16xbf16>
    %cst_85 = arith.constant dense<0.000000e+00> : vector<8x64xf32>
    %475 = tpu.matmul %474, %250, %cst_85 {dimension_numbers = #tpu.dot_dimension_numbers<[1], [0], [0], [1], [0, 0, 1, 1], [], []>} : vector<8x16xbf16>, vector<16x64xbf16>, vector<8x64xf32> -> vector<8x64xf32>
    %476 = arith.addf %473, %475 : vector<8x64xf32>
    %477 = arith.negf %476 : vector<8x64xf32>
    %478 = math.exp %477 : vector<8x64xf32>
    %cst_86 = arith.constant 1.000000e+00 : f32
    %479 = vector.broadcast %cst_86 : f32 to vector<8x64xf32>
    %480 = arith.addf %479, %478 : vector<8x64xf32>
    %481 = arith.divf %479, %480 : vector<8x64xf32>
    %482 = vector.extract_strided_slice %481 {offsets = [0, 0], sizes = [8, 16], strides = [1, 1]} : vector<8x64xf32> to vector<8x16xf32>
    %483 = vector.extract_strided_slice %481 {offsets = [0, 16], sizes = [8, 16], strides = [1, 1]} : vector<8x64xf32> to vector<8x16xf32>
    %484 = vector.extract_strided_slice %481 {offsets = [0, 48], sizes = [8, 16], strides = [1, 1]} : vector<8x64xf32> to vector<8x16xf32>
    %485 = vector.extract_strided_slice %476 {offsets = [0, 32], sizes = [8, 16], strides = [1, 1]} : vector<8x64xf32> to vector<8x16xf32>
    %486 = math.tanh %485 : vector<8x16xf32>
    %487 = arith.mulf %483, %445 : vector<8x16xf32>
    %488 = arith.mulf %482, %486 : vector<8x16xf32>
    %489 = arith.addf %487, %488 : vector<8x16xf32>
    %490 = math.tanh %489 : vector<8x16xf32>
    %491 = arith.mulf %484, %490 : vector<8x16xf32>
    %492 = arith.subf %491, %441 : vector<8x16xf32>
    %493 = vector.broadcast %237 : vector<8x1xf32> to vector<8x16xf32>
    %494 = arith.mulf %493, %492 : vector<8x16xf32>
    %495 = arith.addf %441, %494 : vector<8x16xf32>
    %496 = arith.subf %489, %445 : vector<8x16xf32>
    %497 = vector.broadcast %237 : vector<8x1xf32> to vector<8x16xf32>
    %498 = arith.mulf %497, %496 : vector<8x16xf32>
    %499 = arith.addf %445, %498 : vector<8x16xf32>
    %500 = vector.extract_strided_slice %248 {offsets = [24, 64], sizes = [8, 64], strides = [1, 1]} : vector<64x128xf32> to vector<8x64xf32>
    %501 = arith.truncf %468 : vector<8x16xf32> to vector<8x16xbf16>
    %cst_87 = arith.constant dense<0.000000e+00> : vector<8x64xf32>
    %502 = tpu.matmul %501, %252, %cst_87 {dimension_numbers = #tpu.dot_dimension_numbers<[1], [0], [0], [1], [0, 0, 1, 1], [], []>} : vector<8x16xbf16>, vector<16x64xbf16>, vector<8x64xf32> -> vector<8x64xf32>
    %503 = arith.addf %500, %502 : vector<8x64xf32>
    %504 = arith.negf %503 : vector<8x64xf32>
    %505 = math.exp %504 : vector<8x64xf32>
    %cst_88 = arith.constant 1.000000e+00 : f32
    %506 = vector.broadcast %cst_88 : f32 to vector<8x64xf32>
    %507 = arith.addf %506, %505 : vector<8x64xf32>
    %508 = arith.divf %506, %507 : vector<8x64xf32>
    %509 = vector.extract_strided_slice %508 {offsets = [0, 0], sizes = [8, 16], strides = [1, 1]} : vector<8x64xf32> to vector<8x16xf32>
    %510 = vector.extract_strided_slice %508 {offsets = [0, 16], sizes = [8, 16], strides = [1, 1]} : vector<8x64xf32> to vector<8x16xf32>
    %511 = vector.extract_strided_slice %508 {offsets = [0, 48], sizes = [8, 16], strides = [1, 1]} : vector<8x64xf32> to vector<8x16xf32>
    %512 = vector.extract_strided_slice %503 {offsets = [0, 32], sizes = [8, 16], strides = [1, 1]} : vector<8x64xf32> to vector<8x16xf32>
    %513 = math.tanh %512 : vector<8x16xf32>
    %514 = arith.mulf %510, %472 : vector<8x16xf32>
    %515 = arith.mulf %509, %513 : vector<8x16xf32>
    %516 = arith.addf %514, %515 : vector<8x16xf32>
    %517 = math.tanh %516 : vector<8x16xf32>
    %518 = arith.mulf %511, %517 : vector<8x16xf32>
    %519 = arith.subf %518, %468 : vector<8x16xf32>
    %520 = vector.broadcast %236 : vector<8x1xf32> to vector<8x16xf32>
    %521 = arith.mulf %520, %519 : vector<8x16xf32>
    %522 = arith.addf %468, %521 : vector<8x16xf32>
    %523 = arith.subf %516, %472 : vector<8x16xf32>
    %524 = vector.broadcast %236 : vector<8x1xf32> to vector<8x16xf32>
    %525 = arith.mulf %524, %523 : vector<8x16xf32>
    %526 = arith.addf %472, %525 : vector<8x16xf32>
    %527 = vector.extract_strided_slice %248 {offsets = [40, 0], sizes = [8, 64], strides = [1, 1]} : vector<64x128xf32> to vector<8x64xf32>
    %528 = arith.truncf %495 : vector<8x16xf32> to vector<8x16xbf16>
    %cst_89 = arith.constant dense<0.000000e+00> : vector<8x64xf32>
    %529 = tpu.matmul %528, %250, %cst_89 {dimension_numbers = #tpu.dot_dimension_numbers<[1], [0], [0], [1], [0, 0, 1, 1], [], []>} : vector<8x16xbf16>, vector<16x64xbf16>, vector<8x64xf32> -> vector<8x64xf32>
    %530 = arith.addf %527, %529 : vector<8x64xf32>
    %531 = arith.negf %530 : vector<8x64xf32>
    %532 = math.exp %531 : vector<8x64xf32>
    %cst_90 = arith.constant 1.000000e+00 : f32
    %533 = vector.broadcast %cst_90 : f32 to vector<8x64xf32>
    %534 = arith.addf %533, %532 : vector<8x64xf32>
    %535 = arith.divf %533, %534 : vector<8x64xf32>
    %536 = vector.extract_strided_slice %535 {offsets = [0, 0], sizes = [8, 16], strides = [1, 1]} : vector<8x64xf32> to vector<8x16xf32>
    %537 = vector.extract_strided_slice %535 {offsets = [0, 16], sizes = [8, 16], strides = [1, 1]} : vector<8x64xf32> to vector<8x16xf32>
    %538 = vector.extract_strided_slice %535 {offsets = [0, 48], sizes = [8, 16], strides = [1, 1]} : vector<8x64xf32> to vector<8x16xf32>
    %539 = vector.extract_strided_slice %530 {offsets = [0, 32], sizes = [8, 16], strides = [1, 1]} : vector<8x64xf32> to vector<8x16xf32>
    %540 = math.tanh %539 : vector<8x16xf32>
    %541 = arith.mulf %537, %499 : vector<8x16xf32>
    %542 = arith.mulf %536, %540 : vector<8x16xf32>
    %543 = arith.addf %541, %542 : vector<8x16xf32>
    %544 = math.tanh %543 : vector<8x16xf32>
    %545 = arith.mulf %538, %544 : vector<8x16xf32>
    %546 = arith.subf %545, %495 : vector<8x16xf32>
    %547 = vector.broadcast %238 : vector<8x1xf32> to vector<8x16xf32>
    %548 = arith.mulf %547, %546 : vector<8x16xf32>
    %549 = arith.addf %495, %548 : vector<8x16xf32>
    %550 = arith.subf %543, %499 : vector<8x16xf32>
    %551 = vector.broadcast %238 : vector<8x1xf32> to vector<8x16xf32>
    %552 = arith.mulf %551, %550 : vector<8x16xf32>
    %553 = arith.addf %499, %552 : vector<8x16xf32>
    %554 = vector.extract_strided_slice %248 {offsets = [16, 64], sizes = [8, 64], strides = [1, 1]} : vector<64x128xf32> to vector<8x64xf32>
    %555 = arith.truncf %522 : vector<8x16xf32> to vector<8x16xbf16>
    %cst_91 = arith.constant dense<0.000000e+00> : vector<8x64xf32>
    %556 = tpu.matmul %555, %252, %cst_91 {dimension_numbers = #tpu.dot_dimension_numbers<[1], [0], [0], [1], [0, 0, 1, 1], [], []>} : vector<8x16xbf16>, vector<16x64xbf16>, vector<8x64xf32> -> vector<8x64xf32>
    %557 = arith.addf %554, %556 : vector<8x64xf32>
    %558 = arith.negf %557 : vector<8x64xf32>
    %559 = math.exp %558 : vector<8x64xf32>
    %cst_92 = arith.constant 1.000000e+00 : f32
    %560 = vector.broadcast %cst_92 : f32 to vector<8x64xf32>
    %561 = arith.addf %560, %559 : vector<8x64xf32>
    %562 = arith.divf %560, %561 : vector<8x64xf32>
    %563 = vector.extract_strided_slice %562 {offsets = [0, 0], sizes = [8, 16], strides = [1, 1]} : vector<8x64xf32> to vector<8x16xf32>
    %564 = vector.extract_strided_slice %562 {offsets = [0, 16], sizes = [8, 16], strides = [1, 1]} : vector<8x64xf32> to vector<8x16xf32>
    %565 = vector.extract_strided_slice %562 {offsets = [0, 48], sizes = [8, 16], strides = [1, 1]} : vector<8x64xf32> to vector<8x16xf32>
    %566 = vector.extract_strided_slice %557 {offsets = [0, 32], sizes = [8, 16], strides = [1, 1]} : vector<8x64xf32> to vector<8x16xf32>
    %567 = math.tanh %566 : vector<8x16xf32>
    %568 = arith.mulf %564, %526 : vector<8x16xf32>
    %569 = arith.mulf %563, %567 : vector<8x16xf32>
    %570 = arith.addf %568, %569 : vector<8x16xf32>
    %571 = math.tanh %570 : vector<8x16xf32>
    %572 = arith.mulf %565, %571 : vector<8x16xf32>
    %573 = arith.subf %572, %522 : vector<8x16xf32>
    %574 = vector.broadcast %235 : vector<8x1xf32> to vector<8x16xf32>
    %575 = arith.mulf %574, %573 : vector<8x16xf32>
    %576 = arith.addf %522, %575 : vector<8x16xf32>
    %577 = arith.subf %570, %526 : vector<8x16xf32>
    %578 = vector.broadcast %235 : vector<8x1xf32> to vector<8x16xf32>
    %579 = arith.mulf %578, %577 : vector<8x16xf32>
    %580 = arith.addf %526, %579 : vector<8x16xf32>
    %581 = vector.extract_strided_slice %248 {offsets = [48, 0], sizes = [8, 64], strides = [1, 1]} : vector<64x128xf32> to vector<8x64xf32>
    %582 = arith.truncf %549 : vector<8x16xf32> to vector<8x16xbf16>
    %cst_93 = arith.constant dense<0.000000e+00> : vector<8x64xf32>
    %583 = tpu.matmul %582, %250, %cst_93 {dimension_numbers = #tpu.dot_dimension_numbers<[1], [0], [0], [1], [0, 0, 1, 1], [], []>} : vector<8x16xbf16>, vector<16x64xbf16>, vector<8x64xf32> -> vector<8x64xf32>
    %584 = arith.addf %581, %583 : vector<8x64xf32>
    %585 = arith.negf %584 : vector<8x64xf32>
    %586 = math.exp %585 : vector<8x64xf32>
    %cst_94 = arith.constant 1.000000e+00 : f32
    %587 = vector.broadcast %cst_94 : f32 to vector<8x64xf32>
    %588 = arith.addf %587, %586 : vector<8x64xf32>
    %589 = arith.divf %587, %588 : vector<8x64xf32>
    %590 = vector.extract_strided_slice %589 {offsets = [0, 0], sizes = [8, 16], strides = [1, 1]} : vector<8x64xf32> to vector<8x16xf32>
    %591 = vector.extract_strided_slice %589 {offsets = [0, 16], sizes = [8, 16], strides = [1, 1]} : vector<8x64xf32> to vector<8x16xf32>
    %592 = vector.extract_strided_slice %589 {offsets = [0, 48], sizes = [8, 16], strides = [1, 1]} : vector<8x64xf32> to vector<8x16xf32>
    %593 = vector.extract_strided_slice %584 {offsets = [0, 32], sizes = [8, 16], strides = [1, 1]} : vector<8x64xf32> to vector<8x16xf32>
    %594 = math.tanh %593 : vector<8x16xf32>
    %595 = arith.mulf %591, %553 : vector<8x16xf32>
    %596 = arith.mulf %590, %594 : vector<8x16xf32>
    %597 = arith.addf %595, %596 : vector<8x16xf32>
    %598 = math.tanh %597 : vector<8x16xf32>
    %599 = arith.mulf %592, %598 : vector<8x16xf32>
    %600 = arith.subf %599, %549 : vector<8x16xf32>
    %601 = vector.broadcast %239 : vector<8x1xf32> to vector<8x16xf32>
    %602 = arith.mulf %601, %600 : vector<8x16xf32>
    %603 = arith.addf %549, %602 : vector<8x16xf32>
    %604 = arith.subf %597, %553 : vector<8x16xf32>
    %605 = vector.broadcast %239 : vector<8x1xf32> to vector<8x16xf32>
    %606 = arith.mulf %605, %604 : vector<8x16xf32>
    %607 = arith.addf %553, %606 : vector<8x16xf32>
    %608 = vector.extract_strided_slice %248 {offsets = [8, 64], sizes = [8, 64], strides = [1, 1]} : vector<64x128xf32> to vector<8x64xf32>
    %609 = arith.truncf %576 : vector<8x16xf32> to vector<8x16xbf16>
    %cst_95 = arith.constant dense<0.000000e+00> : vector<8x64xf32>
    %610 = tpu.matmul %609, %252, %cst_95 {dimension_numbers = #tpu.dot_dimension_numbers<[1], [0], [0], [1], [0, 0, 1, 1], [], []>} : vector<8x16xbf16>, vector<16x64xbf16>, vector<8x64xf32> -> vector<8x64xf32>
    %611 = arith.addf %608, %610 : vector<8x64xf32>
    %612 = arith.negf %611 : vector<8x64xf32>
    %613 = math.exp %612 : vector<8x64xf32>
    %cst_96 = arith.constant 1.000000e+00 : f32
    %614 = vector.broadcast %cst_96 : f32 to vector<8x64xf32>
    %615 = arith.addf %614, %613 : vector<8x64xf32>
    %616 = arith.divf %614, %615 : vector<8x64xf32>
    %617 = vector.extract_strided_slice %616 {offsets = [0, 0], sizes = [8, 16], strides = [1, 1]} : vector<8x64xf32> to vector<8x16xf32>
    %618 = vector.extract_strided_slice %616 {offsets = [0, 16], sizes = [8, 16], strides = [1, 1]} : vector<8x64xf32> to vector<8x16xf32>
    %619 = vector.extract_strided_slice %616 {offsets = [0, 48], sizes = [8, 16], strides = [1, 1]} : vector<8x64xf32> to vector<8x16xf32>
    %620 = vector.extract_strided_slice %611 {offsets = [0, 32], sizes = [8, 16], strides = [1, 1]} : vector<8x64xf32> to vector<8x16xf32>
    %621 = math.tanh %620 : vector<8x16xf32>
    %622 = arith.mulf %618, %580 : vector<8x16xf32>
    %623 = arith.mulf %617, %621 : vector<8x16xf32>
    %624 = arith.addf %622, %623 : vector<8x16xf32>
    %625 = math.tanh %624 : vector<8x16xf32>
    %626 = arith.mulf %619, %625 : vector<8x16xf32>
    %627 = arith.subf %626, %576 : vector<8x16xf32>
    %628 = vector.broadcast %234 : vector<8x1xf32> to vector<8x16xf32>
    %629 = arith.mulf %628, %627 : vector<8x16xf32>
    %630 = arith.addf %576, %629 : vector<8x16xf32>
    %631 = arith.subf %624, %580 : vector<8x16xf32>
    %632 = vector.broadcast %234 : vector<8x1xf32> to vector<8x16xf32>
    %633 = arith.mulf %632, %631 : vector<8x16xf32>
    %634 = arith.addf %580, %633 : vector<8x16xf32>
    %635 = vector.extract_strided_slice %248 {offsets = [56, 0], sizes = [8, 64], strides = [1, 1]} : vector<64x128xf32> to vector<8x64xf32>
    %636 = arith.truncf %603 : vector<8x16xf32> to vector<8x16xbf16>
    %cst_97 = arith.constant dense<0.000000e+00> : vector<8x64xf32>
    %637 = tpu.matmul %636, %250, %cst_97 {dimension_numbers = #tpu.dot_dimension_numbers<[1], [0], [0], [1], [0, 0, 1, 1], [], []>} : vector<8x16xbf16>, vector<16x64xbf16>, vector<8x64xf32> -> vector<8x64xf32>
    %638 = arith.addf %635, %637 : vector<8x64xf32>
    %639 = arith.negf %638 : vector<8x64xf32>
    %640 = math.exp %639 : vector<8x64xf32>
    %cst_98 = arith.constant 1.000000e+00 : f32
    %641 = vector.broadcast %cst_98 : f32 to vector<8x64xf32>
    %642 = arith.addf %641, %640 : vector<8x64xf32>
    %643 = arith.divf %641, %642 : vector<8x64xf32>
    %644 = vector.extract_strided_slice %643 {offsets = [0, 0], sizes = [8, 16], strides = [1, 1]} : vector<8x64xf32> to vector<8x16xf32>
    %645 = vector.extract_strided_slice %643 {offsets = [0, 16], sizes = [8, 16], strides = [1, 1]} : vector<8x64xf32> to vector<8x16xf32>
    %646 = vector.extract_strided_slice %643 {offsets = [0, 48], sizes = [8, 16], strides = [1, 1]} : vector<8x64xf32> to vector<8x16xf32>
    %647 = vector.extract_strided_slice %638 {offsets = [0, 32], sizes = [8, 16], strides = [1, 1]} : vector<8x64xf32> to vector<8x16xf32>
    %648 = math.tanh %647 : vector<8x16xf32>
    %649 = arith.mulf %645, %607 : vector<8x16xf32>
    %650 = arith.mulf %644, %648 : vector<8x16xf32>
    %651 = arith.addf %649, %650 : vector<8x16xf32>
    %652 = math.tanh %651 : vector<8x16xf32>
    %653 = arith.mulf %646, %652 : vector<8x16xf32>
    %654 = arith.subf %653, %603 : vector<8x16xf32>
    %655 = vector.broadcast %240 : vector<8x1xf32> to vector<8x16xf32>
    %656 = arith.mulf %655, %654 : vector<8x16xf32>
    %657 = arith.addf %603, %656 : vector<8x16xf32>
    %658 = vector.extract_strided_slice %248 {offsets = [0, 64], sizes = [8, 64], strides = [1, 1]} : vector<64x128xf32> to vector<8x64xf32>
    %659 = arith.truncf %630 : vector<8x16xf32> to vector<8x16xbf16>
    %cst_99 = arith.constant dense<0.000000e+00> : vector<8x64xf32>
    %660 = tpu.matmul %659, %252, %cst_99 {dimension_numbers = #tpu.dot_dimension_numbers<[1], [0], [0], [1], [0, 0, 1, 1], [], []>} : vector<8x16xbf16>, vector<16x64xbf16>, vector<8x64xf32> -> vector<8x64xf32>
    %661 = arith.addf %658, %660 : vector<8x64xf32>
    %662 = arith.negf %661 : vector<8x64xf32>
    %663 = math.exp %662 : vector<8x64xf32>
    %cst_100 = arith.constant 1.000000e+00 : f32
    %664 = vector.broadcast %cst_100 : f32 to vector<8x64xf32>
    %665 = arith.addf %664, %663 : vector<8x64xf32>
    %666 = arith.divf %664, %665 : vector<8x64xf32>
    %667 = vector.extract_strided_slice %666 {offsets = [0, 0], sizes = [8, 16], strides = [1, 1]} : vector<8x64xf32> to vector<8x16xf32>
    %668 = vector.extract_strided_slice %666 {offsets = [0, 16], sizes = [8, 16], strides = [1, 1]} : vector<8x64xf32> to vector<8x16xf32>
    %669 = vector.extract_strided_slice %666 {offsets = [0, 48], sizes = [8, 16], strides = [1, 1]} : vector<8x64xf32> to vector<8x16xf32>
    %670 = vector.extract_strided_slice %661 {offsets = [0, 32], sizes = [8, 16], strides = [1, 1]} : vector<8x64xf32> to vector<8x16xf32>
    %671 = math.tanh %670 : vector<8x16xf32>
    %672 = arith.mulf %668, %634 : vector<8x16xf32>
    %673 = arith.mulf %667, %671 : vector<8x16xf32>
    %674 = arith.addf %672, %673 : vector<8x16xf32>
    %675 = math.tanh %674 : vector<8x16xf32>
    %676 = arith.mulf %669, %675 : vector<8x16xf32>
    %677 = arith.subf %676, %630 : vector<8x16xf32>
    %678 = vector.broadcast %233 : vector<8x1xf32> to vector<8x16xf32>
    %679 = arith.mulf %678, %677 : vector<8x16xf32>
    %680 = arith.addf %630, %679 : vector<8x16xf32>
    %681 = tpu.concatenate %279, %333, %387, %441, %495, %549, %603, %657 in 0 : vector<8x16xf32>, vector<8x16xf32>, vector<8x16xf32>, vector<8x16xf32>, vector<8x16xf32>, vector<8x16xf32>, vector<8x16xf32>, vector<8x16xf32> -> vector<64x16xf32>
    %682 = arith.truncf %681 : vector<64x16xf32> to vector<64x16xbf16>
    %683 = tpu.concatenate %680, %630, %576, %522, %468, %414, %360, %306 in 0 : vector<8x16xf32>, vector<8x16xf32>, vector<8x16xf32>, vector<8x16xf32>, vector<8x16xf32>, vector<8x16xf32>, vector<8x16xf32>, vector<8x16xf32> -> vector<64x16xf32>
    %684 = arith.truncf %683 : vector<64x16xf32> to vector<64x16xbf16>
    %c304 = arith.constant 304 : index
    %c0_101 = arith.constant 0 : index
    %685 = vector.load %arg0[%c304, %c0_101] : memref<472x128xf32, #tpu.memory_space<vmem>>, vector<32x128xf32>
    %686 = arith.truncf %685 : vector<32x128xf32> to vector<32x128xbf16>
    %687 = vector.extract_strided_slice %686 {offsets = [0, 0], sizes = [16, 128], strides = [1, 1]} : vector<32x128xbf16> to vector<16x128xbf16>
    %cst_102 = arith.constant dense<0.000000e+00> : vector<64x128xf32>
    %688 = tpu.matmul %682, %687, %cst_102 {dimension_numbers = #tpu.dot_dimension_numbers<[1], [0], [0], [1], [0, 0, 1, 1], [], []>} : vector<64x16xbf16>, vector<16x128xbf16>, vector<64x128xf32> -> vector<64x128xf32>
    %689 = vector.extract_strided_slice %686 {offsets = [16, 0], sizes = [16, 128], strides = [1, 1]} : vector<32x128xbf16> to vector<16x128xbf16>
    %cst_103 = arith.constant dense<0.000000e+00> : vector<64x128xf32>
    %690 = tpu.matmul %684, %689, %cst_103 {dimension_numbers = #tpu.dot_dimension_numbers<[1], [0], [0], [1], [0, 0, 1, 1], [], []>} : vector<64x16xbf16>, vector<16x128xbf16>, vector<64x128xf32> -> vector<64x128xf32>
    %691 = arith.addf %688, %690 : vector<64x128xf32>
    %c368 = arith.constant 368 : index
    %c0_104 = arith.constant 0 : index
    %692 = vector.load %arg0[%c368, %c0_104] : memref<472x128xf32, #tpu.memory_space<vmem>>, vector<1x128xf32>
    %693 = vector.broadcast %692 : vector<1x128xf32> to vector<64x128xf32>
    %694 = arith.addf %691, %693 : vector<64x128xf32>
    %c336 = arith.constant 336 : index
    %c0_105 = arith.constant 0 : index
    %695 = vector.load %arg0[%c336, %c0_105] : memref<472x128xf32, #tpu.memory_space<vmem>>, vector<16x64xf32>
    %696 = arith.truncf %695 : vector<16x64xf32> to vector<16x64xbf16>
    %c352 = arith.constant 352 : index
    %c0_106 = arith.constant 0 : index
    %697 = vector.load %arg0[%c352, %c0_106] : memref<472x128xf32, #tpu.memory_space<vmem>>, vector<16x64xf32>
    %698 = arith.truncf %697 : vector<16x64xf32> to vector<16x64xbf16>
    %cst_107 = arith.constant 0.000000e+00 : f32
    %699 = vector.broadcast %cst_107 : f32 to vector<8x16xf32>
    %cst_108 = arith.constant 0.000000e+00 : f32
    %700 = vector.broadcast %cst_108 : f32 to vector<8x16xf32>
    %cst_109 = arith.constant 0.000000e+00 : f32
    %701 = vector.broadcast %cst_109 : f32 to vector<8x16xf32>
    %cst_110 = arith.constant 0.000000e+00 : f32
    %702 = vector.broadcast %cst_110 : f32 to vector<8x16xf32>
    %703 = vector.extract_strided_slice %694 {offsets = [0, 0], sizes = [8, 64], strides = [1, 1]} : vector<64x128xf32> to vector<8x64xf32>
    %704 = arith.truncf %699 : vector<8x16xf32> to vector<8x16xbf16>
    %cst_111 = arith.constant dense<0.000000e+00> : vector<8x64xf32>
    %705 = tpu.matmul %704, %696, %cst_111 {dimension_numbers = #tpu.dot_dimension_numbers<[1], [0], [0], [1], [0, 0, 1, 1], [], []>} : vector<8x16xbf16>, vector<16x64xbf16>, vector<8x64xf32> -> vector<8x64xf32>
    %706 = arith.addf %703, %705 : vector<8x64xf32>
    %707 = arith.negf %706 : vector<8x64xf32>
    %708 = math.exp %707 : vector<8x64xf32>
    %cst_112 = arith.constant 1.000000e+00 : f32
    %709 = vector.broadcast %cst_112 : f32 to vector<8x64xf32>
    %710 = arith.addf %709, %708 : vector<8x64xf32>
    %711 = arith.divf %709, %710 : vector<8x64xf32>
    %712 = vector.extract_strided_slice %711 {offsets = [0, 0], sizes = [8, 16], strides = [1, 1]} : vector<8x64xf32> to vector<8x16xf32>
    %713 = vector.extract_strided_slice %711 {offsets = [0, 16], sizes = [8, 16], strides = [1, 1]} : vector<8x64xf32> to vector<8x16xf32>
    %714 = vector.extract_strided_slice %711 {offsets = [0, 48], sizes = [8, 16], strides = [1, 1]} : vector<8x64xf32> to vector<8x16xf32>
    %715 = vector.extract_strided_slice %706 {offsets = [0, 32], sizes = [8, 16], strides = [1, 1]} : vector<8x64xf32> to vector<8x16xf32>
    %716 = math.tanh %715 : vector<8x16xf32>
    %717 = arith.mulf %713, %700 : vector<8x16xf32>
    %718 = arith.mulf %712, %716 : vector<8x16xf32>
    %719 = arith.addf %717, %718 : vector<8x16xf32>
    %720 = math.tanh %719 : vector<8x16xf32>
    %721 = arith.mulf %714, %720 : vector<8x16xf32>
    %722 = arith.subf %721, %699 : vector<8x16xf32>
    %723 = vector.broadcast %233 : vector<8x1xf32> to vector<8x16xf32>
    %724 = arith.mulf %723, %722 : vector<8x16xf32>
    %725 = arith.addf %699, %724 : vector<8x16xf32>
    %726 = arith.subf %719, %700 : vector<8x16xf32>
    %727 = vector.broadcast %233 : vector<8x1xf32> to vector<8x16xf32>
    %728 = arith.mulf %727, %726 : vector<8x16xf32>
    %729 = arith.addf %700, %728 : vector<8x16xf32>
    %730 = vector.extract_strided_slice %694 {offsets = [56, 64], sizes = [8, 64], strides = [1, 1]} : vector<64x128xf32> to vector<8x64xf32>
    %731 = arith.truncf %701 : vector<8x16xf32> to vector<8x16xbf16>
    %cst_113 = arith.constant dense<0.000000e+00> : vector<8x64xf32>
    %732 = tpu.matmul %731, %698, %cst_113 {dimension_numbers = #tpu.dot_dimension_numbers<[1], [0], [0], [1], [0, 0, 1, 1], [], []>} : vector<8x16xbf16>, vector<16x64xbf16>, vector<8x64xf32> -> vector<8x64xf32>
    %733 = arith.addf %730, %732 : vector<8x64xf32>
    %734 = arith.negf %733 : vector<8x64xf32>
    %735 = math.exp %734 : vector<8x64xf32>
    %cst_114 = arith.constant 1.000000e+00 : f32
    %736 = vector.broadcast %cst_114 : f32 to vector<8x64xf32>
    %737 = arith.addf %736, %735 : vector<8x64xf32>
    %738 = arith.divf %736, %737 : vector<8x64xf32>
    %739 = vector.extract_strided_slice %738 {offsets = [0, 0], sizes = [8, 16], strides = [1, 1]} : vector<8x64xf32> to vector<8x16xf32>
    %740 = vector.extract_strided_slice %738 {offsets = [0, 16], sizes = [8, 16], strides = [1, 1]} : vector<8x64xf32> to vector<8x16xf32>
    %741 = vector.extract_strided_slice %738 {offsets = [0, 48], sizes = [8, 16], strides = [1, 1]} : vector<8x64xf32> to vector<8x16xf32>
    %742 = vector.extract_strided_slice %733 {offsets = [0, 32], sizes = [8, 16], strides = [1, 1]} : vector<8x64xf32> to vector<8x16xf32>
    %743 = math.tanh %742 : vector<8x16xf32>
    %744 = arith.mulf %740, %702 : vector<8x16xf32>
    %745 = arith.mulf %739, %743 : vector<8x16xf32>
    %746 = arith.addf %744, %745 : vector<8x16xf32>
    %747 = math.tanh %746 : vector<8x16xf32>
    %748 = arith.mulf %741, %747 : vector<8x16xf32>
    %749 = arith.subf %748, %701 : vector<8x16xf32>
    %750 = vector.broadcast %240 : vector<8x1xf32> to vector<8x16xf32>
    %751 = arith.mulf %750, %749 : vector<8x16xf32>
    %752 = arith.addf %701, %751 : vector<8x16xf32>
    %753 = arith.subf %746, %702 : vector<8x16xf32>
    %754 = vector.broadcast %240 : vector<8x1xf32> to vector<8x16xf32>
    %755 = arith.mulf %754, %753 : vector<8x16xf32>
    %756 = arith.addf %702, %755 : vector<8x16xf32>
    %757 = vector.extract_strided_slice %694 {offsets = [8, 0], sizes = [8, 64], strides = [1, 1]} : vector<64x128xf32> to vector<8x64xf32>
    %758 = arith.truncf %725 : vector<8x16xf32> to vector<8x16xbf16>
    %cst_115 = arith.constant dense<0.000000e+00> : vector<8x64xf32>
    %759 = tpu.matmul %758, %696, %cst_115 {dimension_numbers = #tpu.dot_dimension_numbers<[1], [0], [0], [1], [0, 0, 1, 1], [], []>} : vector<8x16xbf16>, vector<16x64xbf16>, vector<8x64xf32> -> vector<8x64xf32>
    %760 = arith.addf %757, %759 : vector<8x64xf32>
    %761 = arith.negf %760 : vector<8x64xf32>
    %762 = math.exp %761 : vector<8x64xf32>
    %cst_116 = arith.constant 1.000000e+00 : f32
    %763 = vector.broadcast %cst_116 : f32 to vector<8x64xf32>
    %764 = arith.addf %763, %762 : vector<8x64xf32>
    %765 = arith.divf %763, %764 : vector<8x64xf32>
    %766 = vector.extract_strided_slice %765 {offsets = [0, 0], sizes = [8, 16], strides = [1, 1]} : vector<8x64xf32> to vector<8x16xf32>
    %767 = vector.extract_strided_slice %765 {offsets = [0, 16], sizes = [8, 16], strides = [1, 1]} : vector<8x64xf32> to vector<8x16xf32>
    %768 = vector.extract_strided_slice %765 {offsets = [0, 48], sizes = [8, 16], strides = [1, 1]} : vector<8x64xf32> to vector<8x16xf32>
    %769 = vector.extract_strided_slice %760 {offsets = [0, 32], sizes = [8, 16], strides = [1, 1]} : vector<8x64xf32> to vector<8x16xf32>
    %770 = math.tanh %769 : vector<8x16xf32>
    %771 = arith.mulf %767, %729 : vector<8x16xf32>
    %772 = arith.mulf %766, %770 : vector<8x16xf32>
    %773 = arith.addf %771, %772 : vector<8x16xf32>
    %774 = math.tanh %773 : vector<8x16xf32>
    %775 = arith.mulf %768, %774 : vector<8x16xf32>
    %776 = arith.subf %775, %725 : vector<8x16xf32>
    %777 = vector.broadcast %234 : vector<8x1xf32> to vector<8x16xf32>
    %778 = arith.mulf %777, %776 : vector<8x16xf32>
    %779 = arith.addf %725, %778 : vector<8x16xf32>
    %780 = arith.subf %773, %729 : vector<8x16xf32>
    %781 = vector.broadcast %234 : vector<8x1xf32> to vector<8x16xf32>
    %782 = arith.mulf %781, %780 : vector<8x16xf32>
    %783 = arith.addf %729, %782 : vector<8x16xf32>
    %784 = vector.extract_strided_slice %694 {offsets = [48, 64], sizes = [8, 64], strides = [1, 1]} : vector<64x128xf32> to vector<8x64xf32>
    %785 = arith.truncf %752 : vector<8x16xf32> to vector<8x16xbf16>
    %cst_117 = arith.constant dense<0.000000e+00> : vector<8x64xf32>
    %786 = tpu.matmul %785, %698, %cst_117 {dimension_numbers = #tpu.dot_dimension_numbers<[1], [0], [0], [1], [0, 0, 1, 1], [], []>} : vector<8x16xbf16>, vector<16x64xbf16>, vector<8x64xf32> -> vector<8x64xf32>
    %787 = arith.addf %784, %786 : vector<8x64xf32>
    %788 = arith.negf %787 : vector<8x64xf32>
    %789 = math.exp %788 : vector<8x64xf32>
    %cst_118 = arith.constant 1.000000e+00 : f32
    %790 = vector.broadcast %cst_118 : f32 to vector<8x64xf32>
    %791 = arith.addf %790, %789 : vector<8x64xf32>
    %792 = arith.divf %790, %791 : vector<8x64xf32>
    %793 = vector.extract_strided_slice %792 {offsets = [0, 0], sizes = [8, 16], strides = [1, 1]} : vector<8x64xf32> to vector<8x16xf32>
    %794 = vector.extract_strided_slice %792 {offsets = [0, 16], sizes = [8, 16], strides = [1, 1]} : vector<8x64xf32> to vector<8x16xf32>
    %795 = vector.extract_strided_slice %792 {offsets = [0, 48], sizes = [8, 16], strides = [1, 1]} : vector<8x64xf32> to vector<8x16xf32>
    %796 = vector.extract_strided_slice %787 {offsets = [0, 32], sizes = [8, 16], strides = [1, 1]} : vector<8x64xf32> to vector<8x16xf32>
    %797 = math.tanh %796 : vector<8x16xf32>
    %798 = arith.mulf %794, %756 : vector<8x16xf32>
    %799 = arith.mulf %793, %797 : vector<8x16xf32>
    %800 = arith.addf %798, %799 : vector<8x16xf32>
    %801 = math.tanh %800 : vector<8x16xf32>
    %802 = arith.mulf %795, %801 : vector<8x16xf32>
    %803 = arith.subf %802, %752 : vector<8x16xf32>
    %804 = vector.broadcast %239 : vector<8x1xf32> to vector<8x16xf32>
    %805 = arith.mulf %804, %803 : vector<8x16xf32>
    %806 = arith.addf %752, %805 : vector<8x16xf32>
    %807 = arith.subf %800, %756 : vector<8x16xf32>
    %808 = vector.broadcast %239 : vector<8x1xf32> to vector<8x16xf32>
    %809 = arith.mulf %808, %807 : vector<8x16xf32>
    %810 = arith.addf %756, %809 : vector<8x16xf32>
    %811 = vector.extract_strided_slice %694 {offsets = [16, 0], sizes = [8, 64], strides = [1, 1]} : vector<64x128xf32> to vector<8x64xf32>
    %812 = arith.truncf %779 : vector<8x16xf32> to vector<8x16xbf16>
    %cst_119 = arith.constant dense<0.000000e+00> : vector<8x64xf32>
    %813 = tpu.matmul %812, %696, %cst_119 {dimension_numbers = #tpu.dot_dimension_numbers<[1], [0], [0], [1], [0, 0, 1, 1], [], []>} : vector<8x16xbf16>, vector<16x64xbf16>, vector<8x64xf32> -> vector<8x64xf32>
    %814 = arith.addf %811, %813 : vector<8x64xf32>
    %815 = arith.negf %814 : vector<8x64xf32>
    %816 = math.exp %815 : vector<8x64xf32>
    %cst_120 = arith.constant 1.000000e+00 : f32
    %817 = vector.broadcast %cst_120 : f32 to vector<8x64xf32>
    %818 = arith.addf %817, %816 : vector<8x64xf32>
    %819 = arith.divf %817, %818 : vector<8x64xf32>
    %820 = vector.extract_strided_slice %819 {offsets = [0, 0], sizes = [8, 16], strides = [1, 1]} : vector<8x64xf32> to vector<8x16xf32>
    %821 = vector.extract_strided_slice %819 {offsets = [0, 16], sizes = [8, 16], strides = [1, 1]} : vector<8x64xf32> to vector<8x16xf32>
    %822 = vector.extract_strided_slice %819 {offsets = [0, 48], sizes = [8, 16], strides = [1, 1]} : vector<8x64xf32> to vector<8x16xf32>
    %823 = vector.extract_strided_slice %814 {offsets = [0, 32], sizes = [8, 16], strides = [1, 1]} : vector<8x64xf32> to vector<8x16xf32>
    %824 = math.tanh %823 : vector<8x16xf32>
    %825 = arith.mulf %821, %783 : vector<8x16xf32>
    %826 = arith.mulf %820, %824 : vector<8x16xf32>
    %827 = arith.addf %825, %826 : vector<8x16xf32>
    %828 = math.tanh %827 : vector<8x16xf32>
    %829 = arith.mulf %822, %828 : vector<8x16xf32>
    %830 = arith.subf %829, %779 : vector<8x16xf32>
    %831 = vector.broadcast %235 : vector<8x1xf32> to vector<8x16xf32>
    %832 = arith.mulf %831, %830 : vector<8x16xf32>
    %833 = arith.addf %779, %832 : vector<8x16xf32>
    %834 = arith.subf %827, %783 : vector<8x16xf32>
    %835 = vector.broadcast %235 : vector<8x1xf32> to vector<8x16xf32>
    %836 = arith.mulf %835, %834 : vector<8x16xf32>
    %837 = arith.addf %783, %836 : vector<8x16xf32>
    %838 = vector.extract_strided_slice %694 {offsets = [40, 64], sizes = [8, 64], strides = [1, 1]} : vector<64x128xf32> to vector<8x64xf32>
    %839 = arith.truncf %806 : vector<8x16xf32> to vector<8x16xbf16>
    %cst_121 = arith.constant dense<0.000000e+00> : vector<8x64xf32>
    %840 = tpu.matmul %839, %698, %cst_121 {dimension_numbers = #tpu.dot_dimension_numbers<[1], [0], [0], [1], [0, 0, 1, 1], [], []>} : vector<8x16xbf16>, vector<16x64xbf16>, vector<8x64xf32> -> vector<8x64xf32>
    %841 = arith.addf %838, %840 : vector<8x64xf32>
    %842 = arith.negf %841 : vector<8x64xf32>
    %843 = math.exp %842 : vector<8x64xf32>
    %cst_122 = arith.constant 1.000000e+00 : f32
    %844 = vector.broadcast %cst_122 : f32 to vector<8x64xf32>
    %845 = arith.addf %844, %843 : vector<8x64xf32>
    %846 = arith.divf %844, %845 : vector<8x64xf32>
    %847 = vector.extract_strided_slice %846 {offsets = [0, 0], sizes = [8, 16], strides = [1, 1]} : vector<8x64xf32> to vector<8x16xf32>
    %848 = vector.extract_strided_slice %846 {offsets = [0, 16], sizes = [8, 16], strides = [1, 1]} : vector<8x64xf32> to vector<8x16xf32>
    %849 = vector.extract_strided_slice %846 {offsets = [0, 48], sizes = [8, 16], strides = [1, 1]} : vector<8x64xf32> to vector<8x16xf32>
    %850 = vector.extract_strided_slice %841 {offsets = [0, 32], sizes = [8, 16], strides = [1, 1]} : vector<8x64xf32> to vector<8x16xf32>
    %851 = math.tanh %850 : vector<8x16xf32>
    %852 = arith.mulf %848, %810 : vector<8x16xf32>
    %853 = arith.mulf %847, %851 : vector<8x16xf32>
    %854 = arith.addf %852, %853 : vector<8x16xf32>
    %855 = math.tanh %854 : vector<8x16xf32>
    %856 = arith.mulf %849, %855 : vector<8x16xf32>
    %857 = arith.subf %856, %806 : vector<8x16xf32>
    %858 = vector.broadcast %238 : vector<8x1xf32> to vector<8x16xf32>
    %859 = arith.mulf %858, %857 : vector<8x16xf32>
    %860 = arith.addf %806, %859 : vector<8x16xf32>
    %861 = arith.subf %854, %810 : vector<8x16xf32>
    %862 = vector.broadcast %238 : vector<8x1xf32> to vector<8x16xf32>
    %863 = arith.mulf %862, %861 : vector<8x16xf32>
    %864 = arith.addf %810, %863 : vector<8x16xf32>
    %865 = vector.extract_strided_slice %694 {offsets = [24, 0], sizes = [8, 64], strides = [1, 1]} : vector<64x128xf32> to vector<8x64xf32>
    %866 = arith.truncf %833 : vector<8x16xf32> to vector<8x16xbf16>
    %cst_123 = arith.constant dense<0.000000e+00> : vector<8x64xf32>
    %867 = tpu.matmul %866, %696, %cst_123 {dimension_numbers = #tpu.dot_dimension_numbers<[1], [0], [0], [1], [0, 0, 1, 1], [], []>} : vector<8x16xbf16>, vector<16x64xbf16>, vector<8x64xf32> -> vector<8x64xf32>
    %868 = arith.addf %865, %867 : vector<8x64xf32>
    %869 = arith.negf %868 : vector<8x64xf32>
    %870 = math.exp %869 : vector<8x64xf32>
    %cst_124 = arith.constant 1.000000e+00 : f32
    %871 = vector.broadcast %cst_124 : f32 to vector<8x64xf32>
    %872 = arith.addf %871, %870 : vector<8x64xf32>
    %873 = arith.divf %871, %872 : vector<8x64xf32>
    %874 = vector.extract_strided_slice %873 {offsets = [0, 0], sizes = [8, 16], strides = [1, 1]} : vector<8x64xf32> to vector<8x16xf32>
    %875 = vector.extract_strided_slice %873 {offsets = [0, 16], sizes = [8, 16], strides = [1, 1]} : vector<8x64xf32> to vector<8x16xf32>
    %876 = vector.extract_strided_slice %873 {offsets = [0, 48], sizes = [8, 16], strides = [1, 1]} : vector<8x64xf32> to vector<8x16xf32>
    %877 = vector.extract_strided_slice %868 {offsets = [0, 32], sizes = [8, 16], strides = [1, 1]} : vector<8x64xf32> to vector<8x16xf32>
    %878 = math.tanh %877 : vector<8x16xf32>
    %879 = arith.mulf %875, %837 : vector<8x16xf32>
    %880 = arith.mulf %874, %878 : vector<8x16xf32>
    %881 = arith.addf %879, %880 : vector<8x16xf32>
    %882 = math.tanh %881 : vector<8x16xf32>
    %883 = arith.mulf %876, %882 : vector<8x16xf32>
    %884 = arith.subf %883, %833 : vector<8x16xf32>
    %885 = vector.broadcast %236 : vector<8x1xf32> to vector<8x16xf32>
    %886 = arith.mulf %885, %884 : vector<8x16xf32>
    %887 = arith.addf %833, %886 : vector<8x16xf32>
    %888 = arith.subf %881, %837 : vector<8x16xf32>
    %889 = vector.broadcast %236 : vector<8x1xf32> to vector<8x16xf32>
    %890 = arith.mulf %889, %888 : vector<8x16xf32>
    %891 = arith.addf %837, %890 : vector<8x16xf32>
    %892 = vector.extract_strided_slice %694 {offsets = [32, 64], sizes = [8, 64], strides = [1, 1]} : vector<64x128xf32> to vector<8x64xf32>
    %893 = arith.truncf %860 : vector<8x16xf32> to vector<8x16xbf16>
    %cst_125 = arith.constant dense<0.000000e+00> : vector<8x64xf32>
    %894 = tpu.matmul %893, %698, %cst_125 {dimension_numbers = #tpu.dot_dimension_numbers<[1], [0], [0], [1], [0, 0, 1, 1], [], []>} : vector<8x16xbf16>, vector<16x64xbf16>, vector<8x64xf32> -> vector<8x64xf32>
    %895 = arith.addf %892, %894 : vector<8x64xf32>
    %896 = arith.negf %895 : vector<8x64xf32>
    %897 = math.exp %896 : vector<8x64xf32>
    %cst_126 = arith.constant 1.000000e+00 : f32
    %898 = vector.broadcast %cst_126 : f32 to vector<8x64xf32>
    %899 = arith.addf %898, %897 : vector<8x64xf32>
    %900 = arith.divf %898, %899 : vector<8x64xf32>
    %901 = vector.extract_strided_slice %900 {offsets = [0, 0], sizes = [8, 16], strides = [1, 1]} : vector<8x64xf32> to vector<8x16xf32>
    %902 = vector.extract_strided_slice %900 {offsets = [0, 16], sizes = [8, 16], strides = [1, 1]} : vector<8x64xf32> to vector<8x16xf32>
    %903 = vector.extract_strided_slice %900 {offsets = [0, 48], sizes = [8, 16], strides = [1, 1]} : vector<8x64xf32> to vector<8x16xf32>
    %904 = vector.extract_strided_slice %895 {offsets = [0, 32], sizes = [8, 16], strides = [1, 1]} : vector<8x64xf32> to vector<8x16xf32>
    %905 = math.tanh %904 : vector<8x16xf32>
    %906 = arith.mulf %902, %864 : vector<8x16xf32>
    %907 = arith.mulf %901, %905 : vector<8x16xf32>
    %908 = arith.addf %906, %907 : vector<8x16xf32>
    %909 = math.tanh %908 : vector<8x16xf32>
    %910 = arith.mulf %903, %909 : vector<8x16xf32>
    %911 = arith.subf %910, %860 : vector<8x16xf32>
    %912 = vector.broadcast %237 : vector<8x1xf32> to vector<8x16xf32>
    %913 = arith.mulf %912, %911 : vector<8x16xf32>
    %914 = arith.addf %860, %913 : vector<8x16xf32>
    %915 = arith.subf %908, %864 : vector<8x16xf32>
    %916 = vector.broadcast %237 : vector<8x1xf32> to vector<8x16xf32>
    %917 = arith.mulf %916, %915 : vector<8x16xf32>
    %918 = arith.addf %864, %917 : vector<8x16xf32>
    %919 = vector.extract_strided_slice %694 {offsets = [32, 0], sizes = [8, 64], strides = [1, 1]} : vector<64x128xf32> to vector<8x64xf32>
    %920 = arith.truncf %887 : vector<8x16xf32> to vector<8x16xbf16>
    %cst_127 = arith.constant dense<0.000000e+00> : vector<8x64xf32>
    %921 = tpu.matmul %920, %696, %cst_127 {dimension_numbers = #tpu.dot_dimension_numbers<[1], [0], [0], [1], [0, 0, 1, 1], [], []>} : vector<8x16xbf16>, vector<16x64xbf16>, vector<8x64xf32> -> vector<8x64xf32>
    %922 = arith.addf %919, %921 : vector<8x64xf32>
    %923 = arith.negf %922 : vector<8x64xf32>
    %924 = math.exp %923 : vector<8x64xf32>
    %cst_128 = arith.constant 1.000000e+00 : f32
    %925 = vector.broadcast %cst_128 : f32 to vector<8x64xf32>
    %926 = arith.addf %925, %924 : vector<8x64xf32>
    %927 = arith.divf %925, %926 : vector<8x64xf32>
    %928 = vector.extract_strided_slice %927 {offsets = [0, 0], sizes = [8, 16], strides = [1, 1]} : vector<8x64xf32> to vector<8x16xf32>
    %929 = vector.extract_strided_slice %927 {offsets = [0, 16], sizes = [8, 16], strides = [1, 1]} : vector<8x64xf32> to vector<8x16xf32>
    %930 = vector.extract_strided_slice %927 {offsets = [0, 48], sizes = [8, 16], strides = [1, 1]} : vector<8x64xf32> to vector<8x16xf32>
    %931 = vector.extract_strided_slice %922 {offsets = [0, 32], sizes = [8, 16], strides = [1, 1]} : vector<8x64xf32> to vector<8x16xf32>
    %932 = math.tanh %931 : vector<8x16xf32>
    %933 = arith.mulf %929, %891 : vector<8x16xf32>
    %934 = arith.mulf %928, %932 : vector<8x16xf32>
    %935 = arith.addf %933, %934 : vector<8x16xf32>
    %936 = math.tanh %935 : vector<8x16xf32>
    %937 = arith.mulf %930, %936 : vector<8x16xf32>
    %938 = arith.subf %937, %887 : vector<8x16xf32>
    %939 = vector.broadcast %237 : vector<8x1xf32> to vector<8x16xf32>
    %940 = arith.mulf %939, %938 : vector<8x16xf32>
    %941 = arith.addf %887, %940 : vector<8x16xf32>
    %942 = arith.subf %935, %891 : vector<8x16xf32>
    %943 = vector.broadcast %237 : vector<8x1xf32> to vector<8x16xf32>
    %944 = arith.mulf %943, %942 : vector<8x16xf32>
    %945 = arith.addf %891, %944 : vector<8x16xf32>
    %946 = vector.extract_strided_slice %694 {offsets = [24, 64], sizes = [8, 64], strides = [1, 1]} : vector<64x128xf32> to vector<8x64xf32>
    %947 = arith.truncf %914 : vector<8x16xf32> to vector<8x16xbf16>
    %cst_129 = arith.constant dense<0.000000e+00> : vector<8x64xf32>
    %948 = tpu.matmul %947, %698, %cst_129 {dimension_numbers = #tpu.dot_dimension_numbers<[1], [0], [0], [1], [0, 0, 1, 1], [], []>} : vector<8x16xbf16>, vector<16x64xbf16>, vector<8x64xf32> -> vector<8x64xf32>
    %949 = arith.addf %946, %948 : vector<8x64xf32>
    %950 = arith.negf %949 : vector<8x64xf32>
    %951 = math.exp %950 : vector<8x64xf32>
    %cst_130 = arith.constant 1.000000e+00 : f32
    %952 = vector.broadcast %cst_130 : f32 to vector<8x64xf32>
    %953 = arith.addf %952, %951 : vector<8x64xf32>
    %954 = arith.divf %952, %953 : vector<8x64xf32>
    %955 = vector.extract_strided_slice %954 {offsets = [0, 0], sizes = [8, 16], strides = [1, 1]} : vector<8x64xf32> to vector<8x16xf32>
    %956 = vector.extract_strided_slice %954 {offsets = [0, 16], sizes = [8, 16], strides = [1, 1]} : vector<8x64xf32> to vector<8x16xf32>
    %957 = vector.extract_strided_slice %954 {offsets = [0, 48], sizes = [8, 16], strides = [1, 1]} : vector<8x64xf32> to vector<8x16xf32>
    %958 = vector.extract_strided_slice %949 {offsets = [0, 32], sizes = [8, 16], strides = [1, 1]} : vector<8x64xf32> to vector<8x16xf32>
    %959 = math.tanh %958 : vector<8x16xf32>
    %960 = arith.mulf %956, %918 : vector<8x16xf32>
    %961 = arith.mulf %955, %959 : vector<8x16xf32>
    %962 = arith.addf %960, %961 : vector<8x16xf32>
    %963 = math.tanh %962 : vector<8x16xf32>
    %964 = arith.mulf %957, %963 : vector<8x16xf32>
    %965 = arith.subf %964, %914 : vector<8x16xf32>
    %966 = vector.broadcast %236 : vector<8x1xf32> to vector<8x16xf32>
    %967 = arith.mulf %966, %965 : vector<8x16xf32>
    %968 = arith.addf %914, %967 : vector<8x16xf32>
    %969 = arith.subf %962, %918 : vector<8x16xf32>
    %970 = vector.broadcast %236 : vector<8x1xf32> to vector<8x16xf32>
    %971 = arith.mulf %970, %969 : vector<8x16xf32>
    %972 = arith.addf %918, %971 : vector<8x16xf32>
    %973 = vector.extract_strided_slice %694 {offsets = [40, 0], sizes = [8, 64], strides = [1, 1]} : vector<64x128xf32> to vector<8x64xf32>
    %974 = arith.truncf %941 : vector<8x16xf32> to vector<8x16xbf16>
    %cst_131 = arith.constant dense<0.000000e+00> : vector<8x64xf32>
    %975 = tpu.matmul %974, %696, %cst_131 {dimension_numbers = #tpu.dot_dimension_numbers<[1], [0], [0], [1], [0, 0, 1, 1], [], []>} : vector<8x16xbf16>, vector<16x64xbf16>, vector<8x64xf32> -> vector<8x64xf32>
    %976 = arith.addf %973, %975 : vector<8x64xf32>
    %977 = arith.negf %976 : vector<8x64xf32>
    %978 = math.exp %977 : vector<8x64xf32>
    %cst_132 = arith.constant 1.000000e+00 : f32
    %979 = vector.broadcast %cst_132 : f32 to vector<8x64xf32>
    %980 = arith.addf %979, %978 : vector<8x64xf32>
    %981 = arith.divf %979, %980 : vector<8x64xf32>
    %982 = vector.extract_strided_slice %981 {offsets = [0, 0], sizes = [8, 16], strides = [1, 1]} : vector<8x64xf32> to vector<8x16xf32>
    %983 = vector.extract_strided_slice %981 {offsets = [0, 16], sizes = [8, 16], strides = [1, 1]} : vector<8x64xf32> to vector<8x16xf32>
    %984 = vector.extract_strided_slice %981 {offsets = [0, 48], sizes = [8, 16], strides = [1, 1]} : vector<8x64xf32> to vector<8x16xf32>
    %985 = vector.extract_strided_slice %976 {offsets = [0, 32], sizes = [8, 16], strides = [1, 1]} : vector<8x64xf32> to vector<8x16xf32>
    %986 = math.tanh %985 : vector<8x16xf32>
    %987 = arith.mulf %983, %945 : vector<8x16xf32>
    %988 = arith.mulf %982, %986 : vector<8x16xf32>
    %989 = arith.addf %987, %988 : vector<8x16xf32>
    %990 = math.tanh %989 : vector<8x16xf32>
    %991 = arith.mulf %984, %990 : vector<8x16xf32>
    %992 = arith.subf %991, %941 : vector<8x16xf32>
    %993 = vector.broadcast %238 : vector<8x1xf32> to vector<8x16xf32>
    %994 = arith.mulf %993, %992 : vector<8x16xf32>
    %995 = arith.addf %941, %994 : vector<8x16xf32>
    %996 = arith.subf %989, %945 : vector<8x16xf32>
    %997 = vector.broadcast %238 : vector<8x1xf32> to vector<8x16xf32>
    %998 = arith.mulf %997, %996 : vector<8x16xf32>
    %999 = arith.addf %945, %998 : vector<8x16xf32>
    %1000 = vector.extract_strided_slice %694 {offsets = [16, 64], sizes = [8, 64], strides = [1, 1]} : vector<64x128xf32> to vector<8x64xf32>
    %1001 = arith.truncf %968 : vector<8x16xf32> to vector<8x16xbf16>
    %cst_133 = arith.constant dense<0.000000e+00> : vector<8x64xf32>
    %1002 = tpu.matmul %1001, %698, %cst_133 {dimension_numbers = #tpu.dot_dimension_numbers<[1], [0], [0], [1], [0, 0, 1, 1], [], []>} : vector<8x16xbf16>, vector<16x64xbf16>, vector<8x64xf32> -> vector<8x64xf32>
    %1003 = arith.addf %1000, %1002 : vector<8x64xf32>
    %1004 = arith.negf %1003 : vector<8x64xf32>
    %1005 = math.exp %1004 : vector<8x64xf32>
    %cst_134 = arith.constant 1.000000e+00 : f32
    %1006 = vector.broadcast %cst_134 : f32 to vector<8x64xf32>
    %1007 = arith.addf %1006, %1005 : vector<8x64xf32>
    %1008 = arith.divf %1006, %1007 : vector<8x64xf32>
    %1009 = vector.extract_strided_slice %1008 {offsets = [0, 0], sizes = [8, 16], strides = [1, 1]} : vector<8x64xf32> to vector<8x16xf32>
    %1010 = vector.extract_strided_slice %1008 {offsets = [0, 16], sizes = [8, 16], strides = [1, 1]} : vector<8x64xf32> to vector<8x16xf32>
    %1011 = vector.extract_strided_slice %1008 {offsets = [0, 48], sizes = [8, 16], strides = [1, 1]} : vector<8x64xf32> to vector<8x16xf32>
    %1012 = vector.extract_strided_slice %1003 {offsets = [0, 32], sizes = [8, 16], strides = [1, 1]} : vector<8x64xf32> to vector<8x16xf32>
    %1013 = math.tanh %1012 : vector<8x16xf32>
    %1014 = arith.mulf %1010, %972 : vector<8x16xf32>
    %1015 = arith.mulf %1009, %1013 : vector<8x16xf32>
    %1016 = arith.addf %1014, %1015 : vector<8x16xf32>
    %1017 = math.tanh %1016 : vector<8x16xf32>
    %1018 = arith.mulf %1011, %1017 : vector<8x16xf32>
    %1019 = arith.subf %1018, %968 : vector<8x16xf32>
    %1020 = vector.broadcast %235 : vector<8x1xf32> to vector<8x16xf32>
    %1021 = arith.mulf %1020, %1019 : vector<8x16xf32>
    %1022 = arith.addf %968, %1021 : vector<8x16xf32>
    %1023 = arith.subf %1016, %972 : vector<8x16xf32>
    %1024 = vector.broadcast %235 : vector<8x1xf32> to vector<8x16xf32>
    %1025 = arith.mulf %1024, %1023 : vector<8x16xf32>
    %1026 = arith.addf %972, %1025 : vector<8x16xf32>
    %1027 = vector.extract_strided_slice %694 {offsets = [48, 0], sizes = [8, 64], strides = [1, 1]} : vector<64x128xf32> to vector<8x64xf32>
    %1028 = arith.truncf %995 : vector<8x16xf32> to vector<8x16xbf16>
    %cst_135 = arith.constant dense<0.000000e+00> : vector<8x64xf32>
    %1029 = tpu.matmul %1028, %696, %cst_135 {dimension_numbers = #tpu.dot_dimension_numbers<[1], [0], [0], [1], [0, 0, 1, 1], [], []>} : vector<8x16xbf16>, vector<16x64xbf16>, vector<8x64xf32> -> vector<8x64xf32>
    %1030 = arith.addf %1027, %1029 : vector<8x64xf32>
    %1031 = arith.negf %1030 : vector<8x64xf32>
    %1032 = math.exp %1031 : vector<8x64xf32>
    %cst_136 = arith.constant 1.000000e+00 : f32
    %1033 = vector.broadcast %cst_136 : f32 to vector<8x64xf32>
    %1034 = arith.addf %1033, %1032 : vector<8x64xf32>
    %1035 = arith.divf %1033, %1034 : vector<8x64xf32>
    %1036 = vector.extract_strided_slice %1035 {offsets = [0, 0], sizes = [8, 16], strides = [1, 1]} : vector<8x64xf32> to vector<8x16xf32>
    %1037 = vector.extract_strided_slice %1035 {offsets = [0, 16], sizes = [8, 16], strides = [1, 1]} : vector<8x64xf32> to vector<8x16xf32>
    %1038 = vector.extract_strided_slice %1035 {offsets = [0, 48], sizes = [8, 16], strides = [1, 1]} : vector<8x64xf32> to vector<8x16xf32>
    %1039 = vector.extract_strided_slice %1030 {offsets = [0, 32], sizes = [8, 16], strides = [1, 1]} : vector<8x64xf32> to vector<8x16xf32>
    %1040 = math.tanh %1039 : vector<8x16xf32>
    %1041 = arith.mulf %1037, %999 : vector<8x16xf32>
    %1042 = arith.mulf %1036, %1040 : vector<8x16xf32>
    %1043 = arith.addf %1041, %1042 : vector<8x16xf32>
    %1044 = math.tanh %1043 : vector<8x16xf32>
    %1045 = arith.mulf %1038, %1044 : vector<8x16xf32>
    %1046 = arith.subf %1045, %995 : vector<8x16xf32>
    %1047 = vector.broadcast %239 : vector<8x1xf32> to vector<8x16xf32>
    %1048 = arith.mulf %1047, %1046 : vector<8x16xf32>
    %1049 = arith.addf %995, %1048 : vector<8x16xf32>
    %1050 = arith.subf %1043, %999 : vector<8x16xf32>
    %1051 = vector.broadcast %239 : vector<8x1xf32> to vector<8x16xf32>
    %1052 = arith.mulf %1051, %1050 : vector<8x16xf32>
    %1053 = arith.addf %999, %1052 : vector<8x16xf32>
    %1054 = vector.extract_strided_slice %694 {offsets = [8, 64], sizes = [8, 64], strides = [1, 1]} : vector<64x128xf32> to vector<8x64xf32>
    %1055 = arith.truncf %1022 : vector<8x16xf32> to vector<8x16xbf16>
    %cst_137 = arith.constant dense<0.000000e+00> : vector<8x64xf32>
    %1056 = tpu.matmul %1055, %698, %cst_137 {dimension_numbers = #tpu.dot_dimension_numbers<[1], [0], [0], [1], [0, 0, 1, 1], [], []>} : vector<8x16xbf16>, vector<16x64xbf16>, vector<8x64xf32> -> vector<8x64xf32>
    %1057 = arith.addf %1054, %1056 : vector<8x64xf32>
    %1058 = arith.negf %1057 : vector<8x64xf32>
    %1059 = math.exp %1058 : vector<8x64xf32>
    %cst_138 = arith.constant 1.000000e+00 : f32
    %1060 = vector.broadcast %cst_138 : f32 to vector<8x64xf32>
    %1061 = arith.addf %1060, %1059 : vector<8x64xf32>
    %1062 = arith.divf %1060, %1061 : vector<8x64xf32>
    %1063 = vector.extract_strided_slice %1062 {offsets = [0, 0], sizes = [8, 16], strides = [1, 1]} : vector<8x64xf32> to vector<8x16xf32>
    %1064 = vector.extract_strided_slice %1062 {offsets = [0, 16], sizes = [8, 16], strides = [1, 1]} : vector<8x64xf32> to vector<8x16xf32>
    %1065 = vector.extract_strided_slice %1062 {offsets = [0, 48], sizes = [8, 16], strides = [1, 1]} : vector<8x64xf32> to vector<8x16xf32>
    %1066 = vector.extract_strided_slice %1057 {offsets = [0, 32], sizes = [8, 16], strides = [1, 1]} : vector<8x64xf32> to vector<8x16xf32>
    %1067 = math.tanh %1066 : vector<8x16xf32>
    %1068 = arith.mulf %1064, %1026 : vector<8x16xf32>
    %1069 = arith.mulf %1063, %1067 : vector<8x16xf32>
    %1070 = arith.addf %1068, %1069 : vector<8x16xf32>
    %1071 = math.tanh %1070 : vector<8x16xf32>
    %1072 = arith.mulf %1065, %1071 : vector<8x16xf32>
    %1073 = arith.subf %1072, %1022 : vector<8x16xf32>
    %1074 = vector.broadcast %234 : vector<8x1xf32> to vector<8x16xf32>
    %1075 = arith.mulf %1074, %1073 : vector<8x16xf32>
    %1076 = arith.addf %1022, %1075 : vector<8x16xf32>
    %1077 = arith.subf %1070, %1026 : vector<8x16xf32>
    %1078 = vector.broadcast %234 : vector<8x1xf32> to vector<8x16xf32>
    %1079 = arith.mulf %1078, %1077 : vector<8x16xf32>
    %1080 = arith.addf %1026, %1079 : vector<8x16xf32>
    %1081 = vector.extract_strided_slice %694 {offsets = [56, 0], sizes = [8, 64], strides = [1, 1]} : vector<64x128xf32> to vector<8x64xf32>
    %1082 = arith.truncf %1049 : vector<8x16xf32> to vector<8x16xbf16>
    %cst_139 = arith.constant dense<0.000000e+00> : vector<8x64xf32>
    %1083 = tpu.matmul %1082, %696, %cst_139 {dimension_numbers = #tpu.dot_dimension_numbers<[1], [0], [0], [1], [0, 0, 1, 1], [], []>} : vector<8x16xbf16>, vector<16x64xbf16>, vector<8x64xf32> -> vector<8x64xf32>
    %1084 = arith.addf %1081, %1083 : vector<8x64xf32>
    %1085 = arith.negf %1084 : vector<8x64xf32>
    %1086 = math.exp %1085 : vector<8x64xf32>
    %cst_140 = arith.constant 1.000000e+00 : f32
    %1087 = vector.broadcast %cst_140 : f32 to vector<8x64xf32>
    %1088 = arith.addf %1087, %1086 : vector<8x64xf32>
    %1089 = arith.divf %1087, %1088 : vector<8x64xf32>
    %1090 = vector.extract_strided_slice %1089 {offsets = [0, 0], sizes = [8, 16], strides = [1, 1]} : vector<8x64xf32> to vector<8x16xf32>
    %1091 = vector.extract_strided_slice %1089 {offsets = [0, 16], sizes = [8, 16], strides = [1, 1]} : vector<8x64xf32> to vector<8x16xf32>
    %1092 = vector.extract_strided_slice %1089 {offsets = [0, 48], sizes = [8, 16], strides = [1, 1]} : vector<8x64xf32> to vector<8x16xf32>
    %1093 = vector.extract_strided_slice %1084 {offsets = [0, 32], sizes = [8, 16], strides = [1, 1]} : vector<8x64xf32> to vector<8x16xf32>
    %1094 = math.tanh %1093 : vector<8x16xf32>
    %1095 = arith.mulf %1091, %1053 : vector<8x16xf32>
    %1096 = arith.mulf %1090, %1094 : vector<8x16xf32>
    %1097 = arith.addf %1095, %1096 : vector<8x16xf32>
    %1098 = math.tanh %1097 : vector<8x16xf32>
    %1099 = arith.mulf %1092, %1098 : vector<8x16xf32>
    %1100 = arith.subf %1099, %1049 : vector<8x16xf32>
    %1101 = vector.broadcast %240 : vector<8x1xf32> to vector<8x16xf32>
    %1102 = arith.mulf %1101, %1100 : vector<8x16xf32>
    %1103 = arith.addf %1049, %1102 : vector<8x16xf32>
    %1104 = vector.extract_strided_slice %694 {offsets = [0, 64], sizes = [8, 64], strides = [1, 1]} : vector<64x128xf32> to vector<8x64xf32>
    %1105 = arith.truncf %1076 : vector<8x16xf32> to vector<8x16xbf16>
    %cst_141 = arith.constant dense<0.000000e+00> : vector<8x64xf32>
    %1106 = tpu.matmul %1105, %698, %cst_141 {dimension_numbers = #tpu.dot_dimension_numbers<[1], [0], [0], [1], [0, 0, 1, 1], [], []>} : vector<8x16xbf16>, vector<16x64xbf16>, vector<8x64xf32> -> vector<8x64xf32>
    %1107 = arith.addf %1104, %1106 : vector<8x64xf32>
    %1108 = arith.negf %1107 : vector<8x64xf32>
    %1109 = math.exp %1108 : vector<8x64xf32>
    %cst_142 = arith.constant 1.000000e+00 : f32
    %1110 = vector.broadcast %cst_142 : f32 to vector<8x64xf32>
    %1111 = arith.addf %1110, %1109 : vector<8x64xf32>
    %1112 = arith.divf %1110, %1111 : vector<8x64xf32>
    %1113 = vector.extract_strided_slice %1112 {offsets = [0, 0], sizes = [8, 16], strides = [1, 1]} : vector<8x64xf32> to vector<8x16xf32>
    %1114 = vector.extract_strided_slice %1112 {offsets = [0, 16], sizes = [8, 16], strides = [1, 1]} : vector<8x64xf32> to vector<8x16xf32>
    %1115 = vector.extract_strided_slice %1112 {offsets = [0, 48], sizes = [8, 16], strides = [1, 1]} : vector<8x64xf32> to vector<8x16xf32>
    %1116 = vector.extract_strided_slice %1107 {offsets = [0, 32], sizes = [8, 16], strides = [1, 1]} : vector<8x64xf32> to vector<8x16xf32>
    %1117 = math.tanh %1116 : vector<8x16xf32>
    %1118 = arith.mulf %1114, %1080 : vector<8x16xf32>
    %1119 = arith.mulf %1113, %1117 : vector<8x16xf32>
    %1120 = arith.addf %1118, %1119 : vector<8x16xf32>
    %1121 = math.tanh %1120 : vector<8x16xf32>
    %1122 = arith.mulf %1115, %1121 : vector<8x16xf32>
    %1123 = arith.subf %1122, %1076 : vector<8x16xf32>
    %1124 = vector.broadcast %233 : vector<8x1xf32> to vector<8x16xf32>
    %1125 = arith.mulf %1124, %1123 : vector<8x16xf32>
    %1126 = arith.addf %1076, %1125 : vector<8x16xf32>
    %c376 = arith.constant 376 : index
    %c0_143 = arith.constant 0 : index
    %1127 = vector.load %arg0[%c376, %c0_143] : memref<472x128xf32, #tpu.memory_space<vmem>>, vector<32x16xf32>
    %1128 = arith.truncf %1127 : vector<32x16xf32> to vector<32x16xbf16>
    %1129 = arith.truncf %1126 : vector<8x16xf32> to vector<8x16xbf16>
    %1130 = vector.extract_strided_slice %1128 {offsets = [0, 0], sizes = [16, 16], strides = [1, 1]} : vector<32x16xbf16> to vector<16x16xbf16>
    %cst_144 = arith.constant dense<0.000000e+00> : vector<8x16xf32>
    %1131 = tpu.matmul %1129, %1130, %cst_144 {dimension_numbers = #tpu.dot_dimension_numbers<[1], [0], [0], [1], [0, 0, 1, 1], [], []>} : vector<8x16xbf16>, vector<16x16xbf16>, vector<8x16xf32> -> vector<8x16xf32>
    %1132 = arith.truncf %1103 : vector<8x16xf32> to vector<8x16xbf16>
    %1133 = vector.extract_strided_slice %1128 {offsets = [16, 0], sizes = [16, 16], strides = [1, 1]} : vector<32x16xbf16> to vector<16x16xbf16>
    %cst_145 = arith.constant dense<0.000000e+00> : vector<8x16xf32>
    %1134 = tpu.matmul %1132, %1133, %cst_145 {dimension_numbers = #tpu.dot_dimension_numbers<[1], [0], [0], [1], [0, 0, 1, 1], [], []>} : vector<8x16xbf16>, vector<16x16xbf16>, vector<8x16xf32> -> vector<8x16xf32>
    %1135 = arith.addf %1131, %1134 : vector<8x16xf32>
    %c408 = arith.constant 408 : index
    %c0_146 = arith.constant 0 : index
    %1136 = vector.load %arg0[%c408, %c0_146] : memref<472x128xf32, #tpu.memory_space<vmem>>, vector<1x16xf32>
    %1137 = vector.broadcast %1136 : vector<1x16xf32> to vector<8x16xf32>
    %1138 = arith.addf %1135, %1137 : vector<8x16xf32>
    %c416 = arith.constant 416 : index
    %c0_147 = arith.constant 0 : index
    %1139 = vector.load %arg0[%c416, %c0_147] : memref<472x128xf32, #tpu.memory_space<vmem>>, vector<48x2xf32>
    %1140 = vector.extract_strided_slice %1139 {offsets = [0, 0], sizes = [16, 2], strides = [1, 1]} : vector<48x2xf32> to vector<16x2xf32>
    %cst_148 = arith.constant dense<0.000000e+00> : vector<8x2xf32>
    %1141 = tpu.matmul %37, %1140, %cst_148 {dimension_numbers = #tpu.dot_dimension_numbers<[1], [0], [0], [1], [0, 0, 1, 1], [], []>} : vector<8x16xf32>, vector<16x2xf32>, vector<8x2xf32> -> vector<8x2xf32>
    %1142 = vector.extract_strided_slice %1139 {offsets = [16, 0], sizes = [16, 2], strides = [1, 1]} : vector<48x2xf32> to vector<16x2xf32>
    %cst_149 = arith.constant dense<0.000000e+00> : vector<8x2xf32>
    %1143 = tpu.matmul %231, %1142, %cst_149 {dimension_numbers = #tpu.dot_dimension_numbers<[1], [0], [0], [1], [0, 0, 1, 1], [], []>} : vector<8x16xf32>, vector<16x2xf32>, vector<8x2xf32> -> vector<8x2xf32>
    %1144 = arith.addf %1141, %1143 : vector<8x2xf32>
    %1145 = vector.extract_strided_slice %1139 {offsets = [32, 0], sizes = [16, 2], strides = [1, 1]} : vector<48x2xf32> to vector<16x2xf32>
    %cst_150 = arith.constant dense<0.000000e+00> : vector<8x2xf32>
    %1146 = tpu.matmul %1138, %1145, %cst_150 {dimension_numbers = #tpu.dot_dimension_numbers<[1], [0], [0], [1], [0, 0, 1, 1], [], []>} : vector<8x16xf32>, vector<16x2xf32>, vector<8x2xf32> -> vector<8x2xf32>
    %1147 = arith.addf %1144, %1146 : vector<8x2xf32>
    %c464 = arith.constant 464 : index
    %c0_151 = arith.constant 0 : index
    %1148 = vector.load %arg0[%c464, %c0_151] : memref<472x128xf32, #tpu.memory_space<vmem>>, vector<1x2xf32>
    %1149 = vector.broadcast %1148 : vector<1x2xf32> to vector<8x2xf32>
    %1150 = arith.addf %1147, %1149 : vector<8x2xf32>
    %c0_152 = arith.constant 0 : index
    %c0_153 = arith.constant 0 : index
    %1151 = vector.load %arg2[%c0_152, %c0_153] : memref<8x2xf32, #tpu.memory_space<vmem>>, vector<8x2xf32>
    tpu.vector_store %arg2[%c0_152, %c0_153], %1150 {strides = array<i32>} : memref<8x2xf32, #tpu.memory_space<vmem>>, vector<8x2xf32>,
    return
  }
}

</mosaic_0001>

<bundles_post_ra>
// kernel: my_model_forward.1
= control target key start
LH: loop header
LB: loop body
LE: loop exit
PB: predicated region body
PF: predicated region fallthrough
CT: control target
= control target key end

     0   :  { %v3694_v0 = vmov 0   ;;  %vm36_vm0 = vcmask 130048   ;;  %vm177_vm1 = vcmask 1042432   ;;  %vm170_vm2 = vcmask 48128   ;;  %s3695_s15 = smov 96   ;;  %s3696_s16 = smov 16   ;;  %s4884_s1 = inlined_call_operand.vmem [shape: f32[200,128], index: 1, kind: input, shape index: {}]   ;;  %s4885_s0 = inlined_call_operand.vmem [shape: f32[472,128], index: 0, kind: input, shape index: {}]   ;;  %s4886_s2 = inlined_call_operand.vmem [shape: f32[8,2], index: 2, kind: output, shape index: {}]  }
   0x1   :  { %3360 = vset.pattern.permute.xlu0 %v3694_v0  ;;  %v15_v1 = vld [vmem:[%s4884_s1 + $0x10] sm:$0xff]  ;;  %3361 = vset.pattern.permute.xlu2 %v3694_v0  ;;  %v16_v2 = vld [vmem:[%s4884_s1 + $0x18] sm:$0xff]  ;;  %v3363_v4 = vld [vmem:[%s4885_s0] ss:$0 sm:$0xff]  ;;  %s3697_s17 = smov 32   ;;  %s3698_s30 = smov 80  }
   0x2   :  { %22 = vperm.xlu0 %3360, %v15_v1   ;;  %3362 = vset.pattern.permute.xlu1 %v3694_v0  ;;  %v12_v8 = vld [vmem:[%s4884_s1] sm:$0xff]  ;;  %v13_v9 = vld [vmem:[%s4884_s1 + $0x8] sm:$0xff]  ;;  %v57_v12 = vld [vmem:[%s4885_s0 + $0x10] sm:$0xff]  ;;  %s3699_s9 = smov 64  }
   0x3   :  { %v14_v11 = vpack.c.bf16 %v13_v9, %v12_v8  ;;  %v58_v13 = vld [vmem:[%s4885_s0 + $0x18] sm:$0xff]  ;;  %v3364_v16 = vld [vmem:[%s4885_s0 + $0x8] ss:$0 sm:$0xff]  ;;  %v98_v27 = vld [vmem:[%s4885_s0 + $0x30] sm:$0xff] }
   0x4   :  { %v59_v14 = vpack.c.bf16 %v58_v13, %v57_v12  ;;  %v97_v26 = vld [vmem:[%s4885_s0 + $0x28] sm:$0xff]  ;;  %v166_v29 = vld [vmem:[%s4885_s0 + $0x40] sm:$0x3f]  ;;  %v152_v33 = vld [vmem:[%s4885_s0 + $0x50] sm:$0xff] }
   0x5   :  { %v99_v28 = vpack.c.bf16 %v98_v27, %v97_v26  ;;  %v167_v30 = vpack.c.bf16 %v166_v29, %v166_v29  ;;  %v151_v32 = vld [vmem:[%s4885_s0 + $0x48] sm:$0xff]  ;;  %v161_v36 = vld [vmem:[%s4884_s1 + $0x30] sm:$0xff]  ;;  %v3365_v39 = vld [vmem:[%s4885_s0 + $0x20] ss:$0 sm:$0xff] }
   0x6   :  { %70 = vmatpush.bf16.msra.mxu1 %v59_v14  ;;  %v160_v34 = vld [vmem:[%s4884_s1 + $0x28] sm:$0xff]  ;;  %v3764_v35 = vpack.c.bf16 %v152_v33, %v151_v32  ;;  %v3781_v48 = vld [vmem:[%s4885_s0 + $0x58] ss:$0 sm:$0xff]  ;;  %v154_v13 = vld [vmem:[%s4885_s0 + $0x60] sm:$0xff] }
   0x7   :  { %110 = vmatpush.bf16.msra.mxu3 %v99_v28  ;;  %v179_v31 = vsel %vm177_vm1, %v167_v30, 0  ;;  %v164_v37 = vpack.c.bf16 %v161_v36, %v160_v34  ;;  %v155_v14 = vld [vmem:[%s4885_s0 + $0x68] sm:$0xff]  ;;  %v3820_v34 = vld [vmem:[%s4885_s0 + $0x80] ss:$0 sm:$0xff] }
   0xa   :  { %27 = vperm.xlu0 %3360, %v16_v2  }
   0xb   :  { %212 = vmatpush.bf16.msrb.mxu3 %v3764_v35 }
  0x74   :  { %v23_v3 = vpop.permute.xlu0 %22 }
  0x75   :  { %v31_v6 = vmul.f32 %v3363_v4, %v23_v3 }
  0x7c   :  { %v28_v5 = vpop.permute.xlu0 %27 }
  0x7d   :  { %v32_v7 = vmul.f32 %v3363_v4, %v28_v5 }
  0x7f   :  { %v33_v10 = vpack.c.bf16 %v32_v7, %v31_v6 }
  0x81   :  { %47 = vmatpush.bf16.msra.mxu0 %v33_v10 }
  0x84   :  { %3250 = vmatmul.msk.bf16.vlgmr.msra.gmra.mxu0 %vm36_vm0, %v14_v11 }
 0x101   :  { %v49_v15 = vpop.f32.mrf.mxu0 }
 0x102   :  { %v50_v17 = vadd.f32 %v3364_v16, %v49_v15  ;;  %v156_v15 = vpack.c.bf16 %v155_v14, %v154_v13 }
 0x104   :  { %v54_v20 = vmax.f32 %v50_v17, 0.0 }
 0x109   :  { %v51_v18 = vpop.f32.mrf.mxu0 }
 0x10a   :  { %v52_v19 = vadd.f32 %v3364_v16, %v51_v18  ;;  %v3367_v16 = vld [vmem:[%s4885_s0 + $0x38] ss:$0 sm:$0xff]  ;;  %v157_v18 = vld [vmem:[%s4885_s0 + $0x70] sm:$0xff] }
 0x10c   :  { %v55_v21 = vmax.f32 %v52_v19, 0.0  ;;  %v158_v19 = vld [vmem:[%s4885_s0 + $0x78] sm:$0xff] }
 0x10e   :  { %v56_v22 = vpack.c.bf16 %v55_v21, %v54_v20 }
 0x110   :  { %3251 = vmatmul.msk.bf16.vlgmr.msra.gmra.mxu1 %vm36_vm0, %v56_v22  ;;  %v17_v22 = vld [vmem:[%s4884_s1 + $0x20] sm:$0xff] }
 0x18d   :  { %v72_v23 = vpop.f32.mrf.mxu1 }
 0x195   :  { %v74_v24 = vpop.f32.mrf.mxu1 }
 0x196   :  { %v77_v25 = vpack.c.bf16 %v74_v24, %v72_v23  ;;  %v159_v23 = vpack.c.bf16 %v158_v19, %v157_v18 }
 0x198   :  { %87 = vmatpush.bf16.msra.mxu2 %v77_v25  ;;  %v18_v25 = vpack.c.bf16 %v17_v22, %v17_v22 }
 0x19b   :  { %3252 = vmatmul.msk.bf16.vlgmr.msra.gmra.mxu2 %vm36_vm0, %v14_v11 }
 0x19c   :  { %188 = vmatpush.bf16.msrb.mxu2 %v179_v31 }
 0x1a0   :  { %463 = vmatpush.bf16.msra.mxu2 %v3764_v35 }
 0x1ab   :  { %3256 = vmatmul.msk.bf16.vlgmr.msrb.gmra.mxu2 %vm170_vm2, %v164_v37 }
 0x1ac   :  { %650 = vmatpush.bf16.msrb.mxu2 %v156_v15 }
 0x21e   :  { %v89_v38 = vpop.f32.mrf.mxu2 }
 0x21f   :  { %v90_v40 = vadd.f32 %v3365_v39, %v89_v38 }
 0x221   :  { %v94_v43 = vmax.f32 %v90_v40, 0.0 }
 0x226   :  { %v91_v41 = vpop.f32.mrf.mxu2 }
 0x227   :  { %v92_v42 = vadd.f32 %v3365_v39, %v91_v41 }
 0x229   :  { %v95_v44 = vmax.f32 %v92_v42, 0.0 }
 0x22b   :  { %v96_v45 = vpack.c.bf16 %v95_v44, %v94_v43 }
 0x22d   :  { %3253 = vmatmul.msk.bf16.vlgmr.msra.gmra.mxu3 %vm36_vm0, %v96_v45 }
 0x22e   :  { %334 = vmatpush.bf16.msra.mxu3 %v3764_v35  ;;  %v190_v50 = vpop.f32.mrf.mxu2 }
 0x22f   :  { %v191_v51 = vadd.f32 %v3781_v48, %v190_v50 }
 0x236   :  { %v192_v37 = vpop.f32.mrf.mxu2 }
 0x237   :  { %v193_v39 = vadd.f32 %v3781_v48, %v192_v37 }
 0x23d   :  { %213 = vmatmul.bf16.vlgmr.msrb.gmra.mxu3 %v3694_v0 }
 0x23e   :  { %521 = vmatpush.bf16.msrb.mxu3 %v156_v15 }
 0x2b0   :  { %v112_v46 = vpop.f32.mrf.mxu3 }
 0x2b8   :  { %v114_v47 = vpop.f32.mrf.mxu3 }
 0x2b9   :  { %v117_v49 = vpack.c.bf16 %v114_v47, %v112_v46 }
 0x2bb   :  { %127 = vmatpush.bf16.msrb.mxu0 %v117_v49 }
 0x2be   :  { %3254 = vmatmul.msk.bf16.vlgmr.msrb.gmra.mxu0 %vm36_vm0, %v14_v11 }
 0x2bf   :  { %270 = vmatpush.bf16.msra.mxu0 %v156_v15 }
 0x2c0   :  { %v214_v52 = vpop.f32.mrf.mxu3 }
 0x2c1   :  { %v218_v53 = vadd.f32 %v214_v52, %v191_v51 }
 0x2c3   :  { %3374 = vtanh.f32 %v218_v53  ;;  %v3258_v56 = vmul.f32 -1.442695, %v218_v53  ;;  %392 = vmatpush.bf16.msrb.mxu0 %v156_v15 }
 0x2c5   :  { %3376 = vpow2.f32 %v3258_v56 }
 0x2c8   :  { %v216_v54 = vpop.f32.mrf.mxu3 }
 0x2c9   :  { %v3375_v55 = vpop.eup %3374 }
 0x2ca   :  { %241 = vrot.lane.b32.xlu1 %v3375_v55, %s3695_s15 }
 0x2cb   :  { %v3377_v57 = vpop.eup %3376 }
 0x2cc   :  { %v222_v58 = vadd.f32 1.0, %v3377_v57 }
 0x2ce   :  { %3378 = vrcp.f32 %v222_v58  ;;  %v234_v1 = vand.u32 2147483648, %v222_v58  ;;  %vm228_vm4 = vweird.f32 %v222_v58  ;;  %v232_v2 = vand.u32 2147483647, %v222_v58 }
 0x2d0   :  { %v235_v4 = vor.u32 1.1754944e-38, %v234_v1  ;;  %vm233_vm6 = vcmp.eq.f32.partialorder %v232_v2, 8.507059e+37 }
 0x2d4   :  { %v3379_v59 = vpop.eup %3378 }
 0x2d5   :  { %v224_v60 = vmul.f32 %v3379_v59, %v222_v58  ;;  %vm229_vm3 = vweird.f32 %v3379_v59 }
 0x2d6   :  { %vm230_vm5 = vmor %vm228_vm4, %vm229_vm3 }
 0x2d7   :  { %v225_v61 = vsub.f32 1.0, %v224_v60 }
 0x2d9   :  { %v226_v62 = vmul.f32 %v3379_v59, %v225_v61 }
 0x2db   :  { %v227_v63 = vadd.f32 %v3379_v59, %v226_v62 }
 0x2dd   :  { %v231_v3 = vsel %vm230_vm5, %v3379_v59, %v227_v63 }
 0x2de   :  { %v236_v6 = vsel %vm233_vm6, %v235_v4, %v231_v3 }
 0x2df   :  { %v239_v8 = vmul.f32 0.0, %v236_v6 }
 0x33b   :  { %v129_v12 = vpop.f32.mrf.mxu0 }
 0x33c   :  { %v242_v5 = vpop.permute.xlu1 %241  ;;  %v130_v17 = vadd.f32 %v3367_v16, %v129_v12 }
 0x33d   :  { %v244_v7 = vmul.f32 %v242_v5, %v236_v6 }
 0x33f   :  { %246 = vrot.lane.b32.xlu1 %v244_v7, %s3696_s16 }
 0x343   :  { %v131_v20 = vpop.f32.mrf.mxu0 }
 0x344   :  { %v132_v21 = vadd.f32 %v3367_v16, %v131_v20 }
 0x346   :  { %v134_v24 = vpack.c.bf16 %v132_v21, %v130_v17 }
 0x348   :  { %145 = vmatpush.bf16.msrb.mxu1 %v134_v24 }
 0x34b   :  { %3255 = vmatmul.msk.bf16.vlgmr.msrb.gmra.mxu1 %vm36_vm0, %v18_v25 }
 0x34c   :  { %283 = vmatpush.bf16.msra.mxu1 %v159_v23 }
 0x350   :  { %412 = vmatpush.bf16.msrb.mxu1 %v159_v23 }
 0x35b   :  { %284 = vmatmul.bf16.vlgmr.msra.gmra.mxu1 %v3694_v0 }
 0x35c   :  { %592 = vmatpush.bf16.msra.mxu1 %v3764_v35 }
 0x3b1   :  { %v247_v9 = vpop.permute.xlu1 %246 }
 0x3b2   :  { %v3787_v10 = vadd.f32 %v247_v9, %v239_v8 }
 0x3b4   :  { %3380 = vtanh.f32 %v3787_v10 }
 0x3ba   :  { %v3381_v11 = vpop.eup %3380 }
 0x3bb   :  { %252 = vrot.lane.b32.xlu2 %v3381_v11, %s3697_s17 }
 0x3c8   :  { %v3815_v30 = vpop.f32.mrf.mxu1 }
 0x3d0   :  { %v149_v31 = vpop.f32.mrf.mxu1 }
 0x3d8   :  { %v285_v32 = vpop.f32.mrf.mxu1 }
 0x3e0   :  { %v287_v33 = vpop.f32.mrf.mxu1 }
 0x415   :  { %v253_v26 = vpop.permute.xlu2 %252 }
 0x416   :  { %v255_v27 = vmul.f32 %v253_v26, %v236_v6 }
 0x418   :  { %v256_v28 = vpack.c.bf16 %v255_v27, %v255_v27 }
 0x41a   :  { %258 = vrot.lane.b32.xlu2 %v256_v28, %s3698_s30 }
 0x474   :  { %v259_v29 = vpop.permute.xlu2 %258 }
 0x475   :  { %3259 = vmatmul.msk.bf16.vlgmr.msra.gmra.mxu0 %vm36_vm0, %v259_v29  ;;  %3261 = vmatmul.msk.bf16.vlgmr.msra.gmra.mxu3 %vm36_vm0, %v259_v29 }
 0x476   :  { %541 = vmatpush.bf16.msra.mxu0 %v159_v23  ;;  %670 = vmatpush.bf16.msra.mxu3 %v159_v23  ;;  %v163_v23 = vld [vmem:[%s4884_s1 + $0x40] sm:$0xff] }
 0x4f2   :  { %v272_v36 = vpop.f32.mrf.mxu0 }
 0x4f3   :  { %v273_v35 = vadd.f32 %v3820_v34, %v272_v36 }
 0x4f5   :  { %v289_v38 = vadd.f32 %v285_v32, %v273_v35 }
 0x4f7   :  { %3382 = vtanh.f32 %v289_v38  ;;  %v3260_v46 = vmul.f32 -1.442695, %v289_v38 }
 0x4f8   :  { %v336_v40 = vpop.f32.mrf.mxu3 }
 0x4f9   :  { %v340_v41 = vadd.f32 %v336_v40, %v193_v39 }
 0x4fa   :  { %v274_v42 = vpop.f32.mrf.mxu0 }
 0x4fb   :  { %3384 = vtanh.f32 %v340_v41  ;;  %v3262_v47 = vmul.f32 -1.442695, %v340_v41 }
 0x4fc   :  { %3386 = vpow2.f32 %v3260_v46 }
 0x4fd   :  { %v3383_v43 = vpop.eup %3382  ;;  %3388 = vpow2.f32 %v3262_v47 }
 0x4fe   :  { %312 = vrot.lane.b32.xlu1 %v3383_v43, %s3695_s15 }
 0x500   :  { %v338_v44 = vpop.f32.mrf.mxu3 }
 0x501   :  { %v3385_v45 = vpop.eup %3384 }
 0x502   :  { %363 = vrot.lane.b32.xlu0 %v3385_v45, %s3695_s15  ;;  %v3387_v49 = vpop.eup %3386 }
 0x503   :  { %v293_v50 = vadd.f32 1.0, %v3387_v49  ;;  %v3389_v51 = vpop.eup %3388 }
 0x504   :  { %v344_v52 = vadd.f32 1.0, %v3389_v51 }
 0x505   :  { %3390 = vrcp.f32 %v293_v50  ;;  %v305_v62 = vand.u32 2147483648, %v293_v50  ;;  %vm299_vm8 = vweird.f32 %v293_v50  ;;  %v303_v63 = vand.u32 2147483647, %v293_v50 }
 0x506   :  { %3392 = vrcp.f32 %v344_v52  ;;  %v356_v4 = vand.u32 2147483648, %v344_v52  ;;  %vm350_vm12 = vweird.f32 %v344_v52  ;;  %v354_v5 = vand.u32 2147483647, %v344_v52 }
 0x507   :  { %v306_v3 = vor.u32 1.1754944e-38, %v305_v62  ;;  %vm304_vm11 = vcmp.eq.f32.partialorder %v303_v63, 8.507059e+37 }
 0x508   :  { %v357_v11 = vor.u32 1.1754944e-38, %v356_v4  ;;  %vm355_vm14 = vcmp.eq.f32.partialorder %v354_v5, 8.507059e+37 }
 0x50b   :  { %v3391_v53 = vpop.eup %3390 }
 0x50c   :  { %v295_v54 = vmul.f32 %v3391_v53, %v293_v50  ;;  %v3393_v55 = vpop.eup %3392  ;;  %vm300_vm7 = vweird.f32 %v3391_v53 }
 0x50d   :  { %v346_v57 = vmul.f32 %v3393_v55, %v344_v52  ;;  %vm301_vm9 = vmor %vm299_vm8, %vm300_vm7  ;;  %vm351_vm10 = vweird.f32 %v3393_v55 }
 0x50e   :  { %v296_v56 = vsub.f32 1.0, %v295_v54  ;;  %vm352_vm13 = vmor %vm350_vm12, %vm351_vm10 }
 0x50f   :  { %v347_v59 = vsub.f32 1.0, %v346_v57 }
 0x510   :  { %v297_v58 = vmul.f32 %v3391_v53, %v296_v56 }
 0x511   :  { %v348_v61 = vmul.f32 %v3393_v55, %v347_v59 }
 0x512   :  { %v298_v60 = vadd.f32 %v3391_v53, %v297_v58 }
 0x513   :  { %v349_v2 = vadd.f32 %v3393_v55, %v348_v61 }
 0x514   :  { %v302_v1 = vsel %vm301_vm9, %v3391_v53, %v298_v60  ;;  %vm723_vm9 = vcmask 1040384  }
 0x515   :  { %v307_v7 = vsel %vm304_vm11, %v306_v3, %v302_v1  ;;  %v353_v9 = vsel %vm352_vm13, %v3393_v55, %v349_v2 }
 0x516   :  { %v358_v13 = vsel %vm355_vm14, %v357_v11, %v353_v9  ;;  %v310_v19 = vmul.f32 0.0, %v307_v7  ;;  %vm725_vm14 = vcmask 1041408  }
 0x517   :  { %v361_v15 = vmul.f32 %v358_v13, %v3787_v10  ;;  %v162_v10 = vld [vmem:[%s4884_s1 + $0x38] sm:$0xff] }
 0x518   :  { %v165_v24 = vpack.c.bf16 %v163_v23, %v162_v10 }
 0x51a   :  { %3257 = vmatmul.msk.bf16.gmra.mxu2 %vm170_vm2, %v165_v24 }
 0x570   :  { %v313_v6 = vpop.permute.xlu1 %312 }
 0x571   :  { %v315_v8 = vmul.f32 %v313_v6, %v307_v7 }
 0x573   :  { %317 = vrot.lane.b32.xlu0 %v315_v8, %s3696_s16 }
 0x574   :  { %v364_v12 = vpop.permute.xlu0 %363 }
 0x575   :  { %v366_v14 = vmul.f32 %v364_v12, %v358_v13 }
 0x577   :  { %368 = vrot.lane.b32.xlu2 %v366_v14, %s3696_s16 }
 0x59d   :  { %v195_v36 = vpop.f32.mrf.mxu2 }
 0x59e   :  { %v196_v42 = vadd.f32 %v3781_v48, %v195_v36 }
 0x5a5   :  { %v3853_v37 = vpop.f32.mrf.mxu2 }
 0x5d1   :  { %v369_v16 = vpop.permute.xlu2 %368 }
 0x5d2   :  { %v3829_v17 = vadd.f32 %v369_v16, %v361_v15 }
 0x5d4   :  { %3394 = vtanh.f32 %v3829_v17 }
 0x5da   :  { %v3395_v18 = vpop.eup %3394 }
 0x5db   :  { %374 = vrot.lane.b32.xlu1 %v3395_v18, %s3697_s17 }
 0x5e5   :  { %v318_v20 = vpop.permute.xlu0 %317 }
 0x5e6   :  { %v3833_v21 = vadd.f32 %v318_v20, %v310_v19 }
 0x5e8   :  { %3396 = vtanh.f32 %v3833_v21 }
 0x5ee   :  { %v3397_v22 = vpop.eup %3396 }
 0x5ef   :  { %323 = vrot.lane.b32.xlu2 %v3397_v22, %s3697_s17 }
 0x649   :  { %v324_v25 = vpop.permute.xlu2 %323 }
 0x64a   :  { %v3844_v26 = vmul.f32 %v324_v25, %v307_v7 }
 0x64c   :  { %v398_v27 = vpack.c.bf16 %v3844_v26, %v3844_v26 }
 0x64d   :  { %v375_v28 = vpop.permute.xlu1 %374 }
 0x64e   :  { %v377_v29 = vmul.f32 %v375_v28, %v358_v13  ;;  %400 = vrot.lane.b32.xlu1 %v398_v27, %s3698_s30 }
 0x650   :  { %v378_v31 = vpack.c.bf16 %v377_v29, %v377_v29 }
 0x652   :  { %380 = vrot.lane.b32.xlu0 %v378_v31, %s3698_s30 }
 0x6c0   :  { %v401_v32 = vpop.permute.xlu1 %400 }
 0x6c1   :  { %3264 = vmatmul.msk.bf16.vlgmr.msrb.gmra.mxu1 %vm36_vm0, %v401_v32 }
 0x6c4   :  { %v381_v33 = vpop.permute.xlu0 %380 }
 0x6c5   :  { %3263 = vmatmul.msk.bf16.vlgmr.msrb.gmra.mxu0 %vm36_vm0, %v381_v33  ;;  %3266 = vmatmul.msk.bf16.vlgmr.msra.gmra.mxu2 %vm36_vm0, %v381_v33 }
 0x73e   :  { %v414_v35 = vpop.f32.mrf.mxu1 }
 0x742   :  { %v394_v38 = vpop.f32.mrf.mxu0 }
 0x743   :  { %v395_v39 = vadd.f32 %v3820_v34, %v394_v38 }
 0x745   :  { %v418_v40 = vadd.f32 %v414_v35, %v395_v39 }
 0x746   :  { %v416_v41 = vpop.f32.mrf.mxu1 }
 0x747   :  { %3398 = vtanh.f32 %v418_v40  ;;  %v3265_v53 = vmul.f32 -1.442695, %v418_v40 }
 0x748   :  { %v465_v43 = vpop.f32.mrf.mxu2 }
 0x749   :  { %v469_v44 = vadd.f32 %v465_v43, %v196_v42 }
 0x74a   :  { %v396_v45 = vpop.f32.mrf.mxu0 }
 0x74b   :  { %3400 = vtanh.f32 %v469_v44  ;;  %v3267_v50 = vmul.f32 -1.442695, %v469_v44 }
 0x74d   :  { %v3399_v46 = vpop.eup %3398  ;;  %3402 = vpow2.f32 %v3267_v50 }
 0x74e   :  { %441 = vrot.lane.b32.xlu0 %v3399_v46, %s3695_s15 }
 0x750   :  { %v467_v47 = vpop.f32.mrf.mxu2 }
 0x751   :  { %v3401_v49 = vpop.eup %3400 }
 0x752   :  { %492 = vrot.lane.b32.xlu2 %v3401_v49, %s3695_s15 }
 0x753   :  { %v3403_v51 = vpop.eup %3402 }
 0x754   :  { %v473_v52 = vadd.f32 1.0, %v3403_v51 }
 0x756   :  { %3404 = vrcp.f32 %v473_v52  ;;  %v485_v61 = vand.u32 2147483648, %v473_v52  ;;  %vm479_vm2 = vweird.f32 %v473_v52  ;;  %v483_v62 = vand.u32 2147483647, %v473_v52 }
 0x757   :  { %3406 = vpow2.f32 %v3265_v53 }
 0x758   :  { %v486_v2 = vor.u32 1.1754944e-38, %v485_v61  ;;  %vm484_vm4 = vcmp.eq.f32.partialorder %v483_v62, 8.507059e+37 }
 0x75c   :  { %v3405_v54 = vpop.eup %3404 }
 0x75d   :  { %v475_v55 = vmul.f32 %v3405_v54, %v473_v52  ;;  %v3407_v56 = vpop.eup %3406  ;;  %vm480_vm15 = vweird.f32 %v3405_v54 }
 0x75e   :  { %v422_v58 = vadd.f32 1.0, %v3407_v56  ;;  %vm481_vm3 = vmor %vm479_vm2, %vm480_vm15  ;;  %vm797_vm15 = vcmask 818176  }
 0x75f   :  { %v476_v57 = vsub.f32 1.0, %v475_v55 }
 0x760   :  { %3408 = vrcp.f32 %v422_v58  ;;  %v434_v11 = vand.u32 2147483648, %v422_v58  ;;  %vm428_vm6 = vweird.f32 %v422_v58  ;;  %v432_v12 = vand.u32 2147483647, %v422_v58 }
 0x761   :  { %v477_v59 = vmul.f32 %v3405_v54, %v476_v57 }
 0x762   :  { %v435_v14 = vor.u32 1.1754944e-38, %v434_v11  ;;  %vm433_vm8 = vcmp.eq.f32.partialorder %v432_v12, 8.507059e+37 }
 0x763   :  { %v478_v60 = vadd.f32 %v3405_v54, %v477_v59 }
 0x765   :  { %v482_v63 = vsel %vm481_vm3, %v3405_v54, %v478_v60 }
 0x766   :  { %v3409_v1 = vpop.eup %3408  ;;  %v487_v3 = vsel %vm484_vm4, %v486_v2, %v482_v63 }
 0x767   :  { %v424_v6 = vmul.f32 %v3409_v1, %v422_v58  ;;  %vm429_vm5 = vweird.f32 %v3409_v1  ;;  %v490_v10 = vmul.f32 %v487_v3, %v3829_v17 }
 0x768   :  { %vm430_vm7 = vmor %vm428_vm6, %vm429_vm5 }
 0x769   :  { %v425_v7 = vsub.f32 1.0, %v424_v6 }
 0x76b   :  { %v426_v8 = vmul.f32 %v3409_v1, %v425_v7 }
 0x76d   :  { %v427_v9 = vadd.f32 %v3409_v1, %v426_v8 }
 0x76f   :  { %v431_v13 = vsel %vm430_vm7, %v3409_v1, %v427_v9 }
 0x770   :  { %v436_v16 = vsel %vm433_vm8, %v435_v14, %v431_v13  ;;  %v787_v14 = vld [vmem:[%s4885_s0 + $0x100] sm:$0xf] }
 0x771   :  { %v439_v19 = vmul.f32 %v436_v16, %v3833_v21  ;;  %v715_v21 = vrot.slane %v3844_v26, 2 }
 0x7ac   :  { %v493_v4 = vpop.permute.xlu2 %492 }
 0x7ad   :  { %v495_v5 = vmul.f32 %v493_v4, %v487_v3  ;;  %v198_v4 = vadd.f32 %v3781_v48, %v3853_v37  ;;  %v845_v48 = vld [vmem:[%s4885_s0 + $0x118] sm:$0xff]  ;;  %v846_v37 = vld [vmem:[%s4885_s0 + $0x120] sm:$0xff] }
 0x7ae   :  { %v3896_v13 = vpack.c.bf16 %v846_v37, %v845_v48 }
 0x7af   :  { %497 = vrot.lane.b32.xlu1 %v495_v5, %s3696_s16 }
 0x7c0   :  { %v442_v15 = vpop.permute.xlu0 %441 }
 0x7c1   :  { %v444_v18 = vmul.f32 %v442_v15, %v436_v16  ;;  %v794_v15 = vpack.c.bf16 %v787_v14, %v787_v14 }
 0x7c3   :  { %446 = vrot.lane.b32.xlu2 %v444_v18, %s3696_s16  ;;  %v786_v18 = vld [vmem:[%s4885_s0 + $0xf8] sm:$0xff] }
 0x81d   :  { %v447_v20 = vpop.permute.xlu2 %446 }
 0x81e   :  { %v449_v22 = vadd.f32 %v447_v20, %v439_v19  ;;  %v811_v19 = vsel %vm725_vm14, %v794_v15, 0 }
 0x81f   :  { %814 = vmatpush.bf16.msrb.mxu1 %v811_v19 }
 0x820   :  { %3410 = vtanh.f32 %v449_v22 }
 0x821   :  { %v498_v23 = vpop.permute.xlu1 %497 }
 0x822   :  { %v3863_v24 = vadd.f32 %v498_v23, %v490_v10  ;;  %v784_v10 = vld [vmem:[%s4885_s0 + $0xe8] sm:$0xff] }
 0x824   :  { %3412 = vtanh.f32 %v3863_v24 }
 0x826   :  { %v3411_v25 = vpop.eup %3410 }
 0x827   :  { %452 = vrot.lane.b32.xlu1 %v3411_v25, %s3697_s17  ;;  %v781_v25 = vld [vmem:[%s4885_s0 + $0xd0] sm:$0xff] }
 0x82a   :  { %v3413_v27 = vpop.eup %3412 }
 0x82b   :  { %503 = vrot.lane.b32.xlu0 %v3413_v27, %s3697_s17  ;;  %v782_v27 = vld [vmem:[%s4885_s0 + $0xd8] sm:$0xff] }
 0x899   :  { %v453_v28 = vpop.permute.xlu1 %452 }
 0x89a   :  { %v455_v29 = vmul.f32 %v453_v28, %v436_v16  ;;  %v785_v16 = vld [vmem:[%s4885_s0 + $0xf0] sm:$0xff]  ;;  %v791_v28 = vpack.c.bf16 %v782_v27, %v781_v25 }
 0x89b   :  { %v793_v20 = vpack.c.bf16 %v786_v18, %v785_v16 }
 0x89c   :  { %v527_v31 = vpack.c.bf16 %v455_v29, %v455_v29  ;;  %v718_v32 = vrot.slane %v455_v29, 1  ;;  %v779_v29 = vld [vmem:[%s4885_s0 + $0xc0] sm:$0xff] }
 0x89d   :  { %v504_v33 = vpop.permute.xlu0 %503  ;;  %815 = vmatpush.bf16.msrb.mxu1 %v793_v20 }
 0x89e   :  { %v724_v17 = vsel %vm723_vm9, %v715_v21, %v718_v32  ;;  %v506_v36 = vmul.f32 %v504_v33, %v487_v3  ;;  %529 = vrot.lane.b32.xlu0 %v527_v31, %s3698_s30  ;;  %v780_v21 = vld [vmem:[%s4885_s0 + $0xc8] sm:$0xff]  ;;  %v777_v33 = vld [vmem:[%s4885_s0 + $0xb0] sm:$0xff] }
 0x89f   :  { %v790_v32 = vpack.c.bf16 %v780_v21, %v779_v29 }
 0x8a0   :  { %v507_v35 = vpack.c.bf16 %v506_v36, %v506_v36 }
 0x8a2   :  { %509 = vrot.lane.b32.xlu2 %v507_v35, %s3698_s30  ;;  %v775_v35 = vld [vmem:[%s4885_s0 + $0xa0] sm:$0xff] }
 0x8fc   :  { %v510_v38 = vpop.permute.xlu2 %509 }
 0x8fd   :  { %3268 = vmatmul.msk.bf16.vlgmr.msrb.gmra.mxu3 %vm36_vm0, %v510_v38  ;;  %3271 = vmatmul.msk.bf16.vlgmr.msra.gmra.mxu1 %vm36_vm0, %v510_v38  ;;  %v776_v38 = vld [vmem:[%s4885_s0 + $0xa8] sm:$0xff] }
 0x8fe   :  { %915 = vmatpush.bf16.msrb.mxu3 %v3896_v13 }
 0x910   :  { %v530_v39 = vpop.permute.xlu0 %529 }
 0x911   :  { %3269 = vmatmul.msk.bf16.vlgmr.msra.gmra.mxu0 %vm36_vm0, %v530_v39  ;;  %v788_v39 = vpack.c.bf16 %v776_v38, %v775_v35 }
 0x97a   :  { %v594_v40 = vpop.f32.mrf.mxu1 }
 0x97b   :  { %v3882_v5 = vadd.f32 %v594_v40, %v198_v4  ;;  %v763_v40 = vld [vmem:[%s4884_s1 + $0x48] sm:$0xff] }
 0x980   :  { %v523_v26 = vpop.f32.mrf.mxu3 }
 0x981   :  { %v524_v43 = vadd.f32 %v3820_v34, %v523_v26  ;;  %v764_v26 = vld [vmem:[%s4884_s1 + $0x50] sm:$0xff] }
 0x982   :  { %v596_v41 = vpop.f32.mrf.mxu1 }
 0x983   :  { %v771_v41 = vpack.c.bf16 %v764_v26, %v763_v40 }
 0x988   :  { %v525_v42 = vpop.f32.mrf.mxu3 }
 0x989   :  { %v765_v42 = vld [vmem:[%s4884_s1 + $0x58] sm:$0xff] }
 0x98e   :  { %v543_v44 = vpop.f32.mrf.mxu0 }
 0x98f   :  { %v547_v45 = vadd.f32 %v543_v44, %v524_v43  ;;  %v766_v43 = vld [vmem:[%s4884_s1 + $0x60] sm:$0xff] }
 0x990   :  { %v772_v44 = vpack.c.bf16 %v766_v43, %v765_v42 }
 0x991   :  { %3414 = vtanh.f32 %v547_v45  ;;  %v3270_v49 = vmul.f32 -1.442695, %v547_v45  ;;  %v767_v45 = vld [vmem:[%s4884_s1 + $0x68] sm:$0xff] }
 0x993   :  { %3416 = vpow2.f32 %v3270_v49  ;;  %v769_v49 = vld [vmem:[%s4884_s1 + $0x78] sm:$0xff] }
 0x996   :  { %v545_v46 = vpop.f32.mrf.mxu0 }
 0x997   :  { %v3415_v47 = vpop.eup %3414  ;;  %v768_v46 = vld [vmem:[%s4884_s1 + $0x70] sm:$0xff] }
 0x998   :  { %570 = vrot.lane.b32.xlu1 %v3415_v47, %s3695_s15  ;;  %v773_v47 = vpack.c.bf16 %v768_v46, %v767_v45 }
 0x999   :  { %v3417_v50 = vpop.eup %3416 }
 0x99a   :  { %v551_v51 = vadd.f32 1.0, %v3417_v50  ;;  %v770_v50 = vld [vmem:[%s4884_s1 + $0x80] sm:$0xff] }
 0x99c   :  { %3418 = vrcp.f32 %v551_v51  ;;  %v563_v57 = vand.u32 2147483648, %v551_v51  ;;  %vm557_vm11 = vweird.f32 %v551_v51  ;;  %v561_v58 = vand.u32 2147483647, %v551_v51 }
 0x99e   :  { %v564_v60 = vor.u32 1.1754944e-38, %v563_v57  ;;  %vm562_vm13 = vcmp.eq.f32.partialorder %v561_v58, 8.507059e+37  ;;  %v3369_v58 = vld [vmem:[%s4885_s0 + $0x128] ss:$0 sm:$0xff] }
 0x9a2   :  { %v3419_v52 = vpop.eup %3418 }
 0x9a3   :  { %v553_v53 = vmul.f32 %v3419_v52, %v551_v51  ;;  %vm558_vm10 = vweird.f32 %v3419_v52  ;;  %v774_v51 = vpack.c.bf16 %v770_v50, %v769_v49 }
 0x9a4   :  { %vm559_vm12 = vmor %vm557_vm11, %vm558_vm10 }
 0x9a5   :  { %v554_v54 = vsub.f32 1.0, %v553_v53 }
 0x9a7   :  { %v555_v55 = vmul.f32 %v3419_v52, %v554_v54 }
 0x9a9   :  { %v556_v56 = vadd.f32 %v3419_v52, %v555_v55 }
 0x9ab   :  { %v560_v59 = vsel %vm559_vm12, %v3419_v52, %v556_v56  ;;  %v3272_v52 = vmul.f32 -1.442695, %v3882_v5 }
 0x9ac   :  { %v565_v62 = vsel %vm562_vm13, %v564_v60, %v560_v59 }
 0x9ad   :  { %v568_v1 = vmul.f32 %v565_v62, %v449_v22  ;;  %v783_v22 = vld [vmem:[%s4885_s0 + $0xe0] sm:$0xff] }
 0x9ae   :  { %v792_v23 = vpack.c.bf16 %v784_v10, %v783_v22 }
 0x9b0   :  { %816 = vmatpush.bf16.msrb.mxu1 %v792_v23 }
 0x9b4   :  { %817 = vmatpush.bf16.msrb.mxu1 %v791_v28 }
 0x9b8   :  { %818 = vmatpush.bf16.msrb.mxu1 %v790_v32 }
 0xa0a   :  { %v571_v61 = vpop.permute.xlu1 %570 }
 0xa0b   :  { %v573_v63 = vmul.f32 %v571_v61, %v565_v62 }
 0xa0d   :  { %575 = vrot.lane.b32.xlu2 %v573_v63, %s3696_s16 }
 0xa67   :  { %v576_v2 = vpop.permute.xlu2 %575 }
 0xa68   :  { %v3877_v3 = vadd.f32 %v576_v2, %v568_v1 }
 0xa6a   :  { %3420 = vtanh.f32 %v3877_v3 }
 0xa6b   :  { %3422 = vtanh.f32 %v3882_v5 }
 0xa6c   :  { %3424 = vpow2.f32 %v3272_v52 }
 0xa70   :  { %v3421_v6 = vpop.eup %3420 }
 0xa71   :  { %581 = vrot.lane.b32.xlu0 %v3421_v6, %s3697_s17  ;;  %v3423_v7 = vpop.eup %3422 }
 0xa72   :  { %v3425_v53 = vpop.eup %3424 }
 0xa73   :  { %v602_v54 = vadd.f32 1.0, %v3425_v53  ;;  %v762_v53 = vld [vmem:[%s4884_s1 + $0xc0] sm:$0xff] }
 0xa75   :  { %3426 = vrcp.f32 %v602_v54  ;;  %v614_v2 = vand.u32 2147483648, %v602_v54  ;;  %vm608_vm3 = vweird.f32 %v602_v54  ;;  %v612_v5 = vand.u32 2147483647, %v602_v54 }
 0xa77   :  { %vm613_vm5 = vcmp.eq.f32.partialorder %v612_v5, 8.507059e+37 }
 0xa79   :  { %621 = vrot.lane.b32.xlu0 %v3423_v7, %s3695_s15 }
 0xa7b   :  { %v3427_v55 = vpop.eup %3426 }
 0xa7c   :  { %v604_v57 = vmul.f32 %v3427_v55, %v602_v54  ;;  %vm609_vm2 = vweird.f32 %v3427_v55 }
 0xa7d   :  { %vm610_vm4 = vmor %vm608_vm3, %vm609_vm2 }
 0xa7e   :  { %v605_v59 = vsub.f32 1.0, %v604_v57  ;;  %v842_v57 = vld [vmem:[%s4885_s0 + $0x108] sm:$0xff] }
 0xa80   :  { %v606_v63 = vmul.f32 %v3427_v55, %v605_v59 }
 0xa82   :  { %v607_v1 = vadd.f32 %v3427_v55, %v606_v63 }
 0xae3   :  { %v582_v8 = vpop.permute.xlu0 %581 }
 0xae4   :  { %v584_v9 = vmul.f32 %v582_v8, %v565_v62  ;;  %v611_v8 = vsel %vm610_vm4, %v3427_v55, %v607_v1 }
 0xae6   :  { %v656_v11 = vpack.c.bf16 %v584_v9, %v584_v9  ;;  %v3887_v12 = vsel %vm725_vm14, %v724_v17, %v584_v9  ;;  %v778_v17 = vld [vmem:[%s4885_s0 + $0xb8] sm:$0xff] }
 0xae7   :  { %v789_v36 = vpack.c.bf16 %v778_v17, %v777_v33 }
 0xae8   :  { %658 = vrot.lane.b32.xlu1 %v656_v11, %s3698_s30  ;;  %v615_v11 = vor.u32 1.1754944e-38, %v614_v2 }
 0xae9   :  { %819 = vmatpush.bf16.msrb.mxu1 %v789_v36 }
 0xaea   :  { %v616_v48 = vsel %vm613_vm5, %v615_v11, %v611_v8 }
 0xaeb   :  { %v622_v9 = vpop.permute.xlu0 %621  ;;  %v619_v32 = vmul.f32 %v616_v48, %v3863_v24 }
 0xaec   :  { %v624_v37 = vmul.f32 %v622_v9, %v616_v48 }
 0xaed   :  { %820 = vmatpush.bf16.msrb.mxu1 %v788_v39 }
 0xaf0   :  { %3277 = vmatmul.msk.bf16.vlgmr.msrb.gmra.mxu1 %vm797_vm15, %v771_v41 }
 0xb00   :  { %3278 = vmatmul.msk.bf16.gmra.mxu1 %vm797_vm15, %v772_v44 }
 0xb10   :  { %3279 = vmatmul.msk.bf16.gmra.mxu1 %vm797_vm15, %v773_v47 }
 0xb20   :  { %3280 = vmatmul.msk.bf16.gmra.mxu1 %vm797_vm15, %v774_v51 }
 0xb5a   :  { %v659_v31 = vpop.permute.xlu1 %658 }
 0xb5b   :  { %3274 = vmatmul.msk.bf16.vlgmr.msra.gmra.mxu3 %vm36_vm0, %v659_v31 }
 0xb6b   :  { %916 = vmatmul.bf16.vlgmr.msrb.gmra.mxu3 %v3694_v0 }
 0xb6d   :  { %v822_v61 = vpop.f32.mrf.mxu1 }
 0xb6e   :  { %v3970_v62 = vadd.f32 %v3369_v58, %v822_v61 }
 0xb75   :  { %v824_v6 = vpop.f32.mrf.mxu1 }
 0xb76   :  { %v3973_v7 = vadd.f32 %v3369_v58, %v824_v6 }
 0xb7d   :  { %v827_v15 = vpop.f32.mrf.mxu1 }
 0xb7e   :  { %v3976_v16 = vadd.f32 %v3369_v58, %v827_v15 }
 0xb85   :  { %v829_v18 = vpop.f32.mrf.mxu1 }
 0xb86   :  { %v3978_v19 = vadd.f32 %v3369_v58, %v829_v18 }
 0xb8d   :  { %v832_v20 = vpop.f32.mrf.mxu1 }
 0xb8e   :  { %v3980_v22 = vadd.f32 %v3369_v58, %v832_v20 }
 0xb95   :  { %v834_v10 = vpop.f32.mrf.mxu1 }
 0xb96   :  { %v3982_v23 = vadd.f32 %v3369_v58, %v834_v10 }
 0xb9d   :  { %v837_v25 = vpop.f32.mrf.mxu1 }
 0xb9e   :  { %v3984_v27 = vadd.f32 %v3369_v58, %v837_v25 }
 0xba5   :  { %v839_v28 = vpop.f32.mrf.mxu1 }
 0xba6   :  { %v3986_v29 = vadd.f32 %v3369_v58, %v839_v28  ;;  %v843_v58 = vld [vmem:[%s4885_s0 + $0x110] sm:$0xff] }
 0xba7   :  { %v4003_v59 = vpack.c.bf16 %v843_v58, %v842_v57 }
 0xba9   :  { %855 = vmatpush.bf16.msra.mxu2 %v4003_v59  ;;  %1128 = vmatpush.bf16.msra.mxu3 %v4003_v59 }
 0xbaa   :  { %1808 = vmatpush.bf16.msra.mxu1 %v4003_v59 }
 0xbad   :  { %1339 = vmatpush.bf16.msrb.mxu3 %v3896_v13 }
 0xbde   :  { %v3965_v56 = vpop.f32.mrf.mxu3 }
 0xbe6   :  { %v674_v60 = vpop.f32.mrf.mxu3 }
 0xbee   :  { %v917_v4 = vpop.f32.mrf.mxu3 }
 0xbef   :  { %922 = vrot.lane.b32.xlu2 %v917_v4, %s3699_s9 }
 0xbf6   :  { %v919_v14 = vpop.f32.mrf.mxu3 }
 0xbf7   :  { %626 = vrot.lane.b32.xlu2 %v624_v37, %s3696_s16 }
 0xc49   :  { %v923_v21 = vpop.permute.xlu2 %922 }
 0xc4a   :  { %v925_v31 = vadd.f32 %v923_v21, %v3986_v29 }
 0xc4c   :  { %3428 = vtanh.f32 %v925_v31  ;;  %v3282_v38 = vmul.f32 -1.442695, %v925_v31 }
 0xc51   :  { %v627_v33 = vpop.permute.xlu2 %626 }
 0xc52   :  { %v3429_v17 = vpop.eup %3428  ;;  %v629_v36 = vadd.f32 %v627_v33, %v619_v32 }
 0xc53   :  { %948 = vrot.lane.b32.xlu1 %v3429_v17, %s3695_s15 }
 0xc54   :  { %3430 = vtanh.f32 %v629_v36 }
 0xc55   :  { %3432 = vpow2.f32 %v3282_v38 }
 0xc5a   :  { %v3431_v35 = vpop.eup %3430 }
 0xc5b   :  { %632 = vrot.lane.b32.xlu1 %v3431_v35, %s3697_s17  ;;  %v3433_v39 = vpop.eup %3432 }
 0xc5c   :  { %v929_v40 = vadd.f32 1.0, %v3433_v39 }
 0xc5e   :  { %3434 = vrcp.f32 %v929_v40  ;;  %v941_v24 = vand.u32 2147483648, %v929_v40  ;;  %vm935_vm7 = vweird.f32 %v929_v40  ;;  %v939_v45 = vand.u32 2147483647, %v929_v40 }
 0xc60   :  { %v942_v47 = vor.u32 1.1754944e-38, %v941_v24  ;;  %vm940_vm9 = vcmp.eq.f32.partialorder %v939_v45, 8.507059e+37 }
 0xc64   :  { %v3435_v26 = vpop.eup %3434 }
 0xc65   :  { %v931_v41 = vmul.f32 %v3435_v26, %v929_v40  ;;  %vm936_vm6 = vweird.f32 %v3435_v26 }
 0xc66   :  { %vm937_vm8 = vmor %vm935_vm7, %vm936_vm6 }
 0xc67   :  { %v932_v42 = vsub.f32 1.0, %v931_v41 }
 0xc69   :  { %v933_v43 = vmul.f32 %v3435_v26, %v932_v42 }
 0xc6b   :  { %v934_v44 = vadd.f32 %v3435_v26, %v933_v43 }
 0xc6d   :  { %v938_v46 = vsel %vm937_vm8, %v3435_v26, %v934_v44  ;;  %vm728_vm8 = vcmask 1043456  }
 0xc6e   :  { %v943_v50 = vsel %vm940_vm9, %v942_v47, %v938_v46 }
 0xc6f   :  { %v946_v60 = vmul.f32 0.0, %v943_v50 }
 0xcc5   :  { %v949_v49 = vpop.permute.xlu1 %948 }
 0xcc6   :  { %v951_v51 = vmul.f32 %v949_v49, %v943_v50 }
 0xcc8   :  { %953 = vrot.lane.b32.xlu0 %v951_v51, %s3696_s16 }
 0xccd   :  { %v633_v52 = vpop.permute.xlu1 %632 }
 0xcce   :  { %v635_v54 = vmul.f32 %v633_v52, %v616_v48 }
 0xcd0   :  { %v636_v55 = vpack.c.bf16 %v635_v54, %v635_v54  ;;  %965 = vperm.xlu0 %3360, %v762_v53  }
 0xcd2   :  { %638 = vrot.lane.b32.xlu1 %v636_v55, %s3698_s30 }
 0xd3a   :  { %v954_v61 = vpop.permute.xlu0 %953 }
 0xd3b   :  { %v4009_v63 = vadd.f32 %v954_v61, %v946_v60 }
 0xd3d   :  { %3436 = vtanh.f32 %v4009_v63 }
 0xd42   :  { %v4017_v6 = vpop.permute.xlu0 %965 }
 0xd43   :  { %v3437_v1 = vpop.eup %3436 }
 0xd44   :  { %v639_v2 = vpop.permute.xlu1 %638  ;;  %959 = vrot.lane.b32.xlu2 %v3437_v1, %s3697_s17 }
 0xd45   :  { %3273 = vmatmul.msk.bf16.vlgmr.msrb.gmra.mxu2 %vm36_vm0, %v639_v2 }
 0xd46   :  { %1055 = vmatpush.bf16.msrb.mxu2 %v3896_v13 }
 0xd55   :  { %856 = vmatmul.bf16.vlgmr.msra.gmra.mxu2 %v3694_v0 }
 0xd56   :  { %1270 = vmatpush.bf16.msra.mxu2 %v4003_v59 }
 0xd9e   :  { %v960_v4 = vpop.permute.xlu2 %959 }
 0xd9f   :  { %v962_v5 = vmul.f32 %v960_v4, %v943_v50 }
 0xda1   :  { %v4020_v8 = vmul.f32 %v4017_v6, %v962_v5 }
 0xda3   :  { %v1041_v9 = vpack.c.bf16 %v4020_v8, %v4020_v8 }
 0xda5   :  { %1043 = vrot.lane.b32.xlu2 %v1041_v9, %s3696_s16 }
 0xdc8   :  { %v652_v11 = vpop.f32.mrf.mxu2 }
 0xdc9   :  { %v653_v48 = vadd.f32 %v3820_v34, %v652_v11 }
 0xdcb   :  { %v676_v37 = vadd.f32 %v3965_v56, %v653_v48 }
 0xdcd   :  { %3438 = vtanh.f32 %v676_v37  ;;  %v3275_v21 = vmul.f32 -1.442695, %v676_v37 }
 0xdd0   :  { %v654_v14 = vpop.f32.mrf.mxu2 }
 0xdd1   :  { %v755_v14 = vld [vmem:[%s4884_s1 + $0x88] sm:$0xff] }
 0xdd3   :  { %v3439_v15 = vpop.eup %3438 }
 0xdd4   :  { %699 = vrot.lane.b32.xlu0 %v3439_v15, %s3695_s15  ;;  %v761_v15 = vld [vmem:[%s4884_s1 + $0xb8] sm:$0xff] }
 0xdd8   :  { %v857_v18 = vpop.f32.mrf.mxu2 }
 0xdd9   :  { %v861_v20 = vadd.f32 %v857_v18, %v3970_v62 }
 0xddb   :  { %3440 = vtanh.f32 %v861_v20  ;;  %v3281_v34 = vmul.f32 -1.442695, %v861_v20 }
 0xddd   :  { %3442 = vpow2.f32 %v3281_v34 }
 0xdde   :  { %3444 = vpow2.f32 %v3275_v21 }
 0xde0   :  { %v859_v10 = vpop.f32.mrf.mxu2 }
 0xde1   :  { %v3441_v25 = vpop.eup %3440 }
 0xde2   :  { %884 = vrot.lane.b32.xlu2 %v3441_v25, %s3695_s15 }
 0xde3   :  { %v3443_v56 = vpop.eup %3442 }
 0xde4   :  { %v865_v31 = vadd.f32 1.0, %v3443_v56  ;;  %v3445_v32 = vpop.eup %3444 }
 0xde5   :  { %v680_v17 = vadd.f32 1.0, %v3445_v32 }
 0xde6   :  { %3446 = vrcp.f32 %v865_v31  ;;  %v877_v41 = vand.u32 2147483648, %v865_v31  ;;  %vm871_vm11 = vweird.f32 %v865_v31  ;;  %v875_v42 = vand.u32 2147483647, %v865_v31 }
 0xde7   :  { %3448 = vrcp.f32 %v680_v17  ;;  %v692_v51 = vand.u32 2147483648, %v680_v17  ;;  %vm686_vm15 = vweird.f32 %v680_v17  ;;  %v690_v52 = vand.u32 2147483647, %v680_v17 }
 0xde8   :  { %v878_v24 = vor.u32 1.1754944e-38, %v877_v41  ;;  %vm876_vm13 = vcmp.eq.f32.partialorder %v875_v42, 8.507059e+37 }
 0xde9   :  { %v693_v54 = vor.u32 1.1754944e-38, %v692_v51  ;;  %vm691_vm3 = vcmp.eq.f32.partialorder %v690_v52, 8.507059e+37  ;;  %v732_v52 = vld [vmem:[%s4885_s0 + $0x90] sm:$0xff] }
 0xdec   :  { %v3447_v33 = vpop.eup %3446 }
 0xded   :  { %v867_v36 = vmul.f32 %v3447_v33, %v865_v31  ;;  %v3449_v38 = vpop.eup %3448  ;;  %vm872_vm10 = vweird.f32 %v3447_v33 }
 0xdee   :  { %v682_v40 = vmul.f32 %v3449_v38, %v680_v17  ;;  %vm873_vm12 = vmor %vm871_vm11, %vm872_vm10  ;;  %vm687_vm14 = vweird.f32 %v3449_v38 }
 0xdef   :  { %v868_v35 = vsub.f32 1.0, %v867_v36  ;;  %vm688_vm2 = vmor %vm686_vm15, %vm687_vm14 }
 0xdf0   :  { %v683_v43 = vsub.f32 1.0, %v682_v40 }
 0xdf1   :  { %v869_v39 = vmul.f32 %v3447_v33, %v868_v35 }
 0xdf2   :  { %v684_v45 = vmul.f32 %v3449_v38, %v683_v43 }
 0xdf3   :  { %v870_v26 = vadd.f32 %v3447_v33, %v869_v39 }
 0xdf4   :  { %v685_v50 = vadd.f32 %v3449_v38, %v684_v45 }
 0xdf5   :  { %v874_v44 = vsel %vm873_vm12, %v3447_v33, %v870_v26 }
 0xdf6   :  { %v4032_v47 = vsel %vm876_vm13, %v878_v24, %v874_v44  ;;  %v689_v53 = vsel %vm688_vm2, %v3449_v38, %v685_v50 }
 0xdf7   :  { %v694_v55 = vsel %vm691_vm3, %v693_v54, %v689_v53  ;;  %v882_v1 = vmul.f32 0.0, %v4032_v47 }
 0xdf8   :  { %v697_v9 = vmul.f32 %v694_v55, %v3877_v3 }
 0xdff   :  { %v1044_v28 = vpop.permute.xlu2 %1043 }
 0xe00   :  { %3285 = vmatmul.msk.bf16.vlgmr.msrb.gmra.mxu2 %vm36_vm0, %v1044_v28 }
 0xe01   :  { %1476 = vmatpush.bf16.msrb.mxu2 %v3896_v13 }
 0xe3c   :  { %v885_v46 = vpop.permute.xlu2 %884 }
 0xe3d   :  { %v887_v49 = vmul.f32 %v885_v46, %v4032_v47 }
 0xe3f   :  { %889 = vrot.lane.b32.xlu2 %v887_v49, %s3696_s16 }
 0xe46   :  { %v700_v57 = vpop.permute.xlu0 %699 }
 0xe47   :  { %v702_v58 = vmul.f32 %v700_v57, %v694_v55 }
 0xe49   :  { %704 = vrot.lane.b32.xlu0 %v702_v58, %s3696_s16 }
 0xe83   :  { %v1057_v60 = vpop.f32.mrf.mxu2 }
 0xe84   :  { %1062 = vrot.lane.b32.xlu1 %v1057_v60, %s3699_s9 }
 0xe8b   :  { %v1059_v61 = vpop.f32.mrf.mxu2 }
 0xe99   :  { %v890_v2 = vpop.permute.xlu2 %889 }
 0xe9a   :  { %v4039_v4 = vadd.f32 %v890_v2, %v882_v1 }
 0xe9c   :  { %3450 = vtanh.f32 %v4039_v4 }
 0xea2   :  { %v3451_v5 = vpop.eup %3450 }
 0xea3   :  { %895 = vrot.lane.b32.xlu2 %v3451_v5, %s3697_s17 }
 0xebb   :  { %v705_v11 = vpop.permute.xlu0 %704 }
 0xebc   :  { %v707_v48 = vadd.f32 %v705_v11, %v697_v9 }
 0xebe   :  { %3452 = vtanh.f32 %v707_v48 }
 0xec4   :  { %v3453_v37 = vpop.eup %3452 }
 0xec5   :  { %710 = vrot.lane.b32.xlu0 %v3453_v37, %s3697_s17 }
 0xecd   :  { %901 = vperm.xlu0 %3360, %v755_v14  }
 0xed5   :  { %1106 = vperm.xlu0 %3360, %v761_v15  }
 0xef6   :  { %v1063_v18 = vpop.permute.xlu1 %1062 }
 0xef7   :  { %v1065_v20 = vadd.f32 %v1063_v18, %v3984_v27 }
 0xef9   :  { %3454 = vtanh.f32 %v1065_v20  ;;  %v3286_v10 = vmul.f32 -1.442695, %v1065_v20 }
 0xefb   :  { %3456 = vpow2.f32 %v3286_v10 }
 0xefd   :  { %v896_v24 = vpop.permute.xlu2 %895 }
 0xefe   :  { %v898_v49 = vmul.f32 %v896_v24, %v4032_v47  ;;  %v4075_v47 = vmul.f32 %v4017_v6, %v4009_v63 }
 0xeff   :  { %v3455_v3 = vpop.eup %3454 }
 0xf00   :  { %1088 = vrot.lane.b32.xlu1 %v3455_v3, %s3695_s15 }
 0xf01   :  { %v3457_v25 = vpop.eup %3456 }
 0xf02   :  { %v1069_v28 = vadd.f32 1.0, %v3457_v25 }
 0xf04   :  { %3458 = vrcp.f32 %v1069_v28  ;;  %v1081_v17 = vand.u32 2147483648, %v1069_v28  ;;  %vm1075_vm5 = vweird.f32 %v1069_v28  ;;  %v1079_v35 = vand.u32 2147483647, %v1069_v28 }
 0xf06   :  { %v1082_v39 = vor.u32 1.1754944e-38, %v1081_v17  ;;  %vm1080_vm7 = vcmp.eq.f32.partialorder %v1079_v35, 8.507059e+37 }
 0xf0a   :  { %v3459_v34 = vpop.eup %3458 }
 0xf0b   :  { %v1071_v56 = vmul.f32 %v3459_v34, %v1069_v28  ;;  %vm1076_vm4 = vweird.f32 %v3459_v34 }
 0xf0c   :  { %vm1077_vm6 = vmor %vm1075_vm5, %vm1076_vm4 }
 0xf0d   :  { %v1072_v21 = vsub.f32 1.0, %v1071_v56 }
 0xf0f   :  { %v1073_v31 = vmul.f32 %v3459_v34, %v1072_v21 }
 0xf11   :  { %v1074_v33 = vadd.f32 %v3459_v34, %v1073_v31 }
 0xf13   :  { %v1078_v38 = vsel %vm1077_vm6, %v3459_v34, %v1074_v33 }
 0xf14   :  { %v1083_v41 = vsel %vm1080_vm7, %v1082_v39, %v1078_v38 }
 0xf15   :  { %v1086_v54 = vmul.f32 %v1083_v41, %v4075_v47 }
 0xf37   :  { %v711_v32 = vpop.permute.xlu0 %710 }
 0xf38   :  { %v713_v36 = vmul.f32 %v711_v32, %v694_v55 }
 0xf3a   :  { %v721_v40 = vrot.slane %v713_v36, 7 }
 0xf3c   :  { %v727_v43 = vsel %vm177_vm1, %v3887_v12, %v721_v40  ;;  %v731_v12 = vld [vmem:[%s4885_s0 + $0x88] sm:$0xff] }
 0xf3d   :  { %v729_v44 = vsel %vm728_vm8, %v727_v43, 0.0  ;;  %v733_v53 = vpack.c.bf16 %v732_v52, %v731_v12 }
 0xf3e   :  { %v730_v45 = vpack.c.bf16 %v729_v44, %v729_v44 }
 0xf3f   :  { %v4056_v46 = vpop.permute.xlu0 %901  ;;  %749 = vmatpush.bf16.msrb.mxu0 %v733_v53 }
 0xf40   :  { %v4061_v50 = vmul.f32 %v4056_v46, %v898_v49  ;;  %v4109_v44 = vmul.f32 %v4056_v46, %v4039_v4 }
 0xf42   :  { %v972_v51 = vpack.c.bf16 %v4061_v50, %v4061_v50 }
 0xf43   :  { %986 = vmatpush.bf16.msra.mxu0 %v4003_v59 }
 0xf47   :  { %v4087_v5 = vpop.permute.xlu0 %1106 }
 0xf72   :  { %v1089_v26 = vpop.permute.xlu1 %1088 }
 0xf73   :  { %v1091_v42 = vmul.f32 %v1089_v26, %v1083_v41 }
 0xf75   :  { %1093 = vrot.lane.b32.xlu1 %v1091_v42, %s3696_s16 }
 0xf7d   :  { %737 = vrot.lane.b32.xlu1 %v730_v45, %s3698_s30 }
 0xf85   :  { %974 = vrot.lane.b32.xlu1 %v972_v51, %s3698_s30 }
 0xfe7   :  { %v1094_v55 = vpop.permute.xlu1 %1093 }
 0xfe8   :  { %v4078_v57 = vadd.f32 %v1094_v55, %v1086_v54 }
 0xfea   :  { %3460 = vtanh.f32 %v4078_v57 }
 0xfef   :  { %v738_v58 = vpop.permute.xlu1 %737 }
 0xff0   :  { %v3461_v60 = vpop.eup %3460  ;;  %3276 = vmatmul.msk.bf16.vlgmr.msrb.gmra.mxu0 %vm36_vm0, %v738_v58 }
 0xff1   :  { %1099 = vrot.lane.b32.xlu2 %v3461_v60, %s3697_s17  ;;  %1197 = vmatpush.bf16.msrb.mxu0 %v3896_v13 }
 0xff7   :  { %v975_v61 = vpop.permute.xlu1 %974 }
0x1000   :  { %3283 = vmatmul.msk.bf16.vlgmr.msra.gmra.mxu0 %vm36_vm0, %v975_v61 }
0x1001   :  { %1412 = vmatpush.bf16.msra.mxu0 %v4003_v59 }
0x104b   :  { %v1100_v63 = vpop.permute.xlu2 %1099 }
0x104c   :  { %v1102_v1 = vmul.f32 %v1100_v63, %v1083_v41  ;;  %v756_v41 = vld [vmem:[%s4884_s1 + $0x90] sm:$0xff] }
0x104e   :  { %v1103_v2 = vsub.f32 %v1102_v1, %v4020_v8 }
0x1050   :  { %v1109_v9 = vmul.f32 %v4087_v5, %v1103_v2 }
0x1052   :  { %v4091_v11 = vadd.f32 %v1109_v9, %v4020_v8 }
0x1054   :  { %v1183_v48 = vpack.c.bf16 %v4091_v11, %v4091_v11 }
0x1056   :  { %1185 = vrot.lane.b32.xlu2 %v1183_v48, %s3696_s16 }
0x106d   :  { %v4096_v37 = vpop.f32.mrf.mxu0 }
0x1075   :  { %v753_v14 = vpop.f32.mrf.mxu0 }
0x107d   :  { %v988_v15 = vpop.f32.mrf.mxu0 }
0x107e   :  { %v992_v18 = vadd.f32 %v988_v15, %v3973_v7 }
0x1080   :  { %3462 = vtanh.f32 %v992_v18  ;;  %v3284_v25 = vmul.f32 -1.442695, %v992_v18 }
0x1082   :  { %3464 = vpow2.f32 %v3284_v25 }
0x1085   :  { %v990_v20 = vpop.f32.mrf.mxu0 }
0x1086   :  { %v3463_v3 = vpop.eup %3462 }
0x1087   :  { %1015 = vrot.lane.b32.xlu0 %v3463_v3, %s3695_s15 }
0x1088   :  { %v3465_v28 = vpop.eup %3464 }
0x1089   :  { %v996_v34 = vadd.f32 1.0, %v3465_v28 }
0x108b   :  { %3466 = vrcp.f32 %v996_v34  ;;  %v1008_v17 = vand.u32 2147483648, %v996_v34  ;;  %vm1002_vm9 = vweird.f32 %v996_v34  ;;  %v1006_v36 = vand.u32 2147483647, %v996_v34 }
0x108d   :  { %v1009_v38 = vor.u32 1.1754944e-38, %v1008_v17  ;;  %vm1007_vm11 = vcmp.eq.f32.partialorder %v1006_v36, 8.507059e+37 }
0x1091   :  { %v3467_v56 = vpop.eup %3466 }
0x1092   :  { %v998_v21 = vmul.f32 %v3467_v56, %v996_v34  ;;  %vm1003_vm1 = vweird.f32 %v3467_v56 }
0x1093   :  { %vm1004_vm10 = vmor %vm1002_vm9, %vm1003_vm1 }
0x1094   :  { %v999_v31 = vsub.f32 1.0, %v998_v21 }
0x1096   :  { %v1000_v32 = vmul.f32 %v3467_v56, %v999_v31  ;;  %v760_v31 = vld [vmem:[%s4884_s1 + $0xb0] sm:$0xff] }
0x1098   :  { %v1001_v33 = vadd.f32 %v3467_v56, %v1000_v32 }
0x109a   :  { %v1005_v35 = vsel %vm1004_vm10, %v3467_v56, %v1001_v33  ;;  %v1111_v33 = vsub.f32 %v4078_v57, %v4075_v47 }
0x109b   :  { %v1010_v40 = vsel %vm1007_vm11, %v1009_v38, %v1005_v35 }
0x109c   :  { %v1013_v24 = vmul.f32 %v1010_v40, %v4109_v44  ;;  %v1112_v17 = vmul.f32 %v1111_v33, %v4087_v5 }
0x109e   :  { %v4138_v36 = vadd.f32 %v1112_v17, %v4075_v47 }
0x10b0   :  { %v1186_v10 = vpop.permute.xlu2 %1185 }
0x10b1   :  { %3289 = vmatmul.msk.bf16.vlgmr.msrb.gmra.mxu0 %vm36_vm0, %v1186_v10 }
0x10b2   :  { %1608 = vmatpush.bf16.msrb.mxu0 %v3896_v13 }
0x10f9   :  { %v1016_v39 = vpop.permute.xlu0 %1015 }
0x10fa   :  { %v1018_v26 = vmul.f32 %v1016_v39, %v1010_v40 }
0x10fc   :  { %1020 = vrot.lane.b32.xlu2 %v1018_v26, %s3696_s16 }
0x1104   :  { %1033 = vperm.xlu2 %3361, %v756_v41  }
0x112e   :  { %v1199_v42 = vpop.f32.mrf.mxu0 }
0x112f   :  { %1204 = vrot.lane.b32.xlu1 %v1199_v42, %s3699_s9 }
0x1136   :  { %v1201_v43 = vpop.f32.mrf.mxu0 }
0x1156   :  { %v1021_v45 = vpop.permute.xlu2 %1020 }
0x1157   :  { %v4112_v49 = vadd.f32 %v1021_v45, %v1013_v24 }
0x1159   :  { %3468 = vtanh.f32 %v4112_v49 }
0x115e   :  { %v4119_v58 = vpop.permute.xlu2 %1033 }
0x115f   :  { %v3469_v51 = vpop.eup %3468 }
0x1160   :  { %1026 = vrot.lane.b32.xlu1 %v3469_v51, %s3697_s17 }
0x11a1   :  { %v1205_v12 = vpop.permute.xlu1 %1204 }
0x11a2   :  { %v1207_v52 = vadd.f32 %v1205_v12, %v3982_v23 }
0x11a4   :  { %3470 = vtanh.f32 %v1207_v52  ;;  %v3290_v1 = vmul.f32 -1.442695, %v1207_v52 }
0x11a6   :  { %3472 = vpow2.f32 %v3290_v1 }
0x11aa   :  { %v3471_v53 = vpop.eup %3470 }
0x11ab   :  { %1230 = vrot.lane.b32.xlu0 %v3471_v53, %s3695_s15 }
0x11ac   :  { %v3473_v2 = vpop.eup %3472 }
0x11ad   :  { %v1211_v9 = vadd.f32 1.0, %v3473_v2 }
0x11af   :  { %3474 = vrcp.f32 %v1211_v9  ;;  %v1223_v3 = vand.u32 2147483648, %v1211_v9  ;;  %vm1217_vm13 = vweird.f32 %v1211_v9  ;;  %v1221_v10 = vand.u32 2147483647, %v1211_v9 }
0x11b1   :  { %v1224_v28 = vor.u32 1.1754944e-38, %v1223_v3  ;;  %vm1222_vm15 = vcmp.eq.f32.partialorder %v1221_v10, 8.507059e+37  ;;  %v757_v10 = vld [vmem:[%s4884_s1 + $0x98] sm:$0xff] }
0x11b5   :  { %v3475_v48 = vpop.eup %3474 }
0x11b6   :  { %v1213_v14 = vmul.f32 %v3475_v48, %v1211_v9  ;;  %vm1218_vm12 = vweird.f32 %v3475_v48 }
0x11b7   :  { %vm1219_vm14 = vmor %vm1217_vm13, %vm1218_vm12 }
0x11b8   :  { %v1214_v15 = vsub.f32 1.0, %v1213_v14 }
0x11ba   :  { %v1215_v18 = vmul.f32 %v3475_v48, %v1214_v15 }
0x11bc   :  { %v1216_v20 = vadd.f32 %v3475_v48, %v1215_v18 }
0x11be   :  { %v1220_v25 = vsel %vm1219_vm14, %v3475_v48, %v1216_v20 }
0x11bf   :  { %v1225_v56 = vsel %vm1222_vm15, %v1224_v28, %v1220_v25  ;;  %v1038_v28 = vsub.f32 %v4112_v49, %v4109_v44 }
0x11c0   :  { %v1228_v35 = vmul.f32 %v1225_v56, %v4138_v36 }
0x11d2   :  { %v1027_v54 = vpop.permute.xlu1 %1026 }
0x11d3   :  { %v1029_v4 = vmul.f32 %v1027_v54, %v1010_v40 }
0x11d5   :  { %v1030_v55 = vsub.f32 %v1029_v4, %v4061_v50 }
0x11d7   :  { %v1036_v60 = vmul.f32 %v4119_v58, %v1030_v55 }
0x11d9   :  { %v4123_v61 = vadd.f32 %v1036_v60, %v4061_v50 }
0x11db   :  { %v1114_v63 = vpack.c.bf16 %v4123_v61, %v4123_v61 }
0x11dd   :  { %1116 = vrot.lane.b32.xlu1 %v1114_v63, %s3698_s30 }
0x121d   :  { %v1231_v34 = vpop.permute.xlu0 %1230 }
0x121e   :  { %v1233_v21 = vmul.f32 %v1231_v34, %v1225_v56  ;;  %v1039_v34 = vmul.f32 %v1038_v28, %v4119_v58 }
0x1220   :  { %1235 = vrot.lane.b32.xlu0 %v1233_v21, %s3696_s16 }
0x1228   :  { %1248 = vperm.xlu0 %3360, %v760_v31  }
0x124f   :  { %v1117_v32 = vpop.permute.xlu1 %1116 }
0x1250   :  { %3287 = vmatmul.msk.bf16.vlgmr.msra.gmra.mxu3 %vm36_vm0, %v1117_v32 }
0x1251   :  { %1544 = vmatpush.bf16.msra.mxu3 %v4003_v59 }
0x1292   :  { %v1236_v38 = vpop.permute.xlu0 %1235 }
0x1293   :  { %v4141_v39 = vadd.f32 %v1236_v38, %v1228_v35 }
0x1295   :  { %3476 = vtanh.f32 %v4141_v39 }
0x129a   :  { %v4148_v45 = vpop.permute.xlu0 %1248 }
0x129b   :  { %v3477_v40 = vpop.eup %3476 }
0x129c   :  { %1241 = vrot.lane.b32.xlu2 %v3477_v40, %s3697_s17 }
0x12d3   :  { %v1130_v26 = vpop.f32.mrf.mxu3 }
0x12d4   :  { %v1134_v41 = vadd.f32 %v1130_v26, %v3976_v16 }
0x12d6   :  { %3478 = vtanh.f32 %v1134_v41  ;;  %v3288_v53 = vmul.f32 -1.442695, %v1134_v41 }
0x12d8   :  { %3480 = vpow2.f32 %v3288_v53 }
0x12db   :  { %v1132_v57 = vpop.f32.mrf.mxu3 }
0x12dc   :  { %v3479_v42 = vpop.eup %3478 }
0x12dd   :  { %1157 = vrot.lane.b32.xlu2 %v3479_v42, %s3695_s15  ;;  %v759_v42 = vld [vmem:[%s4884_s1 + $0xa8] sm:$0xff] }
0x12de   :  { %v3481_v54 = vpop.eup %3480 }
0x12df   :  { %v1138_v4 = vadd.f32 1.0, %v3481_v54 }
0x12e1   :  { %3482 = vrcp.f32 %v1138_v4  ;;  %v1150_v9 = vand.u32 2147483648, %v1138_v4  ;;  %vm1144_vm3 = vweird.f32 %v1138_v4  ;;  %v1148_v48 = vand.u32 2147483647, %v1138_v4 }
0x12e3   :  { %v1151_v15 = vor.u32 1.1754944e-38, %v1150_v9  ;;  %vm1149_vm5 = vcmp.eq.f32.partialorder %v1148_v48, 8.507059e+37 }
0x12e7   :  { %v3483_v55 = vpop.eup %3482 }
0x12e8   :  { %v1140_v60 = vmul.f32 %v3483_v55, %v1138_v4  ;;  %vm1145_vm2 = vweird.f32 %v3483_v55 }
0x12e9   :  { %vm1146_vm4 = vmor %vm1144_vm3, %vm1145_vm2 }
0x12ea   :  { %v1141_v63 = vsub.f32 1.0, %v1140_v60 }
0x12ec   :  { %v1142_v1 = vmul.f32 %v3483_v55, %v1141_v63 }
0x12ee   :  { %v1143_v2 = vadd.f32 %v3483_v55, %v1142_v1 }
0x12f0   :  { %v1147_v14 = vsel %vm1146_vm4, %v3483_v55, %v1143_v2 }
0x12f1   :  { %v1152_v18 = vsel %vm1149_vm5, %v1151_v15, %v1147_v14 }
0x12f6   :  { %v1242_v47 = vpop.permute.xlu2 %1241 }
0x12f7   :  { %v1244_v43 = vmul.f32 %v1242_v47, %v1225_v56  ;;  %v4167_v56 = vadd.f32 %v1039_v34, %v4109_v44 }
0x12f9   :  { %v1245_v24 = vsub.f32 %v1244_v43, %v4091_v11  ;;  %v1155_v21 = vmul.f32 %v1152_v18, %v4167_v56 }
0x12fb   :  { %v1251_v51 = vmul.f32 %v4148_v45, %v1245_v24 }
0x12fd   :  { %v4152_v12 = vadd.f32 %v1251_v51, %v4091_v11 }
0x12ff   :  { %v1325_v52 = vpack.c.bf16 %v4152_v12, %v4152_v12 }
0x1301   :  { %1327 = vrot.lane.b32.xlu1 %v1325_v52, %s3696_s16 }
0x1337   :  { %v1158_v20 = vpop.permute.xlu2 %1157 }
0x1338   :  { %v1160_v3 = vmul.f32 %v1158_v20, %v1152_v18 }
0x133a   :  { %1162 = vrot.lane.b32.xlu0 %v1160_v3, %s3696_s16 }
0x1342   :  { %1175 = vperm.xlu0 %3360, %v757_v10   ;;  %v1253_v10 = vsub.f32 %v4141_v39, %v4138_v36 }
0x1373   :  { %v1328_v25 = vpop.permute.xlu1 %1327 }
0x1374   :  { %3293 = vmatmul.msk.bf16.vlgmr.msrb.gmra.mxu3 %vm36_vm0, %v1328_v25  ;;  %v1254_v25 = vmul.f32 %v1253_v10, %v4148_v45 }
0x1375   :  { %1740 = vmatpush.bf16.msrb.mxu3 %v3896_v13 }
0x1376   :  { %v4197_v28 = vadd.f32 %v1254_v25, %v4138_v36  ;;  %v758_v36 = vld [vmem:[%s4884_s1 + $0xa0] sm:$0xff] }
0x13ac   :  { %v1163_v31 = vpop.permute.xlu0 %1162 }
0x13ad   :  { %v4170_v32 = vadd.f32 %v1163_v31, %v1155_v21 }
0x13af   :  { %3484 = vtanh.f32 %v4170_v32 }
0x13b4   :  { %v4176_v44 = vpop.permute.xlu0 %1175 }
0x13b5   :  { %v3485_v33 = vpop.eup %3484 }
0x13b6   :  { %1168 = vrot.lane.b32.xlu2 %v3485_v33, %s3697_s17 }
0x13f7   :  { %v1341_v17 = vpop.f32.mrf.mxu3 }
0x13f8   :  { %1346 = vrot.lane.b32.xlu1 %v1341_v17, %s3699_s9 }
0x13ff   :  { %v1343_v35 = vpop.f32.mrf.mxu3 }
0x1410   :  { %v1169_v49 = vpop.permute.xlu2 %1168 }
0x1411   :  { %v1171_v38 = vmul.f32 %v1169_v49, %v1152_v18 }
0x1413   :  { %v1172_v40 = vsub.f32 %v1171_v38, %v4123_v61 }
0x1415   :  { %v1178_v26 = vmul.f32 %v4176_v44, %v1172_v40 }
0x1417   :  { %v4180_v41 = vadd.f32 %v1178_v26, %v4123_v61 }
0x1419   :  { %v1256_v57 = vpack.c.bf16 %v4180_v41, %v4180_v41 }
0x141b   :  { %1258 = vrot.lane.b32.xlu2 %v1256_v57, %s3698_s30 }
0x1423   :  { %1390 = vperm.xlu2 %3361, %v759_v42  }
0x146a   :  { %v1347_v47 = vpop.permute.xlu1 %1346 }
0x146b   :  { %v1349_v43 = vadd.f32 %v1347_v47, %v3980_v22 }
0x146d   :  { %3486 = vtanh.f32 %v1349_v43  ;;  %v3294_v52 = vmul.f32 -1.442695, %v1349_v43 }
0x146f   :  { %3488 = vpow2.f32 %v3294_v52 }
0x1473   :  { %v3487_v24 = vpop.eup %3486 }
0x1474   :  { %1372 = vrot.lane.b32.xlu1 %v3487_v24, %s3695_s15 }
0x1475   :  { %v1259_v51 = vpop.permute.xlu2 %1258  ;;  %v3489_v53 = vpop.eup %3488 }
0x1476   :  { %3291 = vmatmul.msk.bf16.vlgmr.msra.gmra.mxu2 %vm36_vm0, %v1259_v51  ;;  %v1353_v54 = vadd.f32 1.0, %v3489_v53 }
0x1477   :  { %1676 = vmatpush.bf16.msra.mxu2 %v4003_v59 }
0x1478   :  { %3490 = vrcp.f32 %v1353_v54  ;;  %v1365_v2 = vand.u32 2147483648, %v1353_v54  ;;  %vm1359_vm7 = vweird.f32 %v1353_v54  ;;  %v1363_v9 = vand.u32 2147483647, %v1353_v54 }
0x147a   :  { %v1366_v14 = vor.u32 1.1754944e-38, %v1365_v2  ;;  %vm1364_vm1 = vcmp.eq.f32.partialorder %v1363_v9, 8.507059e+37 }
0x147e   :  { %v3491_v4 = vpop.eup %3490 }
0x147f   :  { %v1355_v55 = vmul.f32 %v3491_v4, %v1353_v54  ;;  %vm1360_vm6 = vweird.f32 %v3491_v4  ;;  %v4210_v54 = vpop.permute.xlu2 %1390 }
0x1480   :  { %vm1361_vm8 = vmor %vm1359_vm7, %vm1360_vm6 }
0x1481   :  { %v1356_v60 = vsub.f32 1.0, %v1355_v55 }
0x1483   :  { %v1357_v63 = vmul.f32 %v3491_v4, %v1356_v60 }
0x1485   :  { %v1358_v1 = vadd.f32 %v3491_v4, %v1357_v63 }
0x1487   :  { %v1362_v48 = vsel %vm1361_vm8, %v3491_v4, %v1358_v1 }
0x1488   :  { %v1367_v59 = vsel %vm1364_vm1, %v1366_v14, %v1362_v48  ;;  %v1180_v14 = vsub.f32 %v4170_v32, %v4167_v56 }
0x1489   :  { %v1370_v34 = vmul.f32 %v1367_v59, %v4197_v28 }
0x14e6   :  { %v1373_v15 = vpop.permute.xlu1 %1372 }
0x14e7   :  { %v1375_v18 = vmul.f32 %v1373_v15, %v1367_v59  ;;  %v1181_v15 = vmul.f32 %v1180_v14, %v4176_v44 }
0x14e9   :  { %1377 = vrot.lane.b32.xlu0 %v1375_v18, %s3696_s16 }
0x14f9   :  { %v1272_v20 = vpop.f32.mrf.mxu2 }
0x14fa   :  { %v1276_v33 = vadd.f32 %v1272_v20, %v3978_v19 }
0x14fc   :  { %v3292_v39 = vmul.f32 -1.442695, %v1276_v33 }
0x1501   :  { %v1274_v3 = vpop.f32.mrf.mxu2 }
0x155b   :  { %v1378_v21 = vpop.permute.xlu0 %1377 }
0x155c   :  { %v4200_v31 = vadd.f32 %v1378_v21, %v1370_v34 }
0x155e   :  { %3492 = vtanh.f32 %v4200_v31 }
0x155f   :  { %3494 = vtanh.f32 %v1276_v33 }
0x1560   :  { %3496 = vpow2.f32 %v3292_v39 }
0x1564   :  { %v3493_v17 = vpop.eup %3492 }
0x1565   :  { %1383 = vrot.lane.b32.xlu1 %v3493_v17, %s3697_s17  ;;  %v3495_v35 = vpop.eup %3494 }
0x1566   :  { %v3497_v49 = vpop.eup %3496 }
0x1567   :  { %v1280_v38 = vadd.f32 1.0, %v3497_v49 }
0x1569   :  { %3498 = vrcp.f32 %v1280_v38  ;;  %v1292_v51 = vand.u32 2147483648, %v1280_v38  ;;  %vm1286_vm10 = vweird.f32 %v1280_v38  ;;  %v1290_v53 = vand.u32 2147483647, %v1280_v38 }
0x156b   :  { %v1293_v60 = vor.u32 1.1754944e-38, %v1292_v51  ;;  %vm1291_vm12 = vcmp.eq.f32.partialorder %v1290_v53, 8.507059e+37 }
0x156d   :  { %1299 = vrot.lane.b32.xlu1 %v3495_v35, %s3695_s15 }
0x156f   :  { %v3499_v40 = vpop.eup %3498 }
0x1570   :  { %v1282_v26 = vmul.f32 %v3499_v40, %v1280_v38  ;;  %vm1287_vm9 = vweird.f32 %v3499_v40 }
0x1571   :  { %vm1288_vm11 = vmor %vm1286_vm10, %vm1287_vm9 }
0x1572   :  { %v1283_v57 = vsub.f32 1.0, %v1282_v26 }
0x1574   :  { %v1284_v42 = vmul.f32 %v3499_v40, %v1283_v57 }
0x1575   :  { %1317 = vperm.xlu1 %3362, %v758_v36  }
0x1576   :  { %v1285_v24 = vadd.f32 %v3499_v40, %v1284_v42 }
0x1578   :  { %v1289_v55 = vsel %vm1288_vm11, %v3499_v40, %v1285_v24 }
0x1579   :  { %v1294_v1 = vsel %vm1291_vm12, %v1293_v60, %v1289_v55 }
0x15d7   :  { %v1384_v47 = vpop.permute.xlu1 %1383 }
0x15d8   :  { %v1386_v43 = vmul.f32 %v1384_v47, %v1367_v59  ;;  %v4224_v59 = vadd.f32 %v1181_v15, %v4167_v56 }
0x15da   :  { %v1387_v52 = vsub.f32 %v1386_v43, %v4152_v12  ;;  %v1297_v18 = vmul.f32 %v1294_v1, %v4224_v59 }
0x15dc   :  { %v1393_v4 = vmul.f32 %v4210_v54, %v1387_v52 }
0x15de   :  { %v4214_v63 = vadd.f32 %v1393_v4, %v4152_v12 }
0x15df   :  { %v1300_v2 = vpop.permute.xlu1 %1299 }
0x15e0   :  { %v1302_v9 = vmul.f32 %v1300_v2, %v1294_v1  ;;  %v1462_v48 = vpack.c.bf16 %v4214_v63, %v4214_v63 }
0x15e2   :  { %1464 = vrot.lane.b32.xlu0 %v1462_v48, %s3696_s16  ;;  %1304 = vrot.lane.b32.xlu2 %v1302_v9, %s3696_s16 }
0x15e7   :  { %v4233_v33 = vpop.permute.xlu1 %1317 }
0x163c   :  { %v1305_v20 = vpop.permute.xlu2 %1304 }
0x163d   :  { %v4227_v3 = vadd.f32 %v1305_v20, %v1297_v18 }
0x163f   :  { %3500 = vtanh.f32 %v4227_v3 }
0x1645   :  { %v3501_v10 = vpop.eup %3500 }
0x1646   :  { %1310 = vrot.lane.b32.xlu0 %v3501_v10, %s3697_s17 }
0x1654   :  { %v1465_v25 = vpop.permute.xlu0 %1464 }
0x1655   :  { %3297 = vmatmul.msk.bf16.vlgmr.msrb.gmra.mxu2 %vm36_vm0, %v1465_v25  ;;  %v1395_v25 = vsub.f32 %v4200_v31, %v4197_v28 }
0x16b8   :  { %v1311_v34 = vpop.permute.xlu0 %1310 }
0x16b9   :  { %v1313_v32 = vmul.f32 %v1311_v34, %v1294_v1 }
0x16bb   :  { %v1314_v21 = vsub.f32 %v1313_v32, %v4180_v41  ;;  %v1396_v32 = vmul.f32 %v1395_v25, %v4210_v54 }
0x16bd   :  { %v1320_v56 = vmul.f32 %v4233_v33, %v1314_v21 }
0x16bf   :  { %v4237_v17 = vadd.f32 %v1320_v56, %v4180_v41  ;;  %v4254_v56 = vadd.f32 %v1396_v32, %v4197_v28 }
0x16c1   :  { %v1398_v35 = vpack.c.bf16 %v4237_v17, %v4237_v17 }
0x16c3   :  { %1400 = vrot.lane.b32.xlu0 %v1398_v35, %s3698_s30 }
0x16d8   :  { %v1478_v36 = vpop.f32.mrf.mxu2 }
0x16d9   :  { %1483 = vrot.lane.b32.xlu2 %v1478_v36, %s3699_s9 }
0x16e0   :  { %v1480_v39 = vpop.f32.mrf.mxu2 }
0x1733   :  { %v1484_v49 = vpop.permute.xlu2 %1483 }
0x1734   :  { %v1486_v38 = vadd.f32 %v1484_v49, %v3978_v19 }
0x1735   :  { %v1401_v40 = vpop.permute.xlu0 %1400 }
0x1736   :  { %3502 = vtanh.f32 %v1486_v38  ;;  %3295 = vmatmul.msk.bf16.vlgmr.msra.gmra.mxu0 %vm36_vm0, %v1401_v40  ;;  %v3298_v57 = vmul.f32 -1.442695, %v1486_v38 }
0x1737   :  { %1869 = vmatpush.bf16.msra.mxu0 %v3896_v13 }
0x1738   :  { %3504 = vpow2.f32 %v3298_v57 }
0x173c   :  { %v3503_v26 = vpop.eup %3502 }
0x173d   :  { %1509 = vrot.lane.b32.xlu1 %v3503_v26, %s3695_s15 }
0x173e   :  { %v3505_v42 = vpop.eup %3504 }
0x173f   :  { %v1490_v47 = vadd.f32 1.0, %v3505_v42 }
0x1741   :  { %3506 = vrcp.f32 %v1490_v47  ;;  %v1502_v19 = vand.u32 2147483648, %v1490_v47  ;;  %vm1496_vm14 = vweird.f32 %v1490_v47  ;;  %v1500_v4 = vand.u32 2147483647, %v1490_v47 }
0x1743   :  { %v1503_v13 = vor.u32 1.1754944e-38, %v1502_v19  ;;  %vm1501_vm2 = vcmp.eq.f32.partialorder %v1500_v4, 8.507059e+37 }
0x1747   :  { %v3507_v43 = vpop.eup %3506 }
0x1748   :  { %v1492_v24 = vmul.f32 %v3507_v43, %v1490_v47  ;;  %vm1497_vm13 = vweird.f32 %v3507_v43 }
0x1749   :  { %vm1498_vm15 = vmor %vm1496_vm14, %vm1497_vm13 }
0x174a   :  { %v1493_v51 = vsub.f32 1.0, %v1492_v24  ;;  %v1322_v24 = vsub.f32 %v4227_v3, %v4224_v59 }
0x174c   :  { %v1494_v52 = vmul.f32 %v3507_v43, %v1493_v51 }
0x174e   :  { %v1495_v53 = vadd.f32 %v3507_v43, %v1494_v52 }
0x1750   :  { %v1499_v55 = vsel %vm1498_vm15, %v3507_v43, %v1495_v53  ;;  %v1323_v53 = vmul.f32 %v1322_v24, %v4233_v33 }
0x1751   :  { %v1504_v60 = vsel %vm1501_vm2, %v1503_v13, %v1499_v55 }
0x1752   :  { %v4268_v55 = vadd.f32 %v1323_v53, %v4224_v59 }
0x17af   :  { %v1510_v1 = vpop.permute.xlu1 %1509 }
0x17b0   :  { %v1512_v2 = vmul.f32 %v1510_v1, %v1504_v60 }
0x17b2   :  { %1514 = vrot.lane.b32.xlu2 %v1512_v2, %s3696_s16 }
0x17b3   :  { %v1414_v9 = vpop.f32.mrf.mxu0 }
0x17b4   :  { %v1418_v48 = vadd.f32 %v1414_v9, %v3980_v22  ;;  %v1507_v22 = vmul.f32 %v1504_v60, %v4254_v56 }
0x17b6   :  { %3508 = vtanh.f32 %v1418_v48  ;;  %v3296_v18 = vmul.f32 -1.442695, %v1418_v48 }
0x17b8   :  { %3510 = vpow2.f32 %v3296_v18 }
0x17bb   :  { %v1416_v14 = vpop.f32.mrf.mxu0 }
0x17bc   :  { %v3509_v15 = vpop.eup %3508 }
0x17bd   :  { %1441 = vrot.lane.b32.xlu2 %v3509_v15, %s3695_s15 }
0x17be   :  { %v3511_v20 = vpop.eup %3510 }
0x17bf   :  { %v1422_v10 = vadd.f32 1.0, %v3511_v20 }
0x17c1   :  { %3512 = vrcp.f32 %v1422_v10  ;;  %v1434_v31 = vand.u32 2147483648, %v1422_v10  ;;  %vm1428_vm4 = vweird.f32 %v1422_v10  ;;  %v1432_v26 = vand.u32 2147483647, %v1422_v10 }
0x17c3   :  { %v1435_v57 = vor.u32 1.1754944e-38, %v1434_v31  ;;  %vm1433_vm6 = vcmp.eq.f32.partialorder %v1432_v26, 8.507059e+37 }
0x17c7   :  { %v3513_v34 = vpop.eup %3512 }
0x17c8   :  { %v1424_v21 = vmul.f32 %v3513_v34, %v1422_v10  ;;  %vm1429_vm3 = vweird.f32 %v3513_v34 }
0x17c9   :  { %vm1430_vm5 = vmor %vm1428_vm4, %vm1429_vm3 }
0x17ca   :  { %v1425_v36 = vsub.f32 1.0, %v1424_v21 }
0x17cc   :  { %v1426_v49 = vmul.f32 %v3513_v34, %v1425_v36 }
0x17ce   :  { %v1427_v38 = vadd.f32 %v3513_v34, %v1426_v49 }
0x17d0   :  { %v1431_v28 = vsel %vm1430_vm5, %v3513_v34, %v1427_v38 }
0x17d1   :  { %v1436_v47 = vsel %vm1433_vm6, %v1435_v57, %v1431_v28 }
0x17d2   :  { %v1439_v1 = vmul.f32 %v1436_v47, %v4268_v55 }
0x180c   :  { %v1515_v35 = vpop.permute.xlu2 %1514 }
0x180d   :  { %v4257_v39 = vadd.f32 %v1515_v35, %v1507_v22 }
0x180f   :  { %3514 = vtanh.f32 %v4257_v39 }
0x1815   :  { %v3515_v40 = vpop.eup %3514 }
0x1816   :  { %1520 = vrot.lane.b32.xlu0 %v3515_v40, %s3697_s17 }
0x1817   :  { %v1442_v42 = vpop.permute.xlu2 %1441 }
0x1818   :  { %v1444_v43 = vmul.f32 %v1442_v42, %v1436_v47 }
0x181e   :  { %1446 = vrot.lane.b32.xlu0 %v1444_v43, %s3696_s16 }
0x1888   :  { %v1521_v51 = vpop.permute.xlu0 %1520 }
0x1889   :  { %v1523_v52 = vmul.f32 %v1521_v51, %v1504_v60 }
0x188b   :  { %v1524_v19 = vsub.f32 %v1523_v52, %v4214_v63 }
0x188d   :  { %v1525_v4 = vmul.f32 %v1524_v19, %v4233_v33 }
0x188f   :  { %v4271_v13 = vadd.f32 %v1525_v4, %v4214_v63 }
0x1890   :  { %v1447_v2 = vpop.permute.xlu0 %1446 }
0x1891   :  { %v4274_v9 = vadd.f32 %v1447_v2, %v1439_v1  ;;  %v1594_v3 = vpack.c.bf16 %v4271_v13, %v4271_v13 }
0x1893   :  { %3516 = vtanh.f32 %v4274_v9  ;;  %1596 = vrot.lane.b32.xlu1 %v1594_v3, %s3696_s16 }
0x1899   :  { %v3517_v60 = vpop.eup %3516 }
0x189b   :  { %1452 = vrot.lane.b32.xlu1 %v3517_v60, %s3697_s17  ;;  %v1527_v60 = vsub.f32 %v4257_v39, %v4254_v56 }
0x1905   :  { %v1597_v59 = vpop.permute.xlu1 %1596 }
0x1906   :  { %3301 = vmatmul.msk.bf16.vlgmr.msrb.gmra.mxu0 %vm36_vm0, %v1597_v59 }
0x190d   :  { %v1453_v48 = vpop.permute.xlu1 %1452 }
0x190e   :  { %v1455_v14 = vmul.f32 %v1453_v48, %v1436_v47  ;;  %v1528_v48 = vmul.f32 %v1527_v60, %v4233_v33 }
0x1910   :  { %v1456_v15 = vsub.f32 %v1455_v14, %v4237_v17 }
0x1912   :  { %v1457_v18 = vmul.f32 %v1456_v15, %v4210_v54  ;;  %v4301_v15 = vadd.f32 %v1528_v48, %v4254_v56 }
0x1914   :  { %v4285_v20 = vadd.f32 %v1457_v18, %v4237_v17 }
0x1916   :  { %v1530_v10 = vpack.c.bf16 %v4285_v20, %v4285_v20 }
0x1918   :  { %1532 = vrot.lane.b32.xlu2 %v1530_v10, %s3698_s30 }
0x1972   :  { %v1533_v25 = vpop.permute.xlu2 %1532 }
0x1973   :  { %3299 = vmatmul.msk.bf16.vlgmr.msra.gmra.mxu3 %vm36_vm0, %v1533_v25 }
0x1983   :  { %v1610_v34 = vpop.f32.mrf.mxu0 }
0x1984   :  { %1615 = vrot.lane.b32.xlu0 %v1610_v34, %s3699_s9 }
0x198b   :  { %v1612_v32 = vpop.f32.mrf.mxu0 }
0x19f6   :  { %v1546_v21 = vpop.f32.mrf.mxu3  ;;  %v1616_v22 = vpop.permute.xlu0 %1615 }
0x19f7   :  { %v1618_v35 = vadd.f32 %v1616_v22, %v3976_v16  ;;  %v1550_v36 = vadd.f32 %v1546_v21, %v3982_v23 }
0x19f9   :  { %3518 = vtanh.f32 %v1618_v35  ;;  %v3302_v31 = vmul.f32 -1.442695, %v1618_v35  ;;  %v3300_v1 = vmul.f32 -1.442695, %v1550_v36 }
0x19fa   :  { %3520 = vtanh.f32 %v1550_v36 }
0x19fb   :  { %3522 = vpow2.f32 %v3302_v31  ;;  %v1459_v31 = vsub.f32 %v4274_v9, %v4268_v55 }
0x19fe   :  { %v1548_v49 = vpop.f32.mrf.mxu3 }
0x19ff   :  { %v3519_v38 = vpop.eup %3518 }
0x1a00   :  { %1641 = vrot.lane.b32.xlu1 %v3519_v38, %s3695_s15  ;;  %v3521_v40 = vpop.eup %3520 }
0x1a01   :  { %v3523_v26 = vpop.eup %3522 }
0x1a02   :  { %v1622_v28 = vadd.f32 1.0, %v3523_v26 }
0x1a04   :  { %3524 = vrcp.f32 %v1622_v28  ;;  %v1634_v23 = vand.u32 2147483648, %v1622_v28  ;;  %vm1628_vm8 = vweird.f32 %v1622_v28  ;;  %v1632_v24 = vand.u32 2147483647, %v1622_v28 }
0x1a05   :  { %3526 = vpow2.f32 %v3300_v1 }
0x1a06   :  { %v1635_v52 = vor.u32 1.1754944e-38, %v1634_v23  ;;  %vm1633_vm9 = vcmp.eq.f32.partialorder %v1632_v24, 8.507059e+37 }
0x1a08   :  { %1573 = vrot.lane.b32.xlu1 %v3521_v40, %s3695_s15 }
0x1a0a   :  { %v3525_v57 = vpop.eup %3524 }
0x1a0b   :  { %v1624_v42 = vmul.f32 %v3525_v57, %v1622_v28  ;;  %vm1629_vm7 = vweird.f32 %v3525_v57  ;;  %v3527_v2 = vpop.eup %3526  ;;  %v1460_v28 = vmul.f32 %v1459_v31, %v4210_v54 }
0x1a0c   :  { %vm1630_vm1 = vmor %vm1628_vm8, %vm1629_vm7  ;;  %v1554_v3 = vadd.f32 1.0, %v3527_v2 }
0x1a0d   :  { %v1625_v47 = vsub.f32 1.0, %v1624_v42 }
0x1a0e   :  { %3528 = vrcp.f32 %v1554_v3  ;;  %v1566_v39 = vand.u32 2147483648, %v1554_v3  ;;  %vm1560_vm11 = vweird.f32 %v1554_v3  ;;  %v1564_v35 = vand.u32 2147483647, %v1554_v3 }
0x1a0f   :  { %v1626_v16 = vmul.f32 %v3525_v57, %v1625_v47  ;;  %v4314_v47 = vadd.f32 %v1460_v28, %v4268_v55 }
0x1a10   :  { %v1567_v36 = vor.u32 1.1754944e-38, %v1566_v39  ;;  %vm1565_vm13 = vcmp.eq.f32.partialorder %v1564_v35, 8.507059e+37 }
0x1a11   :  { %v1627_v43 = vadd.f32 %v3525_v57, %v1626_v16 }
0x1a13   :  { %v1631_v51 = vsel %vm1630_vm1, %v3525_v57, %v1627_v43 }
0x1a14   :  { %v1636_v19 = vsel %vm1633_vm9, %v1635_v52, %v1631_v51  ;;  %v3529_v59 = vpop.eup %3528 }
0x1a15   :  { %v1556_v14 = vmul.f32 %v3529_v59, %v1554_v3  ;;  %v1639_v18 = vmul.f32 %v1636_v19, %v4301_v15  ;;  %vm1561_vm10 = vweird.f32 %v3529_v59 }
0x1a16   :  { %vm1562_vm12 = vmor %vm1560_vm11, %vm1561_vm10 }
0x1a17   :  { %v1557_v10 = vsub.f32 1.0, %v1556_v14 }
0x1a19   :  { %v1558_v32 = vmul.f32 %v3529_v59, %v1557_v10 }
0x1a1b   :  { %v1559_v21 = vadd.f32 %v3529_v59, %v1558_v32 }
0x1a1d   :  { %v1563_v56 = vsel %vm1562_vm12, %v3529_v59, %v1559_v21 }
0x1a1e   :  { %v1568_v38 = vsel %vm1565_vm13, %v1567_v36, %v1563_v56 }
0x1a1f   :  { %v1571_v23 = vmul.f32 %v1568_v38, %v4314_v47 }
0x1a72   :  { %v1642_v53 = vpop.permute.xlu1 %1641 }
0x1a73   :  { %v1644_v4 = vmul.f32 %v1642_v53, %v1636_v19 }
0x1a75   :  { %1646 = vrot.lane.b32.xlu2 %v1644_v4, %s3696_s16 }
0x1a7a   :  { %v1574_v49 = vpop.permute.xlu1 %1573 }
0x1a7b   :  { %v1576_v40 = vmul.f32 %v1574_v49, %v1568_v38 }
0x1acf   :  { %v1647_v25 = vpop.permute.xlu2 %1646 }
0x1ad0   :  { %v4304_v34 = vadd.f32 %v1647_v25, %v1639_v18 }
0x1ad2   :  { %3530 = vtanh.f32 %v4304_v34 }
0x1ad8   :  { %v3531_v22 = vpop.eup %3530 }
0x1ad9   :  { %1652 = vrot.lane.b32.xlu0 %v3531_v22, %s3697_s17 }
0x1ae1   :  { %1578 = vrot.lane.b32.xlu0 %v1576_v40, %s3696_s16 }
0x1b4b   :  { %v1653_v26 = vpop.permute.xlu0 %1652 }
0x1b4c   :  { %v1655_v57 = vmul.f32 %v1653_v26, %v1636_v19 }
0x1b4e   :  { %v1656_v42 = vsub.f32 %v1655_v57, %v4271_v13 }
0x1b50   :  { %v1657_v16 = vmul.f32 %v1656_v42, %v4176_v44 }
0x1b52   :  { %v4318_v43 = vadd.f32 %v1657_v16, %v4271_v13 }
0x1b53   :  { %v1579_v24 = vpop.permute.xlu0 %1578 }
0x1b54   :  { %v4321_v51 = vadd.f32 %v1579_v24, %v1571_v23  ;;  %v1726_v9 = vpack.c.bf16 %v4318_v43, %v4318_v43 }
0x1b56   :  { %3532 = vtanh.f32 %v4321_v51  ;;  %1728 = vrot.lane.b32.xlu2 %v1726_v9, %s3696_s16 }
0x1b5c   :  { %v3533_v52 = vpop.eup %3532 }
0x1b5d   :  { %1584 = vrot.lane.b32.xlu1 %v3533_v52, %s3697_s17 }
0x1bb0   :  { %v1729_v55 = vpop.permute.xlu2 %1728 }
0x1bb1   :  { %3305 = vmatmul.msk.bf16.vlgmr.msrb.gmra.mxu3 %vm36_vm0, %v1729_v55 }
0x1bcf   :  { %v1585_v53 = vpop.permute.xlu1 %1584 }
0x1bd0   :  { %v1587_v19 = vmul.f32 %v1585_v53, %v1568_v38 }
0x1bd2   :  { %v1588_v4 = vsub.f32 %v1587_v19, %v4285_v20 }
0x1bd4   :  { %v1589_v1 = vmul.f32 %v1588_v4, %v4148_v45 }
0x1bd6   :  { %v4332_v2 = vadd.f32 %v1589_v1, %v4285_v20 }
0x1bd8   :  { %v1662_v3 = vpack.c.bf16 %v4332_v2, %v4332_v2 }
0x1bda   :  { %1664 = vrot.lane.b32.xlu2 %v1662_v3, %s3698_s30 }
0x1c34   :  { %v1742_v60 = vpop.f32.mrf.mxu3  ;;  %v1665_v59 = vpop.permute.xlu2 %1664 }
0x1c35   :  { %1747 = vrot.lane.b32.xlu0 %v1742_v60, %s3699_s9  ;;  %3303 = vmatmul.msk.bf16.vlgmr.msra.gmra.mxu2 %vm36_vm0, %v1665_v59 }
0x1c3c   :  { %v1744_v48 = vpop.f32.mrf.mxu3 }
0x1ca7   :  { %v1748_v14 = vpop.permute.xlu0 %1747 }
0x1ca8   :  { %v1750_v18 = vadd.f32 %v1748_v14, %v3973_v7 }
0x1caa   :  { %3534 = vtanh.f32 %v1750_v18  ;;  %v3306_v39 = vmul.f32 -1.442695, %v1750_v18 }
0x1cb0   :  { %v3535_v10 = vpop.eup %3534 }
0x1cb1   :  { %1773 = vrot.lane.b32.xlu1 %v3535_v10, %s3695_s15  ;;  %v1659_v10 = vsub.f32 %v4304_v34, %v4301_v15 }
0x1cb8   :  { %v1678_v25 = vpop.f32.mrf.mxu2 }
0x1cb9   :  { %v1682_v32 = vadd.f32 %v1678_v25, %v3984_v27  ;;  %v1660_v25 = vmul.f32 %v1659_v10, %v4176_v44 }
0x1cbb   :  { %3536 = vtanh.f32 %v1682_v32  ;;  %v3304_v36 = vmul.f32 -1.442695, %v1682_v32  ;;  %v4349_v32 = vadd.f32 %v1660_v25, %v4301_v15 }
0x1cbc   :  { %3538 = vpow2.f32 %v3306_v39 }
0x1cc0   :  { %v1680_v21 = vpop.f32.mrf.mxu2 }
0x1cc1   :  { %v3537_v22 = vpop.eup %3536 }
0x1cc2   :  { %1705 = vrot.lane.b32.xlu0 %v3537_v22, %s3695_s15  ;;  %v3539_v35 = vpop.eup %3538 }
0x1cc3   :  { %v1754_v56 = vadd.f32 1.0, %v3539_v35  ;;  %v1591_v35 = vsub.f32 %v4321_v51, %v4314_v47 }
0x1cc5   :  { %3540 = vrcp.f32 %v1754_v56  ;;  %v1766_v28 = vand.u32 2147483648, %v1754_v56  ;;  %vm1760_vm15 = vweird.f32 %v1754_v56  ;;  %v1764_v42 = vand.u32 2147483647, %v1754_v56 }
0x1cc6   :  { %3542 = vpow2.f32 %v3304_v36  ;;  %v1592_v36 = vmul.f32 %v1591_v35, %v4148_v45 }
0x1cc7   :  { %v1767_v23 = vor.u32 1.1754944e-38, %v1766_v28  ;;  %vm1765_vm3 = vcmp.eq.f32.partialorder %v1764_v42, 8.507059e+37 }
0x1cc8   :  { %v4360_v34 = vadd.f32 %v1592_v36, %v4314_v47 }
0x1ccb   :  { %v3541_v7 = vpop.eup %3540 }
0x1ccc   :  { %v1756_v49 = vmul.f32 %v3541_v7, %v1754_v56  ;;  %v3543_v38 = vpop.eup %3542  ;;  %vm1761_vm14 = vweird.f32 %v3541_v7 }
0x1ccd   :  { %v1686_v40 = vadd.f32 1.0, %v3543_v38  ;;  %vm1762_vm2 = vmor %vm1760_vm15, %vm1761_vm14 }
0x1cce   :  { %v1757_v31 = vsub.f32 1.0, %v1756_v49 }
0x1ccf   :  { %3544 = vrcp.f32 %v1686_v40  ;;  %v1698_v1 = vand.u32 2147483648, %v1686_v40  ;;  %vm1692_vm5 = vweird.f32 %v1686_v40  ;;  %v1696_v3 = vand.u32 2147483647, %v1686_v40 }
0x1cd0   :  { %v1758_v26 = vmul.f32 %v3541_v7, %v1757_v31 }
0x1cd1   :  { %v1699_v59 = vor.u32 1.1754944e-38, %v1698_v1  ;;  %vm1697_vm7 = vcmp.eq.f32.partialorder %v1696_v3, 8.507059e+37 }
0x1cd2   :  { %v1759_v27 = vadd.f32 %v3541_v7, %v1758_v26 }
0x1cd4   :  { %v1763_v16 = vsel %vm1762_vm2, %v3541_v7, %v1759_v27 }
0x1cd5   :  { %v3545_v57 = vpop.eup %3544  ;;  %v1768_v52 = vsel %vm1765_vm3, %v1767_v23, %v1763_v16 }
0x1cd6   :  { %v1688_v24 = vmul.f32 %v3545_v57, %v1686_v40  ;;  %vm1693_vm4 = vweird.f32 %v3545_v57  ;;  %v1771_v21 = vmul.f32 %v1768_v52, %v4349_v32 }
0x1cd7   :  { %vm1694_vm6 = vmor %vm1692_vm5, %vm1693_vm4 }
0x1cd8   :  { %v1689_v53 = vsub.f32 1.0, %v1688_v24 }
0x1cda   :  { %v1690_v19 = vmul.f32 %v3545_v57, %v1689_v53 }
0x1cdc   :  { %v1691_v4 = vadd.f32 %v3545_v57, %v1690_v19 }
0x1cde   :  { %v1695_v60 = vsel %vm1694_vm6, %v3545_v57, %v1691_v4 }
0x1cdf   :  { %v1700_v48 = vsel %vm1697_vm7, %v1699_v59, %v1695_v60 }
0x1ce0   :  { %v1703_v15 = vmul.f32 %v1700_v48, %v4360_v34 }
0x1d23   :  { %v1774_v9 = vpop.permute.xlu1 %1773 }
0x1d24   :  { %v1776_v55 = vmul.f32 %v1774_v9, %v1768_v52 }
0x1d26   :  { %1778 = vrot.lane.b32.xlu2 %v1776_v55, %s3696_s16 }
0x1d34   :  { %v1706_v14 = vpop.permute.xlu0 %1705 }
0x1d35   :  { %v1708_v18 = vmul.f32 %v1706_v14, %v1700_v48 }
0x1d37   :  { %1710 = vrot.lane.b32.xlu2 %v1708_v18, %s3696_s16 }
0x1d80   :  { %v1779_v22 = vpop.permute.xlu2 %1778 }
0x1d81   :  { %v4352_v39 = vadd.f32 %v1779_v22, %v1771_v21 }
0x1d83   :  { %3546 = vtanh.f32 %v4352_v39 }
0x1d89   :  { %v3547_v56 = vpop.eup %3546 }
0x1d8a   :  { %1784 = vrot.lane.b32.xlu1 %v3547_v56, %s3697_s17 }
0x1d91   :  { %v1711_v7 = vpop.permute.xlu2 %1710 }
0x1d92   :  { %v4363_v49 = vadd.f32 %v1711_v7, %v1703_v15 }
0x1d94   :  { %3548 = vtanh.f32 %v4363_v49 }
0x1d9a   :  { %v3549_v38 = vpop.eup %3548 }
0x1d9b   :  { %1716 = vrot.lane.b32.xlu1 %v3549_v38, %s3697_s17 }
0x1dfc   :  { %v1785_v40 = vpop.permute.xlu1 %1784 }
0x1dfd   :  { %v1787_v51 = vmul.f32 %v1785_v40, %v1768_v52 }
0x1dff   :  { %v1788_v31 = vsub.f32 %v1787_v51, %v4318_v43 }
0x1e01   :  { %v1789_v26 = vmul.f32 %v1788_v31, %v4119_v58 }
0x1e03   :  { %v4370_v27 = vadd.f32 %v1789_v26, %v4318_v43 }
0x1e05   :  { %v1855_v47 = vpack.c.bf16 %v4370_v27, %v4370_v27 }
0x1e07   :  { %1857 = vrot.lane.b32.xlu0 %v1855_v47, %s3696_s16 }
0x1e0d   :  { %v1717_v28 = vpop.permute.xlu1 %1716 }
0x1e0e   :  { %v1719_v57 = vmul.f32 %v1717_v28, %v1700_v48 }
0x1e10   :  { %v1720_v42 = vsub.f32 %v1719_v57, %v4332_v2 }
0x1e12   :  { %v1721_v16 = vmul.f32 %v1720_v42, %v4087_v5 }
0x1e14   :  { %v4378_v23 = vadd.f32 %v1721_v16, %v4332_v2 }
0x1e16   :  { %v1794_v24 = vpack.c.bf16 %v4378_v23, %v4378_v23 }
0x1e18   :  { %1796 = vrot.lane.b32.xlu2 %v1794_v24, %s3698_s30 }
0x1e72   :  { %v1797_v9 = vpop.permute.xlu2 %1796 }
0x1e73   :  { %3307 = vmatmul.msk.bf16.vlgmr.msra.gmra.mxu1 %vm36_vm0, %v1797_v9 }
0x1e79   :  { %v1858_v52 = vpop.permute.xlu0 %1857 }
0x1e7a   :  { %3309 = vmatmul.msk.bf16.vlgmr.msra.gmra.mxu0 %vm36_vm0, %v1858_v52  ;;  %v1723_v52 = vsub.f32 %v4363_v49, %v4360_v34  ;;  %v1925_v49 = vpack.c.bf16 %v4271_v13, %v4318_v43  ;;  %v1920_v13 = vpack.c.bf16 %v4123_v61, %v4061_v50  ;;  %v1928_v50 = vld [vmem:[%s4885_s0 + $0x130] sm:$0xff]  ;;  %v1929_v61 = vld [vmem:[%s4885_s0 + $0x138] sm:$0xff] }
0x1ef0   :  { %v1810_v55 = vpop.f32.mrf.mxu1 }
0x1ef1   :  { %v1814_v53 = vadd.f32 %v1810_v55, %v3986_v29 }
0x1ef3   :  { %3550 = vtanh.f32 %v1814_v53  ;;  %v3308_v60 = vmul.f32 -1.442695, %v1814_v53 }
0x1ef5   :  { %3552 = vpow2.f32 %v3308_v60 }
0x1ef7   :  { %v1871_v19 = vpop.f32.mrf.mxu0 }
0x1ef8   :  { %v1812_v4 = vpop.f32.mrf.mxu1  ;;  %1876 = vrot.lane.b32.xlu0 %v1871_v19, %s3699_s9 }
0x1ef9   :  { %v3551_v1 = vpop.eup %3550 }
0x1efb   :  { %v3553_v59 = vpop.eup %3552 }
0x1efc   :  { %v1818_v48 = vadd.f32 1.0, %v3553_v59 }
0x1efe   :  { %3554 = vrcp.f32 %v1818_v48  ;;  %v1830_v56 = vand.u32 2147483648, %v1818_v48  ;;  %vm1824_vm1 = vweird.f32 %v1818_v48  ;;  %v1828_v36 = vand.u32 2147483647, %v1818_v48 }
0x1eff   :  { %v1873_v3 = vpop.f32.mrf.mxu0 }
0x1f00   :  { %1837 = vrot.lane.b32.xlu0 %v3551_v1, %s3695_s15  ;;  %v1831_v7 = vor.u32 1.1754944e-38, %v1830_v56  ;;  %vm1829_vm10 = vcmp.eq.f32.partialorder %v1828_v36, 8.507059e+37  ;;  %v1724_v1 = vmul.f32 %v1723_v52, %v4087_v5 }
0x1f02   :  { %v1725_v60 = vadd.f32 %v1724_v1, %v4360_v34  ;;  %v1791_v34 = vsub.f32 %v4352_v39, %v4349_v32  ;;  %v1927_v1 = vpack.c.bf16 %v4020_v8, %v4091_v11 }
0x1f04   :  { %v3555_v14 = vpop.eup %3554 }
0x1f05   :  { %v1820_v18 = vmul.f32 %v3555_v14, %v1818_v48  ;;  %vm1825_vm8 = vweird.f32 %v3555_v14 }
0x1f06   :  { %vm1826_vm9 = vmor %vm1824_vm1, %vm1825_vm8 }
0x1f07   :  { %v1821_v25 = vsub.f32 1.0, %v1820_v18 }
0x1f09   :  { %v1822_v21 = vmul.f32 %v3555_v14, %v1821_v25  ;;  %v1792_v25 = vmul.f32 %v1791_v34, %v4119_v58 }
0x1f0b   :  { %v1823_v22 = vadd.f32 %v3555_v14, %v1822_v21 }
0x1f0d   :  { %v1827_v15 = vsel %vm1826_vm9, %v3555_v14, %v1823_v22 }
0x1f0e   :  { %v1832_v40 = vsel %vm1829_vm10, %v1831_v7, %v1827_v15 }
0x1f0f   :  { %v1835_v59 = vmul.f32 %v1832_v40, %v1725_v60  ;;  %v2065_v60 = vld [vmem:[%s4885_s0 + $0x158] sm:$0xff] }
0x1f6a   :  { %v1877_v10 = vpop.permute.xlu0 %1876 }
0x1f6b   :  { %v1879_v29 = vadd.f32 %v1877_v10, %v3970_v62  ;;  %v1922_v10 = vpack.c.bf16 %v4332_v2, %v4285_v20  ;;  %v1926_v20 = vpack.c.bf16 %v4152_v12, %v4214_v63  ;;  %v1932_v12 = vpack.c.bf16 %v1928_v50, %v1928_v50 }
0x1f6c   :  { %v1933_v63 = vpack.c.bf16 %v1929_v61, %v1929_v61 }
0x1f6d   :  { %3556 = vtanh.f32 %v1879_v29  ;;  %v3310_v62 = vmul.f32 -1.442695, %v1879_v29  ;;  %v1793_v29 = vadd.f32 %v1792_v25, %v4349_v32  ;;  %v2009_v7 = vunpack.c.l.b16 %v1932_v12 }
0x1f6f   :  { %3558 = vpow2.f32 %v3310_v62 }
0x1f72   :  { %v1838_v38 = vpop.permute.xlu0 %1837 }
0x1f73   :  { %v3557_v35 = vpop.eup %3556  ;;  %v1840_v51 = vmul.f32 %v1838_v38, %v1832_v40  ;;  %v2010_v38 = vunpack.c.l.b16 %v1933_v63 }
0x1f74   :  { %1902 = vrot.lane.b32.xlu1 %v3557_v35, %s3695_s15 }
0x1f75   :  { %v3559_v31 = vpop.eup %3558 }
0x1f76   :  { %v1883_v26 = vadd.f32 1.0, %v3559_v31 }
0x1f78   :  { %3560 = vrcp.f32 %v1883_v26  ;;  %v1895_v24 = vand.u32 2147483648, %v1883_v26  ;;  %vm1889_vm12 = vweird.f32 %v1883_v26  ;;  %v1893_v9 = vand.u32 2147483647, %v1883_v26 }
0x1f7a   :  { %v1896_v53 = vor.u32 1.1754944e-38, %v1895_v24  ;;  %vm1894_vm14 = vcmp.eq.f32.partialorder %v1893_v9, 8.507059e+37  ;;  %v1931_v9 = vld [vmem:[%s4885_s0 + $0x148] sm:$0xff] }
0x1f7c   :  { %1842 = vrot.lane.b32.xlu1 %v1840_v51, %s3696_s16 }
0x1f7e   :  { %v3561_v47 = vpop.eup %3560 }
0x1f7f   :  { %v1885_v28 = vmul.f32 %v3561_v47, %v1883_v26  ;;  %vm1890_vm11 = vweird.f32 %v3561_v47 }
0x1f80   :  { %vm1891_vm13 = vmor %vm1889_vm12, %vm1890_vm11 }
0x1f81   :  { %v1886_v57 = vsub.f32 1.0, %v1885_v28  ;;  %v2067_v28 = vld [vmem:[%s4885_s0 + $0x160] sm:$0xff] }
0x1f83   :  { %v1887_v42 = vmul.f32 %v3561_v47, %v1886_v57  ;;  %v2068_v57 = vld [vmem:[%s4885_s0 + $0x168] sm:$0xff] }
0x1f84   :  { %v4439_v24 = vpack.c.bf16 %v2068_v57, %v2067_v28 }
0x1f85   :  { %v1888_v16 = vadd.f32 %v3561_v47, %v1887_v42  ;;  %v1930_v42 = vld [vmem:[%s4885_s0 + $0x140] sm:$0xff] }
0x1f86   :  { %v1934_v52 = vpack.c.bf16 %v1930_v42, %v1930_v42  ;;  %2132 = vmatpush.bf16.msrb.mxu0 %v4439_v24 }
0x1f87   :  { %v1892_v55 = vsel %vm1891_vm13, %v3561_v47, %v1888_v16 }
0x1f88   :  { %v1897_v4 = vsel %vm1894_vm14, %v1896_v53, %v1892_v55  ;;  %v1935_v55 = vpack.c.bf16 %v1931_v9, %v1931_v9  ;;  %v1950_v53 = vunpack.c.l.b16 %v1934_v52 }
0x1f89   :  { %v1900_v21 = vmul.f32 %v1897_v4, %v1793_v29  ;;  %2133 = vmatmul.bf16.vlgmr.msrb.gmra.mxu0 %v3694_v0  ;;  %v3371_v29 = vld [vmem:[%s4885_s0 + $0x170] ss:$0 sm:$0xff] }
0x1f8a   :  { %2262 = vmatpush.bf16.msra.mxu0 %v4439_v24 }
0x1f8e   :  { %2394 = vmatpush.bf16.msrb.mxu0 %v4439_v24 }
0x1fe6   :  { %v1903_v19 = vpop.permute.xlu1 %1902 }
0x1fe7   :  { %v1905_v3 = vmul.f32 %v1903_v19, %v1897_v4  ;;  %v1951_v19 = vunpack.c.l.b16 %v1935_v55 }
0x1fe9   :  { %1907 = vrot.lane.b32.xlu2 %v1905_v3, %s3696_s16  ;;  %v2064_v3 = vld [vmem:[%s4885_s0 + $0x150] sm:$0xff] }
0x1fee   :  { %v1843_v48 = vpop.permute.xlu1 %1842 }
0x1fef   :  { %v1845_v14 = vadd.f32 %v1843_v48, %v1835_v59  ;;  %v4463_v59 = vpack.c.bf16 %v2065_v60, %v2064_v3 }
0x1ff1   :  { %3562 = vtanh.f32 %v1845_v14  ;;  %2077 = vmatpush.bf16.msrb.mxu1 %v4463_v59 }
0x1ff4   :  { %2078 = vmatmul.bf16.vlgmr.msrb.gmra.mxu1 %v3694_v0 }
0x1ff5   :  { %2198 = vmatpush.bf16.msra.mxu1 %v4463_v59 }
0x1ff7   :  { %v3563_v18 = vpop.eup %3562 }
0x1ff8   :  { %1848 = vrot.lane.b32.xlu0 %v3563_v18, %s3697_s17 }
0x1ff9   :  { %2330 = vmatpush.bf16.msrb.mxu1 %v4463_v59 }
0x2000   :  { %1942 = vrot.lane.b32.xlu0 %v1925_v49, %s3696_s16 }
0x2008   :  { %2003 = vrot.lane.b32.xlu0 %v1922_v10, %s3698_s30 }
0x2043   :  { %v1908_v22 = vpop.permute.xlu2 %1907 }
0x2044   :  { %v1910_v35 = vadd.f32 %v1908_v22, %v1900_v21 }
0x2046   :  { %3564 = vtanh.f32 %v1910_v35 }
0x204c   :  { %v3565_v56 = vpop.eup %3564 }
0x204d   :  { %1913 = vrot.lane.b32.xlu2 %v3565_v56, %s3697_s17 }
0x2055   :  { %1999 = vrot.lane.b32.xlu2 %v1920_v13, %s3698_s30 }
0x205d   :  { %1944 = vrot.lane.b32.xlu2 %v1926_v20, %s3696_s16 }
0x206a   :  { %v1849_v43 = vpop.permute.xlu0 %1848 }
0x206b   :  { %v1851_v2 = vmul.f32 %v1849_v43, %v1832_v40  ;;  %v2011_v40 = vpack.c.b16 %v2010_v38, %v2009_v7 }
0x206d   :  { %v1852_v32 = vsub.f32 %v1851_v2, %v4378_v23  ;;  %2032 = vmatpush.bf16.msra.mxu3 %v2011_v40 }
0x206f   :  { %v1853_v39 = vmul.f32 %v1852_v32, %v4017_v6 }
0x2071   :  { %v1854_v36 = vadd.f32 %v1853_v39, %v4378_v23  ;;  %2658 = vmatpush.bf16.msrb.mxu3 %v4439_v24  ;;  %v2079_v10 = vpop.f32.mrf.mxu1 }
0x2073   :  { %v1923_v15 = vpack.c.bf16 %v1854_v36, %v4378_v23 }
0x2075   :  { %2005 = vrot.lane.b32.xlu2 %v1923_v15, %s3698_s30 }
0x2079   :  { %v2081_v34 = vpop.f32.mrf.mxu1 }
0x20a7   :  { %v1914_v51 = vpop.permute.xlu2 %1913 }
0x20a8   :  { %v1916_v62 = vmul.f32 %v1914_v51, %v1897_v4  ;;  %v1921_v4 = vpack.c.bf16 %v4237_v17, %v4180_v41  ;;  %v1943_v41 = vpop.permute.xlu0 %1942  ;;  %v2134_v17 = vpop.f32.mrf.mxu0 }
0x20a9   :  { %2139 = vrot.lane.b32.xlu0 %v2134_v17, %s3699_s9 }
0x20aa   :  { %v1917_v23 = vsub.f32 %v1916_v62, %v4370_v27 }
0x20ac   :  { %v1918_v31 = vmul.f32 %v1917_v23, %v4056_v46 }
0x20ae   :  { %v1919_v26 = vadd.f32 %v1918_v31, %v4370_v27 }
0x20af   :  { %v2000_v47 = vpop.permute.xlu2 %1999 }
0x20b0   :  { %3315 = vmatmul.msk.bf16.vlgmr.msra.gmra.mxu3 %vm36_vm0, %v2000_v47  ;;  %v1924_v16 = vpack.c.bf16 %v4370_v27, %v1919_v26  ;;  %v1952_v27 = vpack.c.b16 %v1951_v19, %v1950_v53  ;;  %v2004_v48 = vpop.permute.xlu0 %2003  ;;  %v2136_v0 = vpop.f32.mrf.mxu0 }
0x20b1   :  { %2922 = vmatpush.bf16.msra.mxu3 %v4439_v24 }
0x20b2   :  { %1940 = vrot.lane.b32.xlu1 %v1924_v16, %s3696_s16  ;;  %1973 = vmatpush.bf16.msrb.mxu2 %v1952_v27 }
0x20b6   :  { %2594 = vmatpush.bf16.msra.mxu2 %v4463_v59 }
0x20b7   :  { %v1945_v14 = vpop.permute.xlu2 %1944 }
0x20ba   :  { %2001 = vrot.lane.b32.xlu1 %v1921_v4, %s3698_s30 }
0x20c2   :  { %1946 = vrot.lane.b32.xlu1 %v1927_v1, %s3696_s16 }
0x20cf   :  { %v2006_v18 = vpop.permute.xlu2 %2005 }
0x211b   :  { %v2140_v52 = vpop.permute.xlu0 %2139 }
0x2124   :  { %v1941_v8 = vpop.permute.xlu1 %1940 }
0x2125   :  { %3311 = vmatmul.msk.bf16.vlgmr.msrb.gmra.mxu2 %vm36_vm0, %v1941_v8 }
0x2126   :  { %2858 = vmatpush.bf16.msrb.mxu2 %v4463_v59 }
0x212c   :  { %v2002_v11 = vpop.permute.xlu1 %2001 }
0x212d   :  { %3316 = vmatmul.msk.bf16.gmra.mxu3 %vm36_vm0, %v2002_v11 }
0x2133   :  { %v2034_v25 = vpop.f32.mrf.mxu3 }
0x2134   :  { %v1947_v49 = vpop.permute.xlu1 %1946 }
0x2135   :  { %3312 = vmatmul.msk.bf16.gmra.mxu2 %vm36_vm0, %v1943_v41 }
0x213b   :  { %v2036_v21 = vpop.f32.mrf.mxu3 }
0x213d   :  { %3317 = vmatmul.msk.bf16.gmra.mxu3 %vm36_vm0, %v2004_v48 }
0x2145   :  { %3313 = vmatmul.msk.bf16.gmra.mxu2 %vm36_vm0, %v1945_v14 }
0x214d   :  { %3318 = vmatmul.msk.bf16.gmra.mxu3 %vm36_vm0, %v2006_v18 }
0x2155   :  { %3314 = vmatmul.msk.bf16.gmra.mxu2 %vm36_vm0, %v1947_v49 }
0x21a8   :  { %v1975_v22 = vpop.f32.mrf.mxu2 }
0x21a9   :  { %v2035_v35 = vadd.f32 %v2034_v25, %v1975_v22 }
0x21ab   :  { %v4482_v56 = vadd.f32 %v3371_v29, %v2035_v35 }
0x21ad   :  { %v2083_v18 = vadd.f32 %v2079_v10, %v4482_v56 }
0x21b0   :  { %v1977_v13 = vpop.f32.mrf.mxu2  ;;  %v2039_v20 = vpop.f32.mrf.mxu3 }
0x21b1   :  { %v2037_v43 = vadd.f32 %v2036_v21, %v1977_v13 }
0x21b3   :  { %v4484_v2 = vadd.f32 %v3371_v29, %v2037_v43 }
0x21b8   :  { %v1980_v32 = vpop.f32.mrf.mxu2  ;;  %v2041_v39 = vpop.f32.mrf.mxu3 }
0x21b9   :  { %v2040_v36 = vadd.f32 %v2039_v20, %v1980_v32  ;;  %v3319_v20 = vmul.f32 -1.442695, %v2083_v18 }
0x21bb   :  { %v4486_v15 = vadd.f32 %v3371_v29, %v2040_v36 }
0x21c0   :  { %v1982_v50 = vpop.f32.mrf.mxu2  ;;  %v2044_v12 = vpop.f32.mrf.mxu3 }
0x21c1   :  { %v2042_v61 = vadd.f32 %v2041_v39, %v1982_v50 }
0x21c3   :  { %v4488_v63 = vadd.f32 %v3371_v29, %v2042_v61 }
0x21c8   :  { %v1985_v7 = vpop.f32.mrf.mxu2  ;;  %v2046_v51 = vpop.f32.mrf.mxu3 }
0x21c9   :  { %v2045_v38 = vadd.f32 %v2044_v12, %v1985_v7 }
0x21cb   :  { %v4490_v40 = vadd.f32 %v3371_v29, %v2045_v38 }
0x21d0   :  { %v1987_v62 = vpop.f32.mrf.mxu2  ;;  %v2049_v26 = vpop.f32.mrf.mxu3 }
0x21d1   :  { %v2047_v23 = vadd.f32 %v2046_v51, %v1987_v62 }
0x21d3   :  { %v4492_v31 = vadd.f32 %v3371_v29, %v2047_v23 }
0x21d8   :  { %v1990_v47 = vpop.f32.mrf.mxu2  ;;  %v2051_v42 = vpop.f32.mrf.mxu3 }
0x21d9   :  { %v2050_v28 = vadd.f32 %v2049_v26, %v1990_v47 }
0x21db   :  { %v4494_v57 = vadd.f32 %v3371_v29, %v2050_v28 }
0x21e0   :  { %v1992_v16 = vpop.f32.mrf.mxu2 }
0x21e1   :  { %v2052_v9 = vadd.f32 %v2051_v42, %v1992_v16 }
0x21e3   :  { %v4496_v55 = vadd.f32 %v3371_v29, %v2052_v9 }
0x21e5   :  { %v2142_v53 = vadd.f32 %v2140_v52, %v4496_v55 }
0x21e7   :  { %3566 = vtanh.f32 %v2142_v53  ;;  %v3320_v27 = vmul.f32 -1.442695, %v2142_v53 }
0x21e9   :  { %3568 = vpow2.f32 %v3320_v27 }
0x21ed   :  { %v3567_v19 = vpop.eup %3566 }
0x21ee   :  { %2165 = vrot.lane.b32.xlu1 %v3567_v19, %s3695_s15 }
0x21ef   :  { %v3569_v4 = vpop.eup %3568 }
0x21f0   :  { %v2146_v1 = vadd.f32 1.0, %v3569_v4 }
0x21f2   :  { %3570 = vrcp.f32 %v2146_v1  ;;  %v2158_v17 = vand.u32 2147483648, %v2146_v1  ;;  %vm2152_vm2 = vweird.f32 %v2146_v1  ;;  %v2156_v48 = vand.u32 2147483647, %v2146_v1 }
0x21f3   :  { %3572 = vtanh.f32 %v2083_v18 }
0x21f4   :  { %v2159_v14 = vor.u32 1.1754944e-38, %v2158_v17  ;;  %vm2157_vm4 = vcmp.eq.f32.partialorder %v2156_v48, 8.507059e+37 }
0x21f8   :  { %v3571_v3 = vpop.eup %3570 }
0x21f9   :  { %v2148_v60 = vmul.f32 %v3571_v3, %v2146_v1  ;;  %vm2153_vm15 = vweird.f32 %v3571_v3  ;;  %v3573_v29 = vpop.eup %3572 }
0x21fa   :  { %vm2154_vm3 = vmor %vm2152_vm2, %vm2153_vm15 }
0x21fb   :  { %v2149_v8 = vsub.f32 1.0, %v2148_v60 }
0x21fd   :  { %v2150_v11 = vmul.f32 %v3571_v3, %v2149_v8 }
0x21ff   :  { %v2151_v41 = vadd.f32 %v3571_v3, %v2150_v11 }
0x2201   :  { %v2155_v0 = vsel %vm2154_vm3, %v3571_v3, %v2151_v41 }
0x2202   :  { %v2160_v34 = vsel %vm2157_vm4, %v2159_v14, %v2155_v0 }
0x2203   :  { %v2163_v21 = vmul.f32 0.0, %v2160_v34 }
0x2260   :  { %v2166_v49 = vpop.permute.xlu1 %2165 }
0x2261   :  { %v2168_v25 = vmul.f32 %v2166_v49, %v2160_v34 }
0x2263   :  { %2170 = vrot.lane.b32.xlu2 %v2168_v25, %s3696_s16 }
0x226b   :  { %2106 = vrot.lane.b32.xlu2 %v3573_v29, %s3695_s15 }
0x22bd   :  { %v2171_v22 = vpop.permute.xlu2 %2170 }
0x22be   :  { %v4503_v35 = vadd.f32 %v2171_v22, %v2163_v21 }
0x22c0   :  { %3574 = vtanh.f32 %v4503_v35 }
0x22c1   :  { %3576 = vpow2.f32 %v3319_v20 }
0x22c5   :  { %v2107_v28 = vpop.permute.xlu2 %2106 }
0x22c6   :  { %v3575_v13 = vpop.eup %3574 }
0x22c7   :  { %2176 = vrot.lane.b32.xlu0 %v3575_v13, %s3697_s17  ;;  %v3577_v10 = vpop.eup %3576 }
0x22c8   :  { %v2087_v43 = vadd.f32 1.0, %v3577_v10 }
0x22ca   :  { %3578 = vrcp.f32 %v2087_v43  ;;  %v2099_v62 = vand.u32 2147483648, %v2087_v43  ;;  %vm2093_vm6 = vweird.f32 %v2087_v43  ;;  %v2097_v23 = vand.u32 2147483647, %v2087_v43 }
0x22cc   :  { %v2100_v47 = vor.u32 1.1754944e-38, %v2099_v62  ;;  %vm2098_vm8 = vcmp.eq.f32.partialorder %v2097_v23, 8.507059e+37 }
0x22d0   :  { %v3579_v32 = vpop.eup %3578 }
0x22d1   :  { %v2089_v39 = vmul.f32 %v3579_v32, %v2087_v43  ;;  %vm2094_vm5 = vweird.f32 %v3579_v32 }
0x22d2   :  { %vm2095_vm7 = vmor %vm2093_vm6, %vm2094_vm5 }
0x22d3   :  { %v2090_v36 = vsub.f32 1.0, %v2089_v39 }
0x22d5   :  { %v2091_v61 = vmul.f32 %v3579_v32, %v2090_v36 }
0x22d7   :  { %v2092_v38 = vadd.f32 %v3579_v32, %v2091_v61 }
0x22d9   :  { %v2096_v26 = vsel %vm2095_vm7, %v3579_v32, %v2092_v38 }
0x22da   :  { %v2101_v42 = vsel %vm2098_vm8, %v2100_v47, %v2096_v26 }
0x22db   :  { %v2109_v16 = vmul.f32 %v2107_v28, %v2101_v42  ;;  %v2104_v53 = vmul.f32 0.0, %v2101_v42 }
0x2339   :  { %v2177_v50 = vpop.permute.xlu0 %2176 }
0x233a   :  { %v2179_v12 = vmul.f32 %v2177_v50, %v2160_v34  ;;  %v4534_v50 = vmul.f32 %v4503_v35, %v4017_v6 }
0x233c   :  { %v4508_v7 = vmul.f32 %v2179_v12, %v4017_v6 }
0x233e   :  { %v2248_v51 = vpack.c.bf16 %v4508_v7, %v4508_v7 }
0x2340   :  { %2250 = vrot.lane.b32.xlu1 %v2248_v51, %s3696_s16 }
0x2348   :  { %2111 = vrot.lane.b32.xlu1 %v2109_v16, %s3696_s16 }
0x23b2   :  { %v2251_v9 = vpop.permute.xlu1 %2250 }
0x23b3   :  { %3323 = vmatmul.msk.bf16.vlgmr.msra.gmra.mxu0 %vm36_vm0, %v2251_v9 }
0x23b4   :  { %2526 = vmatpush.bf16.msra.mxu0 %v4439_v24 }
0x23ba   :  { %v2112_v52 = vpop.permute.xlu1 %2111 }
0x23bb   :  { %v4516_v19 = vadd.f32 %v2112_v52, %v2104_v53 }
0x23bd   :  { %3580 = vtanh.f32 %v4516_v19 }
0x23c3   :  { %v3581_v4 = vpop.eup %3580 }
0x2430   :  { %v2264_v27 = vpop.f32.mrf.mxu0 }
0x2431   :  { %2269 = vrot.lane.b32.xlu0 %v2264_v27, %s3699_s9 }
0x2438   :  { %v2266_v1 = vpop.f32.mrf.mxu0 }
0x2439   :  { %2117 = vrot.lane.b32.xlu0 %v3581_v4, %s3697_s17 }
0x24a3   :  { %v2270_v3 = vpop.permute.xlu0 %2269 }
0x24a4   :  { %v2272_v60 = vadd.f32 %v2270_v3, %v4494_v57 }
0x24a6   :  { %3582 = vtanh.f32 %v2272_v60  ;;  %v3324_v0 = vmul.f32 -1.442695, %v2272_v60 }
0x24a8   :  { %3584 = vpow2.f32 %v3324_v0 }
0x24ab   :  { %v2118_v8 = vpop.permute.xlu0 %2117 }
0x24ac   :  { %v3583_v11 = vpop.eup %3582  ;;  %v2120_v41 = vmul.f32 %v2118_v8, %v2101_v42 }
0x24ad   :  { %2295 = vrot.lane.b32.xlu2 %v3583_v11, %s3695_s15 }
0x24ae   :  { %v4524_v17 = vmul.f32 %v2120_v41, %v4056_v46  ;;  %v3585_v14 = vpop.eup %3584 }
0x24af   :  { %v2276_v18 = vadd.f32 1.0, %v3585_v14 }
0x24b0   :  { %v2184_v48 = vpack.c.bf16 %v4524_v17, %v4524_v17 }
0x24b1   :  { %3586 = vrcp.f32 %v2276_v18  ;;  %v2288_v22 = vand.u32 2147483648, %v2276_v18  ;;  %vm2282_vm9 = vweird.f32 %v2276_v18  ;;  %v2286_v13 = vand.u32 2147483647, %v2276_v18 }
0x24b3   :  { %v2289_v10 = vor.u32 1.1754944e-38, %v2288_v22  ;;  %vm2287_vm11 = vcmp.eq.f32.partialorder %v2286_v13, 8.507059e+37 }
0x24b5   :  { %2186 = vrot.lane.b32.xlu2 %v2184_v48, %s3698_s30 }
0x24b7   :  { %v3587_v49 = vpop.eup %3586 }
0x24b8   :  { %v2278_v34 = vmul.f32 %v3587_v49, %v2276_v18  ;;  %vm2283_vm1 = vweird.f32 %v3587_v49 }
0x24b9   :  { %vm2284_vm10 = vmor %vm2282_vm9, %vm2283_vm1 }
0x24ba   :  { %v2279_v25 = vsub.f32 1.0, %v2278_v34 }
0x24bc   :  { %v2280_v29 = vmul.f32 %v3587_v49, %v2279_v25  ;;  %v4554_v25 = vmul.f32 %v4516_v19, %v4056_v46 }
0x24be   :  { %v2281_v21 = vadd.f32 %v3587_v49, %v2280_v29 }
0x24c0   :  { %v2285_v20 = vsel %vm2284_vm10, %v3587_v49, %v2281_v21 }
0x24c1   :  { %v2290_v32 = vsel %vm2287_vm11, %v2289_v10, %v2285_v20 }
0x24c2   :  { %v2293_v61 = vmul.f32 %v2290_v32, %v4534_v50 }
0x2507   :  { %v2296_v43 = vpop.permute.xlu2 %2295 }
0x2508   :  { %v2298_v39 = vmul.f32 %v2296_v43, %v2290_v32 }
0x250a   :  { %2300 = vrot.lane.b32.xlu1 %v2298_v39, %s3696_s16 }
0x250f   :  { %v2187_v36 = vpop.permute.xlu2 %2186 }
0x2510   :  { %3321 = vmatmul.msk.bf16.vlgmr.msra.gmra.mxu1 %vm36_vm0, %v2187_v36 }
0x2511   :  { %2462 = vmatpush.bf16.msra.mxu1 %v4463_v59 }
0x257c   :  { %v2301_v12 = vpop.permute.xlu1 %2300 }
0x257d   :  { %v4537_v38 = vadd.f32 %v2301_v12, %v2293_v61 }
0x257f   :  { %3588 = vtanh.f32 %v4537_v38 }
0x2585   :  { %v3589_v51 = vpop.eup %3588 }
0x2586   :  { %2306 = vrot.lane.b32.xlu0 %v3589_v51, %s3697_s17 }
0x258d   :  { %v2200_v62 = vpop.f32.mrf.mxu1 }
0x258e   :  { %v2204_v23 = vadd.f32 %v2200_v62, %v4484_v2 }
0x2590   :  { %3590 = vtanh.f32 %v2204_v23  ;;  %v3322_v35 = vmul.f32 -1.442695, %v2204_v23 }
0x2592   :  { %3592 = vpow2.f32 %v3322_v35 }
0x2595   :  { %v2202_v26 = vpop.f32.mrf.mxu1 }
0x2596   :  { %v3591_v47 = vpop.eup %3590 }
0x2597   :  { %2227 = vrot.lane.b32.xlu2 %v3591_v47, %s3695_s15 }
0x2598   :  { %v3593_v28 = vpop.eup %3592 }
0x2599   :  { %v2208_v42 = vadd.f32 1.0, %v3593_v28 }
0x259b   :  { %3594 = vrcp.f32 %v2208_v42  ;;  %v2220_v4 = vand.u32 2147483648, %v2208_v42  ;;  %vm2214_vm13 = vweird.f32 %v2208_v42  ;;  %v2218_v1 = vand.u32 2147483647, %v2208_v42 }
0x259d   :  { %v2221_v60 = vor.u32 1.1754944e-38, %v2220_v4  ;;  %vm2219_vm15 = vcmp.eq.f32.partialorder %v2218_v1, 8.507059e+37 }
0x25a1   :  { %v3595_v16 = vpop.eup %3594 }
0x25a2   :  { %v2210_v9 = vmul.f32 %v3595_v16, %v2208_v42  ;;  %vm2215_vm12 = vweird.f32 %v3595_v16 }
0x25a3   :  { %vm2216_vm14 = vmor %vm2214_vm13, %vm2215_vm12 }
0x25a4   :  { %v2211_v52 = vsub.f32 1.0, %v2210_v9 }
0x25a6   :  { %v2212_v53 = vmul.f32 %v3595_v16, %v2211_v52 }
0x25a8   :  { %v2213_v27 = vadd.f32 %v3595_v16, %v2212_v53 }
0x25aa   :  { %v2217_v3 = vsel %vm2216_vm14, %v3595_v16, %v2213_v27 }
0x25ab   :  { %v2222_v11 = vsel %vm2219_vm15, %v2221_v60, %v2217_v3 }
0x25ac   :  { %v2225_v29 = vmul.f32 %v2222_v11, %v4554_v25 }
0x25f1   :  { %v2228_v8 = vpop.permute.xlu2 %2227 }
0x25f2   :  { %v2230_v41 = vmul.f32 %v2228_v8, %v2222_v11 }
0x25f4   :  { %2232 = vrot.lane.b32.xlu0 %v2230_v41, %s3696_s16 }
0x25f8   :  { %v2307_v48 = vpop.permute.xlu0 %2306 }
0x25f9   :  { %v2309_v0 = vmul.f32 %v2307_v48, %v2290_v32 }
0x25fb   :  { %v2310_v14 = vsub.f32 %v2309_v0, %v4508_v7 }
0x25fd   :  { %v2311_v18 = vmul.f32 %v2310_v14, %v4087_v5 }
0x25ff   :  { %v4547_v49 = vadd.f32 %v2311_v18, %v4508_v7 }
0x2601   :  { %v2380_v34 = vpack.c.bf16 %v4547_v49, %v4547_v49 }
0x2603   :  { %2382 = vrot.lane.b32.xlu1 %v2380_v34, %s3696_s16  ;;  %v2313_v34 = vsub.f32 %v4537_v38, %v4534_v50 }
0x2666   :  { %v2233_v21 = vpop.permute.xlu0 %2232 }
0x2667   :  { %v4557_v22 = vadd.f32 %v2233_v21, %v2225_v29  ;;  %v2314_v29 = vmul.f32 %v2313_v34, %v4087_v5 }
0x2669   :  { %3596 = vtanh.f32 %v4557_v22 }
0x266f   :  { %v3597_v13 = vpop.eup %3596 }
0x2670   :  { %2238 = vrot.lane.b32.xlu2 %v3597_v13, %s3697_s17  ;;  %v4583_v13 = vadd.f32 %v2314_v29, %v4534_v50 }
0x2675   :  { %v2383_v7 = vpop.permute.xlu1 %2382 }
0x2676   :  { %3327 = vmatmul.msk.bf16.vlgmr.msrb.gmra.mxu0 %vm36_vm0, %v2383_v7 }
0x2677   :  { %2790 = vmatpush.bf16.msrb.mxu0 %v4439_v24 }
0x26ca   :  { %v2239_v20 = vpop.permute.xlu2 %2238 }
0x26cb   :  { %v2241_v10 = vmul.f32 %v2239_v20, %v2222_v11 }
0x26cd   :  { %v2242_v19 = vsub.f32 %v2241_v10, %v4524_v17 }
0x26cf   :  { %v2243_v43 = vmul.f32 %v2242_v19, %v4119_v58 }
0x26d1   :  { %v4567_v39 = vadd.f32 %v2243_v43, %v4524_v17 }
0x26d3   :  { %v2316_v36 = vpack.c.bf16 %v4567_v39, %v4567_v39 }
0x26f3   :  { %v2396_v32 = vpop.f32.mrf.mxu0 }
0x26f4   :  { %2401 = vrot.lane.b32.xlu1 %v2396_v32, %s3699_s9 }
0x26fb   :  { %v2398_v61 = vpop.f32.mrf.mxu0 }
0x26fc   :  { %2318 = vrot.lane.b32.xlu1 %v2316_v36, %s3698_s30 }
0x2766   :  { %v2402_v12 = vpop.permute.xlu1 %2401 }
0x2767   :  { %v2404_v51 = vadd.f32 %v2402_v12, %v4492_v31 }
0x2769   :  { %3598 = vtanh.f32 %v2404_v51  ;;  %v3328_v17 = vmul.f32 -1.442695, %v2404_v51 }
0x276b   :  { %3600 = vpow2.f32 %v3328_v17 }
0x276e   :  { %v2319_v62 = vpop.permute.xlu1 %2318 }
0x276f   :  { %v3599_v23 = vpop.eup %3598  ;;  %3325 = vmatmul.msk.bf16.vlgmr.msrb.gmra.mxu1 %vm36_vm0, %v2319_v62 }
0x2770   :  { %2427 = vrot.lane.b32.xlu0 %v3599_v23, %s3695_s15  ;;  %2726 = vmatpush.bf16.msrb.mxu1 %v4463_v59 }
0x2771   :  { %v3601_v26 = vpop.eup %3600 }
0x2772   :  { %v2408_v47 = vadd.f32 1.0, %v3601_v26  ;;  %v2245_v26 = vsub.f32 %v4557_v22, %v4554_v25 }
0x2774   :  { %3602 = vrcp.f32 %v2408_v47  ;;  %v2420_v52 = vand.u32 2147483648, %v2408_v47  ;;  %vm2414_vm3 = vweird.f32 %v2408_v47  ;;  %v2418_v53 = vand.u32 2147483647, %v2408_v47 }
0x2776   :  { %v2421_v4 = vor.u32 1.1754944e-38, %v2420_v52  ;;  %vm2419_vm5 = vcmp.eq.f32.partialorder %v2418_v53, 8.507059e+37 }
0x277a   :  { %v3603_v35 = vpop.eup %3602 }
0x277b   :  { %v2410_v28 = vmul.f32 %v3603_v35, %v2408_v47  ;;  %vm2415_vm2 = vweird.f32 %v3603_v35 }
0x277c   :  { %vm2416_vm4 = vmor %vm2414_vm3, %vm2415_vm2 }
0x277d   :  { %v2411_v42 = vsub.f32 1.0, %v2410_v28  ;;  %v2246_v28 = vmul.f32 %v2245_v26, %v4119_v58 }
0x277f   :  { %v2412_v16 = vmul.f32 %v3603_v35, %v2411_v42 }
0x2781   :  { %v2413_v9 = vadd.f32 %v3603_v35, %v2412_v16 }
0x2783   :  { %v2417_v27 = vsel %vm2416_vm4, %v3603_v35, %v2413_v9  ;;  %v4597_v9 = vadd.f32 %v2246_v28, %v4554_v25 }
0x2784   :  { %v2422_v3 = vsel %vm2419_vm5, %v2421_v4, %v2417_v27 }
0x2785   :  { %v2425_v20 = vmul.f32 %v2422_v3, %v4583_v13 }
0x27e2   :  { %v2428_v1 = vpop.permute.xlu0 %2427 }
0x27e3   :  { %v2430_v60 = vmul.f32 %v2428_v1, %v2422_v3 }
0x27e5   :  { %2432 = vrot.lane.b32.xlu2 %v2430_v60, %s3696_s16 }
0x27ec   :  { %v2332_v8 = vpop.f32.mrf.mxu1 }
0x27ed   :  { %v2336_v11 = vadd.f32 %v2332_v8, %v4486_v15 }
0x27ef   :  { %3604 = vtanh.f32 %v2336_v11  ;;  %v3326_v0 = vmul.f32 -1.442695, %v2336_v11 }
0x27f1   :  { %3606 = vpow2.f32 %v3326_v0 }
0x27f4   :  { %v2334_v41 = vpop.f32.mrf.mxu1 }
0x27f5   :  { %v3605_v48 = vpop.eup %3604 }
0x27f6   :  { %2359 = vrot.lane.b32.xlu2 %v3605_v48, %s3695_s15 }
0x27f7   :  { %v3607_v14 = vpop.eup %3606 }
0x27f8   :  { %v2340_v18 = vadd.f32 1.0, %v3607_v14 }
0x27fa   :  { %3608 = vrcp.f32 %v2340_v18  ;;  %v2352_v61 = vand.u32 2147483648, %v2340_v18  ;;  %vm2346_vm7 = vweird.f32 %v2340_v18  ;;  %v2350_v12 = vand.u32 2147483647, %v2340_v18 }
0x27fc   :  { %v2353_v51 = vor.u32 1.1754944e-38, %v2352_v61  ;;  %vm2351_vm1 = vcmp.eq.f32.partialorder %v2350_v12, 8.507059e+37 }
0x2800   :  { %v3609_v21 = vpop.eup %3608 }
0x2801   :  { %v2342_v7 = vmul.f32 %v3609_v21, %v2340_v18  ;;  %vm2347_vm6 = vweird.f32 %v3609_v21 }
0x2802   :  { %vm2348_vm8 = vmor %vm2346_vm7, %vm2347_vm6 }
0x2803   :  { %v2343_v43 = vsub.f32 1.0, %v2342_v7 }
0x2805   :  { %v2344_v32 = vmul.f32 %v3609_v21, %v2343_v43 }
0x2807   :  { %v2345_v38 = vadd.f32 %v3609_v21, %v2344_v32 }
0x2809   :  { %v2349_v50 = vsel %vm2348_vm8, %v3609_v21, %v2345_v38 }
0x280a   :  { %v2354_v23 = vsel %vm2351_vm1, %v2353_v51, %v2349_v50 }
0x280b   :  { %v2357_v53 = vmul.f32 %v2354_v23, %v4597_v9 }
0x283f   :  { %v2433_v10 = vpop.permute.xlu2 %2432 }
0x2840   :  { %v4586_v19 = vadd.f32 %v2433_v10, %v2425_v20 }
0x2842   :  { %3610 = vtanh.f32 %v4586_v19 }
0x2848   :  { %v3611_v36 = vpop.eup %3610 }
0x2849   :  { %2438 = vrot.lane.b32.xlu0 %v3611_v36, %s3697_s17 }
0x2850   :  { %v2360_v62 = vpop.permute.xlu2 %2359 }
0x2851   :  { %v2362_v17 = vmul.f32 %v2360_v62, %v2354_v23 }
0x2853   :  { %2364 = vrot.lane.b32.xlu0 %v2362_v17, %s3696_s16 }
0x28bb   :  { %v2439_v47 = vpop.permute.xlu0 %2438 }
0x28bc   :  { %v2441_v35 = vmul.f32 %v2439_v47, %v2422_v3 }
0x28be   :  { %v2442_v42 = vsub.f32 %v2441_v35, %v4547_v49 }
0x28c0   :  { %v2443_v16 = vmul.f32 %v2442_v42, %v4148_v45  ;;  %v2445_v42 = vsub.f32 %v4586_v19, %v4583_v13 }
0x28c2   :  { %v4600_v52 = vadd.f32 %v2443_v16, %v4547_v49 }
0x28c4   :  { %v2512_v27 = vpack.c.bf16 %v4600_v52, %v4600_v52 }
0x28c5   :  { %v2365_v22 = vpop.permute.xlu0 %2364 }
0x28c6   :  { %v4605_v4 = vadd.f32 %v2365_v22, %v2357_v53  ;;  %2514 = vrot.lane.b32.xlu1 %v2512_v27, %s3696_s16  ;;  %v2446_v53 = vmul.f32 %v2445_v42, %v4148_v45 }
0x28c8   :  { %3612 = vtanh.f32 %v4605_v4  ;;  %v4632_v22 = vadd.f32 %v2446_v53, %v4583_v13 }
0x28ce   :  { %v3613_v1 = vpop.eup %3612 }
0x28cf   :  { %2370 = vrot.lane.b32.xlu1 %v3613_v1, %s3697_s17 }
0x2938   :  { %v2515_v25 = vpop.permute.xlu1 %2514 }
0x2939   :  { %3331 = vmatmul.msk.bf16.vlgmr.msra.gmra.mxu0 %vm36_vm0, %v2515_v25 }
0x293a   :  { %3051 = vmatpush.bf16.msra.mxu0 %v4439_v24 }
0x2941   :  { %v2371_v49 = vpop.permute.xlu1 %2370 }
0x2942   :  { %v2373_v3 = vmul.f32 %v2371_v49, %v2354_v23 }
0x2944   :  { %v2374_v60 = vsub.f32 %v2373_v3, %v4567_v39 }
0x2946   :  { %v2375_v8 = vmul.f32 %v2374_v60, %v4176_v44 }
0x2948   :  { %v4615_v11 = vadd.f32 %v2375_v8, %v4567_v39 }
0x294a   :  { %v2448_v41 = vpack.c.bf16 %v4615_v11, %v4615_v11 }
0x294c   :  { %2450 = vrot.lane.b32.xlu0 %v2448_v41, %s3698_s30 }
0x29b6   :  { %v2528_v48 = vpop.f32.mrf.mxu0 }
0x29b7   :  { %2533 = vrot.lane.b32.xlu2 %v2528_v48, %s3699_s9 }
0x29be   :  { %v2451_v0 = vpop.permute.xlu0 %2450  ;;  %v2530_v14 = vpop.f32.mrf.mxu0 }
0x29bf   :  { %3329 = vmatmul.msk.bf16.vlgmr.msra.gmra.mxu1 %vm36_vm0, %v2451_v0 }
0x29c0   :  { %2990 = vmatpush.bf16.msra.mxu1 %v4463_v59 }
0x2a11   :  { %v2534_v24 = vpop.permute.xlu2 %2533 }
0x2a12   :  { %v2536_v18 = vadd.f32 %v2534_v24, %v4490_v40 }
0x2a14   :  { %3614 = vtanh.f32 %v2536_v18  ;;  %v3332_v21 = vmul.f32 -1.442695, %v2536_v18 }
0x2a16   :  { %3616 = vpow2.f32 %v3332_v21 }
0x2a1a   :  { %v3615_v39 = vpop.eup %3614 }
0x2a1b   :  { %2559 = vrot.lane.b32.xlu1 %v3615_v39, %s3695_s15  ;;  %v2377_v39 = vsub.f32 %v4605_v4, %v4597_v9 }
0x2a1c   :  { %v3617_v7 = vpop.eup %3616 }
0x2a1d   :  { %v2540_v20 = vadd.f32 1.0, %v3617_v7 }
0x2a1f   :  { %3618 = vrcp.f32 %v2540_v20  ;;  %v2552_v59 = vand.u32 2147483648, %v2540_v20  ;;  %vm2546_vm10 = vweird.f32 %v2540_v20  ;;  %v2550_v61 = vand.u32 2147483647, %v2540_v20 }
0x2a21   :  { %v2553_v50 = vor.u32 1.1754944e-38, %v2552_v59  ;;  %vm2551_vm12 = vcmp.eq.f32.partialorder %v2550_v61, 8.507059e+37 }
0x2a25   :  { %v3619_v10 = vpop.eup %3618 }
0x2a26   :  { %v2542_v43 = vmul.f32 %v3619_v10, %v2540_v20  ;;  %vm2547_vm9 = vweird.f32 %v3619_v10 }
0x2a27   :  { %vm2548_vm11 = vmor %vm2546_vm10, %vm2547_vm9 }
0x2a28   :  { %v2543_v32 = vsub.f32 1.0, %v2542_v43 }
0x2a2a   :  { %v2544_v36 = vmul.f32 %v3619_v10, %v2543_v32 }
0x2a2c   :  { %v2545_v38 = vadd.f32 %v3619_v10, %v2544_v36 }
0x2a2e   :  { %v2549_v12 = vsel %vm2548_vm11, %v3619_v10, %v2545_v38 }
0x2a2f   :  { %v2554_v23 = vsel %vm2551_vm12, %v2553_v50, %v2549_v12 }
0x2a30   :  { %v2557_v1 = vmul.f32 %v2554_v23, %v4632_v22 }
0x2a3c   :  { %v2464_v34 = vpop.f32.mrf.mxu1 }
0x2a3d   :  { %v2468_v51 = vadd.f32 %v2464_v34, %v4488_v63 }
0x2a3f   :  { %3620 = vtanh.f32 %v2468_v51  ;;  %v3330_v47 = vmul.f32 -1.442695, %v2468_v51 }
0x2a41   :  { %3622 = vpow2.f32 %v3330_v47 }
0x2a44   :  { %v2466_v29 = vpop.f32.mrf.mxu1 }
0x2a45   :  { %v3621_v26 = vpop.eup %3620  ;;  %v2378_v29 = vmul.f32 %v2377_v39, %v4176_v44 }
0x2a47   :  { %v3623_v35 = vpop.eup %3622  ;;  %v4645_v20 = vadd.f32 %v2378_v29, %v4597_v9 }
0x2a48   :  { %v2472_v28 = vadd.f32 1.0, %v3623_v35 }
0x2a4a   :  { %3624 = vrcp.f32 %v2472_v28  ;;  %v2484_v19 = vand.u32 2147483648, %v2472_v28  ;;  %vm2478_vm14 = vweird.f32 %v2472_v28  ;;  %v2482_v48 = vand.u32 2147483647, %v2472_v28 }
0x2a4c   :  { %v2485_v0 = vor.u32 1.1754944e-38, %v2484_v19  ;;  %vm2483_vm2 = vcmp.eq.f32.partialorder %v2482_v48, 8.507059e+37 }
0x2a50   :  { %v3625_v16 = vpop.eup %3624 }
0x2a51   :  { %v2474_v27 = vmul.f32 %v3625_v16, %v2472_v28  ;;  %vm2479_vm13 = vweird.f32 %v3625_v16 }
0x2a52   :  { %vm2480_vm15 = vmor %vm2478_vm14, %vm2479_vm13 }
0x2a53   :  { %v2475_v49 = vsub.f32 1.0, %v2474_v27 }
0x2a55   :  { %v2476_v60 = vmul.f32 %v3625_v16, %v2475_v49 }
0x2a57   :  { %v2477_v8 = vadd.f32 %v3625_v16, %v2476_v60 }
0x2a59   :  { %v2481_v13 = vsel %vm2480_vm15, %v3625_v16, %v2477_v8 }
0x2a5a   :  { %v2486_v24 = vsel %vm2483_vm2, %v2485_v0, %v2481_v13 }
0x2a5b   :  { %v2489_v32 = vmul.f32 %v2486_v24, %v4645_v20 }
0x2a8d   :  { %v2560_v62 = vpop.permute.xlu1 %2559 }
0x2a8e   :  { %v2562_v17 = vmul.f32 %v2560_v62, %v2554_v23 }
0x2a90   :  { %2564 = vrot.lane.b32.xlu2 %v2562_v17, %s3696_s16 }
0x2a98   :  { %2491 = vrot.lane.b32.xlu2 %v3621_v26, %s3695_s15 }
0x2aea   :  { %v2565_v25 = vpop.permute.xlu2 %2564 }
0x2aeb   :  { %v4635_v3 = vadd.f32 %v2565_v25, %v2557_v1 }
0x2aed   :  { %3626 = vtanh.f32 %v4635_v3  ;;  %v2577_v29 = vsub.f32 %v4635_v3, %v4632_v22 }
0x2af2   :  { %v2492_v14 = vpop.permute.xlu2 %2491 }
0x2af3   :  { %v3627_v41 = vpop.eup %3626  ;;  %v2494_v18 = vmul.f32 %v2492_v14, %v2486_v24 }
0x2af4   :  { %2570 = vrot.lane.b32.xlu0 %v3627_v41, %s3697_s17 }
0x2afc   :  { %2496 = vrot.lane.b32.xlu0 %v2494_v18, %s3696_s16 }
0x2b66   :  { %v2571_v34 = vpop.permute.xlu0 %2570 }
0x2b67   :  { %v2573_v21 = vmul.f32 %v2571_v34, %v2554_v23 }
0x2b69   :  { %v2574_v7 = vsub.f32 %v2573_v21, %v4600_v52 }
0x2b6b   :  { %v2575_v10 = vmul.f32 %v2574_v7, %v4210_v54  ;;  %v2578_v7 = vmul.f32 %v2577_v29, %v4210_v54 }
0x2b6d   :  { %v4649_v43 = vadd.f32 %v2575_v10, %v4600_v52 }
0x2b6e   :  { %v2497_v36 = vpop.permute.xlu0 %2496 }
0x2b6f   :  { %v4652_v38 = vadd.f32 %v2497_v36, %v2489_v32  ;;  %v2644_v4 = vpack.c.bf16 %v4649_v43, %v4649_v43  ;;  %v4679_v32 = vadd.f32 %v2578_v7, %v4632_v22 }
0x2b71   :  { %3628 = vtanh.f32 %v4652_v38  ;;  %2646 = vrot.lane.b32.xlu1 %v2644_v4, %s3696_s16 }
0x2b77   :  { %v3629_v59 = vpop.eup %3628 }
0x2b79   :  { %2502 = vrot.lane.b32.xlu1 %v3629_v59, %s3697_s17 }
0x2be3   :  { %v2647_v9 = vpop.permute.xlu1 %2646 }
0x2be4   :  { %3335 = vmatmul.msk.bf16.vlgmr.msrb.gmra.mxu3 %vm36_vm0, %v2647_v9 }
0x2beb   :  { %v2503_v52 = vpop.permute.xlu1 %2502 }
0x2bec   :  { %v2505_v61 = vmul.f32 %v2503_v52, %v2486_v24 }
0x2bee   :  { %v2506_v12 = vsub.f32 %v2505_v61, %v4615_v11 }
0x2bf0   :  { %v2507_v50 = vmul.f32 %v2506_v12, %v4233_v33 }
0x2bf2   :  { %v4663_v51 = vadd.f32 %v2507_v50, %v4615_v11 }
0x2bf4   :  { %v2580_v62 = vpack.c.bf16 %v4663_v51, %v4663_v51 }
0x2bf6   :  { %2582 = vrot.lane.b32.xlu2 %v2580_v62, %s3698_s30 }
0x2c50   :  { %v2583_v23 = vpop.permute.xlu2 %2582 }
0x2c51   :  { %3333 = vmatmul.msk.bf16.vlgmr.msra.gmra.mxu2 %vm36_vm0, %v2583_v23 }
0x2c67   :  { %v2660_v17 = vpop.f32.mrf.mxu3 }
0x2c68   :  { %2665 = vrot.lane.b32.xlu0 %v2660_v17, %s3699_s9 }
0x2c6f   :  { %v2662_v26 = vpop.f32.mrf.mxu3 }
0x2cd4   :  { %v2596_v47 = vpop.f32.mrf.mxu2 }
0x2cd5   :  { %v2600_v11 = vadd.f32 %v2596_v47, %v4490_v40  ;;  %v2509_v47 = vsub.f32 %v4652_v38, %v4645_v20 }
0x2cd7   :  { %v3334_v18 = vmul.f32 -1.442695, %v2600_v11 }
0x2cda   :  { %v2666_v35 = vpop.permute.xlu0 %2665 }
0x2cdb   :  { %v2668_v28 = vadd.f32 %v2666_v35, %v4488_v63 }
0x2cdc   :  { %v2598_v42 = vpop.f32.mrf.mxu2 }
0x2cdd   :  { %3630 = vtanh.f32 %v2668_v28  ;;  %v3336_v27 = vmul.f32 -1.442695, %v2668_v28  ;;  %v2510_v28 = vmul.f32 %v2509_v47, %v4233_v33 }
0x2cde   :  { %3632 = vtanh.f32 %v2600_v11 }
0x2cdf   :  { %3634 = vpow2.f32 %v3336_v27 }
0x2ce3   :  { %v3631_v16 = vpop.eup %3630 }
0x2ce4   :  { %2691 = vrot.lane.b32.xlu1 %v3631_v16, %s3695_s15  ;;  %v3633_v53 = vpop.eup %3632  ;;  %v4692_v16 = vadd.f32 %v2510_v28, %v4645_v20 }
0x2ce5   :  { %v3635_v1 = vpop.eup %3634 }
0x2ce6   :  { %v2672_v25 = vadd.f32 1.0, %v3635_v1 }
0x2ce8   :  { %3636 = vrcp.f32 %v2672_v25  ;;  %v2684_v19 = vand.u32 2147483648, %v2672_v25  ;;  %vm2678_vm4 = vweird.f32 %v2672_v25  ;;  %v2682_v40 = vand.u32 2147483647, %v2672_v25 }
0x2ce9   :  { %3638 = vpow2.f32 %v3334_v18 }
0x2cea   :  { %v2685_v13 = vor.u32 1.1754944e-38, %v2684_v19  ;;  %vm2683_vm6 = vcmp.eq.f32.partialorder %v2682_v40, 8.507059e+37 }
0x2cec   :  { %2623 = vrot.lane.b32.xlu1 %v3633_v53, %s3695_s15 }
0x2cee   :  { %v3637_v49 = vpop.eup %3636 }
0x2cef   :  { %v2674_v60 = vmul.f32 %v3637_v49, %v2672_v25  ;;  %vm2679_vm3 = vweird.f32 %v3637_v49  ;;  %v3639_v39 = vpop.eup %3638 }
0x2cf0   :  { %vm2680_vm5 = vmor %vm2678_vm4, %vm2679_vm3  ;;  %v2604_v34 = vadd.f32 1.0, %v3639_v39 }
0x2cf1   :  { %v2675_v8 = vsub.f32 1.0, %v2674_v60 }
0x2cf2   :  { %3640 = vrcp.f32 %v2604_v34  ;;  %v2616_v3 = vand.u32 2147483648, %v2604_v34  ;;  %vm2610_vm8 = vweird.f32 %v2604_v34  ;;  %v2614_v50 = vand.u32 2147483647, %v2604_v34 }
0x2cf3   :  { %v2676_v63 = vmul.f32 %v3637_v49, %v2675_v8 }
0x2cf4   :  { %v2617_v62 = vor.u32 1.1754944e-38, %v2616_v3  ;;  %vm2615_vm9 = vcmp.eq.f32.partialorder %v2614_v50, 8.507059e+37 }
0x2cf5   :  { %v2677_v41 = vadd.f32 %v3637_v49, %v2676_v63 }
0x2cf7   :  { %v2681_v48 = vsel %vm2680_vm5, %v3637_v49, %v2677_v41 }
0x2cf8   :  { %v2686_v14 = vsel %vm2683_vm6, %v2685_v13, %v2681_v48  ;;  %v3641_v21 = vpop.eup %3640 }
0x2cf9   :  { %v2606_v10 = vmul.f32 %v3641_v21, %v2604_v34  ;;  %v2689_v36 = vmul.f32 %v2686_v14, %v4679_v32  ;;  %vm2611_vm7 = vweird.f32 %v3641_v21 }
0x2cfa   :  { %vm2612_vm1 = vmor %vm2610_vm8, %vm2611_vm7 }
0x2cfb   :  { %v2607_v4 = vsub.f32 1.0, %v2606_v10 }
0x2cfd   :  { %v2608_v52 = vmul.f32 %v3641_v21, %v2607_v4 }
0x2cff   :  { %v2609_v61 = vadd.f32 %v3641_v21, %v2608_v52 }
0x2d01   :  { %v2613_v22 = vsel %vm2612_vm1, %v3641_v21, %v2609_v61 }
0x2d02   :  { %v2618_v17 = vsel %vm2615_vm9, %v2617_v62, %v2613_v22 }
0x2d03   :  { %v2621_v1 = vmul.f32 %v2618_v17, %v4692_v16 }
0x2d56   :  { %v2692_v0 = vpop.permute.xlu1 %2691 }
0x2d57   :  { %v2694_v24 = vmul.f32 %v2692_v0, %v2686_v14 }
0x2d59   :  { %2696 = vrot.lane.b32.xlu2 %v2694_v24, %s3696_s16 }
0x2d5e   :  { %v2624_v23 = vpop.permute.xlu1 %2623 }
0x2d5f   :  { %v2626_v26 = vmul.f32 %v2624_v23, %v2618_v17 }
0x2db3   :  { %v2697_v59 = vpop.permute.xlu2 %2696 }
0x2db4   :  { %v4682_v9 = vadd.f32 %v2697_v59, %v2689_v36 }
0x2db6   :  { %3642 = vtanh.f32 %v4682_v9 }
0x2dbc   :  { %v3643_v12 = vpop.eup %3642 }
0x2dbd   :  { %2702 = vrot.lane.b32.xlu0 %v3643_v12, %s3697_s17 }
0x2dc5   :  { %2628 = vrot.lane.b32.xlu0 %v2626_v26, %s3696_s16 }
0x2e2f   :  { %v2703_v35 = vpop.permute.xlu0 %2702 }
0x2e30   :  { %v2705_v42 = vmul.f32 %v2703_v35, %v2686_v14 }
0x2e32   :  { %v2706_v11 = vsub.f32 %v2705_v42, %v4649_v43 }
0x2e34   :  { %v2707_v53 = vmul.f32 %v2706_v11, %v4233_v33 }
0x2e36   :  { %v4696_v27 = vadd.f32 %v2707_v53, %v4649_v43 }
0x2e37   :  { %v2629_v25 = vpop.permute.xlu0 %2628 }
0x2e38   :  { %v4699_v49 = vadd.f32 %v2629_v25, %v2621_v1  ;;  %v2776_v38 = vpack.c.bf16 %v4696_v27, %v4696_v27 }
0x2e3a   :  { %3644 = vtanh.f32 %v4699_v49  ;;  %2778 = vrot.lane.b32.xlu2 %v2776_v38, %s3696_s16 }
0x2e40   :  { %v3645_v60 = vpop.eup %3644 }
0x2e41   :  { %2634 = vrot.lane.b32.xlu1 %v3645_v60, %s3697_s17 }
0x2e94   :  { %v2779_v20 = vpop.permute.xlu2 %2778 }
0x2e95   :  { %3339 = vmatmul.msk.bf16.vlgmr.msrb.gmra.mxu0 %vm36_vm0, %v2779_v20 }
0x2eb3   :  { %v2635_v43 = vpop.permute.xlu1 %2634 }
0x2eb4   :  { %v2637_v8 = vmul.f32 %v2635_v43, %v2618_v17 }
0x2eb6   :  { %v2638_v63 = vsub.f32 %v2637_v8, %v4663_v51  ;;  %v2709_v8 = vsub.f32 %v4682_v9, %v4679_v32 }
0x2eb8   :  { %v2639_v41 = vmul.f32 %v2638_v63, %v4210_v54  ;;  %v2710_v63 = vmul.f32 %v2709_v8, %v4233_v33 }
0x2eba   :  { %v4710_v19 = vadd.f32 %v2639_v41, %v4663_v51  ;;  %v4727_v41 = vadd.f32 %v2710_v63, %v4679_v32 }
0x2ebc   :  { %v2712_v40 = vpack.c.bf16 %v4710_v19, %v4710_v19 }
0x2ebe   :  { %2714 = vrot.lane.b32.xlu2 %v2712_v40, %s3698_s30 }
0x2f12   :  { %v2792_v48 = vpop.f32.mrf.mxu0 }
0x2f13   :  { %2797 = vrot.lane.b32.xlu0 %v2792_v48, %s3699_s9 }
0x2f18   :  { %v2715_v13 = vpop.permute.xlu2 %2714 }
0x2f19   :  { %3337 = vmatmul.msk.bf16.vlgmr.msrb.gmra.mxu1 %vm36_vm0, %v2715_v13 }
0x2f1a   :  { %v2794_v0 = vpop.f32.mrf.mxu0 }
0x2f1b   :  { %v2641_v0 = vsub.f32 %v4699_v49, %v4692_v16 }
0x2f85   :  { %v2798_v14 = vpop.permute.xlu0 %2797 }
0x2f86   :  { %v2800_v24 = vadd.f32 %v2798_v14, %v4486_v15 }
0x2f88   :  { %3646 = vtanh.f32 %v2800_v24  ;;  %v3340_v21 = vmul.f32 -1.442695, %v2800_v24  ;;  %v2642_v24 = vmul.f32 %v2641_v0, %v4210_v54 }
0x2f8a   :  { %v4738_v33 = vadd.f32 %v2642_v24, %v4692_v16 }
0x2f8e   :  { %v3647_v18 = vpop.eup %3646 }
0x2f8f   :  { %2823 = vrot.lane.b32.xlu1 %v3647_v18, %s3695_s15 }
0x2f96   :  { %v2728_v51 = vpop.f32.mrf.mxu1 }
0x2f97   :  { %v2732_v39 = vadd.f32 %v2728_v51, %v4492_v31 }
0x2f99   :  { %3648 = vtanh.f32 %v2732_v39  ;;  %v3338_v36 = vmul.f32 -1.442695, %v2732_v39 }
0x2f9a   :  { %3650 = vpow2.f32 %v3340_v21 }
0x2f9e   :  { %v2730_v34 = vpop.f32.mrf.mxu1 }
0x2f9f   :  { %v3649_v29 = vpop.eup %3648 }
0x2fa0   :  { %2755 = vrot.lane.b32.xlu0 %v3649_v29, %s3695_s15  ;;  %v3651_v7 = vpop.eup %3650 }
0x2fa1   :  { %v2804_v10 = vadd.f32 1.0, %v3651_v7 }
0x2fa3   :  { %3652 = vrcp.f32 %v2804_v10  ;;  %v2816_v3 = vand.u32 2147483648, %v2804_v10  ;;  %vm2810_vm11 = vweird.f32 %v2804_v10  ;;  %v2814_v22 = vand.u32 2147483647, %v2804_v10 }
0x2fa4   :  { %3654 = vpow2.f32 %v3338_v36 }
0x2fa5   :  { %v2817_v23 = vor.u32 1.1754944e-38, %v2816_v3  ;;  %vm2815_vm13 = vcmp.eq.f32.partialorder %v2814_v22, 8.507059e+37 }
0x2fa9   :  { %v3653_v15 = vpop.eup %3652 }
0x2faa   :  { %v2806_v4 = vmul.f32 %v3653_v15, %v2804_v10  ;;  %v3655_v59 = vpop.eup %3654  ;;  %vm2811_vm10 = vweird.f32 %v3653_v15 }
0x2fab   :  { %v2736_v52 = vadd.f32 1.0, %v3655_v59  ;;  %vm2812_vm12 = vmor %vm2810_vm11, %vm2811_vm10 }
0x2fac   :  { %v2807_v61 = vsub.f32 1.0, %v2806_v4 }
0x2fad   :  { %3656 = vrcp.f32 %v2736_v52  ;;  %v2748_v53 = vand.u32 2147483648, %v2736_v52  ;;  %vm2742_vm15 = vweird.f32 %v2736_v52  ;;  %v2746_v1 = vand.u32 2147483647, %v2736_v52 }
0x2fae   :  { %v2808_v12 = vmul.f32 %v3653_v15, %v2807_v61 }
0x2faf   :  { %v2749_v38 = vor.u32 1.1754944e-38, %v2748_v53  ;;  %vm2747_vm3 = vcmp.eq.f32.partialorder %v2746_v1, 8.507059e+37 }
0x2fb0   :  { %v2809_v31 = vadd.f32 %v3653_v15, %v2808_v12 }
0x2fb2   :  { %v2813_v62 = vsel %vm2812_vm12, %v3653_v15, %v2809_v31 }
0x2fb3   :  { %v3657_v50 = vpop.eup %3656  ;;  %v2818_v47 = vsel %vm2815_vm13, %v2817_v23, %v2813_v62 }
0x2fb4   :  { %v2738_v17 = vmul.f32 %v3657_v50, %v2736_v52  ;;  %vm2743_vm14 = vweird.f32 %v3657_v50  ;;  %v2821_v40 = vmul.f32 %v2818_v47, %v4727_v41 }
0x2fb5   :  { %vm2744_vm2 = vmor %vm2742_vm15, %vm2743_vm14 }
0x2fb6   :  { %v2739_v28 = vsub.f32 1.0, %v2738_v17 }
0x2fb8   :  { %v2740_v42 = vmul.f32 %v3657_v50, %v2739_v28 }
0x2fba   :  { %v2741_v11 = vadd.f32 %v3657_v50, %v2740_v42 }
0x2fbc   :  { %v2745_v25 = vsel %vm2744_vm2, %v3657_v50, %v2741_v11 }
0x2fbd   :  { %v2750_v60 = vsel %vm2747_vm3, %v2749_v38, %v2745_v25 }
0x2fbe   :  { %v2753_v32 = vmul.f32 %v2750_v60, %v4738_v33 }
0x3001   :  { %v2824_v26 = vpop.permute.xlu1 %2823 }
0x3002   :  { %v2826_v35 = vmul.f32 %v2824_v26, %v2818_v47 }
0x3004   :  { %2828 = vrot.lane.b32.xlu2 %v2826_v35, %s3696_s16 }
0x3012   :  { %v2756_v20 = vpop.permute.xlu0 %2755 }
0x3013   :  { %v2758_v43 = vmul.f32 %v2756_v20, %v2750_v60 }
0x3015   :  { %2760 = vrot.lane.b32.xlu2 %v2758_v43, %s3696_s16 }
0x305e   :  { %v2829_v48 = vpop.permute.xlu2 %2828 }
0x305f   :  { %v4730_v13 = vadd.f32 %v2829_v48, %v2821_v40 }
0x3061   :  { %3658 = vtanh.f32 %v4730_v13 }
0x3067   :  { %v3659_v14 = vpop.eup %3658 }
0x3068   :  { %2834 = vrot.lane.b32.xlu1 %v3659_v14, %s3697_s17 }
0x306f   :  { %v2761_v9 = vpop.permute.xlu2 %2760 }
0x3070   :  { %v4741_v18 = vadd.f32 %v2761_v9, %v2753_v32 }
0x3072   :  { %3660 = vtanh.f32 %v4741_v18  ;;  %v2773_v9 = vsub.f32 %v4741_v18, %v4738_v33 }
0x3078   :  { %v3661_v51 = vpop.eup %3660 }
0x3079   :  { %2766 = vrot.lane.b32.xlu1 %v3661_v51, %s3697_s17 }
0x30da   :  { %v2835_v39 = vpop.permute.xlu1 %2834 }
0x30db   :  { %v2837_v49 = vmul.f32 %v2835_v39, %v2818_v47 }
0x30dd   :  { %v2838_v34 = vsub.f32 %v2837_v49, %v4696_v27 }
0x30df   :  { %v2839_v54 = vmul.f32 %v2838_v34, %v4176_v44 }
0x30e1   :  { %v4748_v29 = vadd.f32 %v2839_v54, %v4696_v27  ;;  %v2774_v54 = vmul.f32 %v2773_v9, %v4148_v45 }
0x30e3   :  { %v2908_v16 = vpack.c.bf16 %v4748_v29, %v4748_v29 }
0x30e5   :  { %2910 = vrot.lane.b32.xlu0 %v2908_v16, %s3696_s16 }
0x30eb   :  { %v2767_v21 = vpop.permute.xlu1 %2766 }
0x30ec   :  { %v2769_v7 = vmul.f32 %v2767_v21, %v2750_v60  ;;  %v4774_v21 = vadd.f32 %v2774_v54, %v4738_v33 }
0x30ee   :  { %v2770_v10 = vsub.f32 %v2769_v7, %v4710_v19 }
0x30f0   :  { %v2771_v36 = vmul.f32 %v2770_v10, %v4148_v45 }
0x30f2   :  { %v4756_v15 = vadd.f32 %v2771_v36, %v4710_v19 }
0x30f4   :  { %v2844_v4 = vpack.c.bf16 %v4756_v15, %v4756_v15 }
0x30f6   :  { %2846 = vrot.lane.b32.xlu2 %v2844_v4, %s3698_s30  ;;  %v2841_v4 = vsub.f32 %v4730_v13, %v4727_v41 }
0x30f8   :  { %v2842_v45 = vmul.f32 %v2841_v4, %v4176_v44 }
0x3150   :  { %v2847_v27 = vpop.permute.xlu2 %2846 }
0x3151   :  { %3341 = vmatmul.msk.bf16.vlgmr.msrb.gmra.mxu2 %vm36_vm0, %v2847_v27  ;;  %v4785_v27 = vadd.f32 %v2842_v45, %v4727_v41 }
0x3157   :  { %v2911_v59 = vpop.permute.xlu0 %2910 }
0x3158   :  { %3343 = vmatmul.msk.bf16.vlgmr.msra.gmra.mxu3 %vm36_vm0, %v2911_v59 }
0x31d4   :  { %v2860_v52 = vpop.f32.mrf.mxu2 }
0x31d5   :  { %v2864_v61 = vadd.f32 %v2860_v52, %v4494_v57 }
0x31d7   :  { %3662 = vtanh.f32 %v2864_v61  ;;  %v3342_v50 = vmul.f32 -1.442695, %v2864_v61 }
0x31d9   :  { %3664 = vpow2.f32 %v3342_v50  ;;  %v3167_v50 = vld [vmem:[%s4885_s0 + $0x1b0] sm:$0xff] }
0x31db   :  { %v2924_v12 = vpop.f32.mrf.mxu3 }
0x31dc   :  { %v2862_v31 = vpop.f32.mrf.mxu2  ;;  %2929 = vrot.lane.b32.xlu0 %v2924_v12, %s3699_s9 }
0x31dd   :  { %v3663_v19 = vpop.eup %3662 }
0x31de   :  { %2887 = vrot.lane.b32.xlu2 %v3663_v19, %s3695_s15 }
0x31df   :  { %v3665_v22 = vpop.eup %3664 }
0x31e0   :  { %v2868_v62 = vadd.f32 1.0, %v3665_v22 }
0x31e2   :  { %3666 = vrcp.f32 %v2868_v62  ;;  %v2880_v11 = vand.u32 2147483648, %v2868_v62  ;;  %vm2874_vm5 = vweird.f32 %v2868_v62  ;;  %v2878_v53 = vand.u32 2147483647, %v2868_v62 }
0x31e3   :  { %v2926_v3 = vpop.f32.mrf.mxu3 }
0x31e4   :  { %v2881_v38 = vor.u32 1.1754944e-38, %v2880_v11  ;;  %vm2879_vm7 = vcmp.eq.f32.partialorder %v2878_v53, 8.507059e+37  ;;  %v3168_v3 = vld [vmem:[%s4885_s0 + $0x1b8] sm:$0xff] }
0x31e5   :  { %3188 = vmatpush.msrb.mxu1 %v3168_v3 }
0x31e7   :  { %3189 = vmatpush.msrb.mxu1 %v3167_v50 }
0x31e8   :  { %v3667_v23 = vpop.eup %3666 }
0x31e9   :  { %v2870_v17 = vmul.f32 %v3667_v23, %v2868_v62  ;;  %vm2875_vm4 = vweird.f32 %v3667_v23 }
0x31ea   :  { %vm2876_vm6 = vmor %vm2874_vm5, %vm2875_vm4  ;;  %vm3244_vm5 = vcmask 15360  }
0x31eb   :  { %v2871_v26 = vsub.f32 1.0, %v2870_v17 }
0x31ed   :  { %v2872_v35 = vmul.f32 %v3667_v23, %v2871_v26 }
0x31ef   :  { %v2873_v28 = vadd.f32 %v3667_v23, %v2872_v35 }
0x31f1   :  { %v2877_v1 = vsel %vm2876_vm6, %v3667_v23, %v2873_v28  ;;  %v3165_v28 = vld [vmem:[%s4885_s0 + $0x1a0] sm:$0xff] }
0x31f2   :  { %v2882_v60 = vsel %vm2879_vm7, %v2881_v38, %v2877_v1 }
0x31f3   :  { %v2885_v7 = vmul.f32 %v2882_v60, %v4774_v21 }
0x3238   :  { %v2888_v25 = vpop.permute.xlu2 %2887 }
0x3239   :  { %v2890_v20 = vmul.f32 %v2888_v25, %v2882_v60 }
0x324e   :  { %v2930_v47 = vpop.permute.xlu0 %2929 }
0x324f   :  { %v2932_v57 = vadd.f32 %v2930_v47, %v4484_v2 }
0x3251   :  { %3668 = vtanh.f32 %v2932_v57  ;;  %v3344_v2 = vmul.f32 -1.442695, %v2932_v57  ;;  %v3370_v57 = vld [vmem:[%s4885_s0 + $0x98] ss:$0 sm:$0xff] }
0x3252   :  { %v752_v35 = vadd.f32 %v3370_v57, %v4096_v37  ;;  %v3104_v57 = vld [vmem:[%s4885_s0 + $0x188] sm:$0xff] }
0x3253   :  { %3670 = vpow2.f32 %v3344_v2 }
0x3257   :  { %v3669_v42 = vpop.eup %3668 }
0x3258   :  { %2955 = vrot.lane.b32.xlu1 %v3669_v42, %s3695_s15 }
0x3259   :  { %v3671_v43 = vpop.eup %3670 }
0x325a   :  { %v2936_v8 = vadd.f32 1.0, %v3671_v43 }
0x325c   :  { %3672 = vrcp.f32 %v2936_v8  ;;  %v2948_v24 = vand.u32 2147483648, %v2936_v8  ;;  %vm2942_vm1 = vweird.f32 %v2936_v8  ;;  %v2946_v32 = vand.u32 2147483647, %v2936_v8 }
0x325e   :  { %v2949_v39 = vor.u32 1.1754944e-38, %v2948_v24  ;;  %vm2947_vm10 = vcmp.eq.f32.partialorder %v2946_v32, 8.507059e+37 }
0x3260   :  { %2892 = vrot.lane.b32.xlu1 %v2890_v20, %s3696_s16 }
0x3262   :  { %v3673_v63 = vpop.eup %3672 }
0x3263   :  { %v2938_v40 = vmul.f32 %v3673_v63, %v2936_v8  ;;  %vm2943_vm8 = vweird.f32 %v3673_v63 }
0x3264   :  { %vm2944_vm9 = vmor %vm2942_vm1, %vm2943_vm8 }
0x3265   :  { %v2939_v48 = vsub.f32 1.0, %v2938_v40 }
0x3267   :  { %v2940_v0 = vmul.f32 %v3673_v63, %v2939_v48 }
0x3269   :  { %v2941_v14 = vadd.f32 %v3673_v63, %v2940_v0 }
0x326b   :  { %v2945_v51 = vsel %vm2944_vm9, %v3673_v63, %v2941_v14 }
0x326c   :  { %v2950_v34 = vsel %vm2947_vm10, %v2949_v39, %v2945_v51 }
0x326d   :  { %v2953_v33 = vmul.f32 %v2950_v34, %v4785_v27 }
0x32ca   :  { %v2956_v49 = vpop.permute.xlu1 %2955 }
0x32cb   :  { %v2958_v16 = vmul.f32 %v2956_v49, %v2950_v34 }
0x32cd   :  { %2960 = vrot.lane.b32.xlu0 %v2958_v16, %s3696_s16 }
0x32d2   :  { %v2893_v10 = vpop.permute.xlu1 %2892 }
0x32d3   :  { %v4777_v36 = vadd.f32 %v2893_v10, %v2885_v7 }
0x32d5   :  { %3674 = vtanh.f32 %v4777_v36  ;;  %v2905_v49 = vsub.f32 %v4777_v36, %v4774_v21 }
0x32d7   :  { %v2906_v54 = vmul.f32 %v2905_v49, %v4087_v5 }
0x32d9   :  { %v2907_v16 = vadd.f32 %v2906_v54, %v4774_v21 }
0x32db   :  { %v3675_v18 = vpop.eup %3674 }
0x32dc   :  { %2898 = vrot.lane.b32.xlu0 %v3675_v18, %s3697_s17 }
0x333f   :  { %v2961_v59 = vpop.permute.xlu0 %2960 }
0x3340   :  { %v4788_v52 = vadd.f32 %v2961_v59, %v2953_v33 }
0x3342   :  { %3676 = vtanh.f32 %v4788_v52 }
0x3348   :  { %v3677_v61 = vpop.eup %3676 }
0x3349   :  { %2966 = vrot.lane.b32.xlu2 %v3677_v61, %s3697_s17 }
0x334e   :  { %v2899_v12 = vpop.permute.xlu0 %2898 }
0x334f   :  { %v2901_v31 = vmul.f32 %v2899_v12, %v2882_v60 }
0x3351   :  { %v2902_v19 = vsub.f32 %v2901_v31, %v4756_v15 }
0x3353   :  { %v2903_v13 = vmul.f32 %v2902_v19, %v4087_v5 }
0x3355   :  { %v4795_v44 = vadd.f32 %v2903_v13, %v4756_v15 }
0x3357   :  { %v2976_v41 = vpack.c.bf16 %v4795_v44, %v4795_v44 }
0x3359   :  { %2978 = vrot.lane.b32.xlu2 %v2976_v41, %s3698_s30 }
0x33a3   :  { %v2967_v22 = vpop.permute.xlu2 %2966 }
0x33a4   :  { %v2969_v62 = vmul.f32 %v2967_v22, %v2950_v34 }
0x33a6   :  { %v2970_v15 = vsub.f32 %v2969_v62, %v4748_v29 }
0x33a8   :  { %v2971_v23 = vmul.f32 %v2970_v15, %v4119_v58 }
0x33aa   :  { %v4809_v17 = vadd.f32 %v2971_v23, %v4748_v29  ;;  %v3166_v29 = vld [vmem:[%s4885_s0 + $0x1a8] sm:$0xff] }
0x33ab   :  { %3211 = vmatpush.msrb.mxu0 %v3166_v29  ;;  %v3108_v29 = vpack.c.bf16 %v3104_v57, %v3104_v57 }
0x33ac   :  { %v3037_v26 = vpack.c.bf16 %v4809_v17, %v4809_v17 }
0x33ad   :  { %3212 = vmatpush.msrb.mxu0 %v3165_v28 }
0x33ae   :  { %3039 = vrot.lane.b32.xlu1 %v3037_v26, %s3696_s16 }
0x33b3   :  { %v2979_v47 = vpop.permute.xlu2 %2978 }
0x33b4   :  { %3345 = vmatmul.msk.bf16.vlgmr.msra.gmra.mxu1 %vm36_vm0, %v2979_v47 }
0x33c4   :  { %3351 = vmatmul.msk.f32.vlgmr.msrb.gmra.mxu1 %vm36_vm0, %v752_v35  ;;  %v3105_v35 = vld [vmem:[%s4885_s0 + $0x190] sm:$0xff] }
0x33c5   :  { %v3109_v28 = vpack.c.bf16 %v3105_v35, %v3105_v35 }
0x3420   :  { %v3040_v42 = vpop.permute.xlu1 %3039 }
0x3421   :  { %3347 = vmatmul.msk.bf16.vlgmr.msra.gmra.mxu0 %vm36_vm0, %v3040_v42  ;;  %v3117_v42 = vunpack.c.l.b16 %v3108_v29 }
0x3431   :  { %v2992_v11 = vpop.f32.mrf.mxu1  ;;  %3352 = vmatmul.msk.f32.vlgmr.msrb.gmra.mxu0 %vm36_vm0, %v3815_v30 }
0x3432   :  { %v2996_v37 = vadd.f32 %v2992_v11, %v4496_v55  ;;  %v3118_v11 = vunpack.c.l.b16 %v3109_v28 }
0x3434   :  { %3678 = vtanh.f32 %v2996_v37  ;;  %v3346_v25 = vmul.f32 -1.442695, %v2996_v37  ;;  %v3119_v37 = vpack.c.b16 %v3118_v11, %v3117_v42 }
0x3436   :  { %3680 = vpow2.f32 %v3346_v25  ;;  %3131 = vmatpush.bf16.msra.mxu2 %v3119_v37 }
0x3439   :  { %v2994_v53 = vpop.f32.mrf.mxu1 }
0x343a   :  { %v3679_v1 = vpop.eup %3678 }
0x343b   :  { %3019 = vrot.lane.b32.xlu1 %v3679_v1, %s3695_s15 }
0x343c   :  { %v3681_v38 = vpop.eup %3680 }
0x343d   :  { %v3000_v60 = vadd.f32 1.0, %v3681_v38 }
0x343f   :  { %3682 = vrcp.f32 %v3000_v60  ;;  %v3012_v55 = vand.u32 2147483648, %v3000_v60  ;;  %vm3006_vm12 = vweird.f32 %v3000_v60  ;;  %v3010_v48 = vand.u32 2147483647, %v3000_v60 }
0x3441   :  { %v3013_v14 = vor.u32 1.1754944e-38, %v3012_v55  ;;  %vm3011_vm14 = vcmp.eq.f32.partialorder %v3010_v48, 8.507059e+37 }
0x3445   :  { %v3683_v20 = vpop.eup %3682 }
0x3446   :  { %v3002_v2 = vmul.f32 %v3683_v20, %v3000_v60  ;;  %vm3007_vm11 = vweird.f32 %v3683_v20 }
0x3447   :  { %vm3008_vm13 = vmor %vm3006_vm12, %vm3007_vm11 }
0x3448   :  { %v3003_v8 = vsub.f32 1.0, %v3002_v2 }
0x344a   :  { %v3004_v63 = vmul.f32 %v3683_v20, %v3003_v8 }
0x344c   :  { %v3005_v40 = vadd.f32 %v3683_v20, %v3004_v63 }
0x344e   :  { %v3009_v0 = vsel %vm3008_vm13, %v3683_v20, %v3005_v40 }
0x344f   :  { %v3014_v32 = vsel %vm3011_vm14, %v3013_v14, %v3009_v0 }
0x3450   :  { %v3017_v7 = vmul.f32 %v3014_v32, %v2907_v16 }
0x349e   :  { %v3053_v43 = vpop.f32.mrf.mxu0 }
0x349f   :  { %3058 = vrot.lane.b32.xlu0 %v3053_v43, %s3699_s9 }
0x34a6   :  { %v3055_v30 = vpop.f32.mrf.mxu0 }
0x34a7   :  { %v3103_v30 = vld [vmem:[%s4885_s0 + $0x180] sm:$0xff] }
0x34a8   :  { %v3107_v55 = vpack.c.bf16 %v3103_v30, %v3103_v30 }
0x34aa   :  { %v3143_v0 = vunpack.c.l.b16 %v3107_v55 }
0x34ad   :  { %v3020_v24 = vpop.permute.xlu1 %3019 }
0x34ae   :  { %v3022_v9 = vmul.f32 %v3020_v24, %v3014_v32  ;;  %v3214_v16 = vpop.f32.mrf.mxu0 }
0x34b0   :  { %3024 = vrot.lane.b32.xlu0 %v3022_v9, %s3696_s16 }
0x3511   :  { %v3059_v51 = vpop.permute.xlu0 %3058 }
0x3512   :  { %v3061_v39 = vadd.f32 %v3059_v51, %v4482_v56  ;;  %v3372_v51 = vld [vmem:[%s4885_s0 + $0x198] ss:$0 sm:$0xff] }
0x3514   :  { %3684 = vtanh.f32 %v3061_v39  ;;  %v3348_v45 = vmul.f32 -1.442695, %v3061_v39 }
0x351a   :  { %v3685_v34 = vpop.eup %3684 }
0x351b   :  { %3084 = vrot.lane.b32.xlu2 %v3685_v34, %s3695_s15 }
0x3522   :  { %v3025_v10 = vpop.permute.xlu0 %3024 }
0x3523   :  { %v3027_v18 = vadd.f32 %v3025_v10, %v3017_v7  ;;  %v3191_v7 = vpop.f32.mrf.mxu1 }
0x3524   :  { %v3215_v10 = vadd.f32 %v3214_v16, %v3191_v7 }
0x3525   :  { %3686 = vtanh.f32 %v3027_v18  ;;  %v3373_v18 = vld [vmem:[%s4885_s0 + $0x1d0] ss:$0 sm:$0xff] }
0x3526   :  { %3688 = vpow2.f32 %v3348_v45 }
0x352b   :  { %v3687_v4 = vpop.eup %3686 }
0x352c   :  { %3030 = vrot.lane.b32.xlu2 %v3687_v4, %s3697_s17  ;;  %v3689_v56 = vpop.eup %3688 }
0x352d   :  { %v3065_v33 = vadd.f32 1.0, %v3689_v56 }
0x352f   :  { %3690 = vrcp.f32 %v3065_v33  ;;  %v3077_v31 = vand.u32 2147483648, %v3065_v33  ;;  %vm3071_vm2 = vweird.f32 %v3065_v33  ;;  %v3075_v21 = vand.u32 2147483647, %v3065_v33 }
0x3531   :  { %v3078_v13 = vor.u32 1.1754944e-38, %v3077_v31  ;;  %vm3076_vm4 = vcmp.eq.f32.partialorder %v3075_v21, 8.507059e+37 }
0x3535   :  { %v3691_v36 = vpop.eup %3690 }
0x3536   :  { %v3067_v59 = vmul.f32 %v3691_v36, %v3065_v33  ;;  %vm3072_vm15 = vweird.f32 %v3691_v36 }
0x3537   :  { %vm3073_vm3 = vmor %vm3071_vm2, %vm3072_vm15 }
0x3538   :  { %v3068_v61 = vsub.f32 1.0, %v3067_v59 }
0x353a   :  { %v3069_v5 = vmul.f32 %v3691_v36, %v3068_v61 }
0x353c   :  { %v3070_v12 = vadd.f32 %v3691_v36, %v3069_v5 }
0x353e   :  { %v3074_v19 = vsel %vm3073_vm3, %v3691_v36, %v3070_v12 }
0x353f   :  { %v3079_v3 = vsel %vm3076_vm4, %v3078_v13, %v3074_v19 }
0x3575   :  { %v3085_v41 = vpop.permute.xlu2 %3084 }
0x3576   :  { %v3087_v50 = vmul.f32 %v3085_v41, %v3079_v3 }
0x3578   :  { %3089 = vrot.lane.b32.xlu1 %v3087_v50, %s3696_s16 }
0x3586   :  { %v3031_v22 = vpop.permute.xlu2 %3030 }
0x3587   :  { %v3033_v62 = vmul.f32 %v3031_v22, %v3014_v32  ;;  %v3169_v32 = vld [vmem:[%s4885_s0 + $0x1c0] sm:$0xff] }
0x3589   :  { %v3034_v15 = vsub.f32 %v3033_v62, %v4795_v44 }
0x358b   :  { %v3035_v23 = vmul.f32 %v3034_v15, %v4017_v6  ;;  %v2973_v6 = vsub.f32 %v4788_v52, %v4785_v27 }
0x358d   :  { %v3036_v26 = vadd.f32 %v3035_v23, %v4795_v44  ;;  %v2974_v44 = vmul.f32 %v2973_v6, %v4119_v58 }
0x358f   :  { %v3111_v47 = vpack.c.bf16 %v3036_v26, %v3036_v26  ;;  %v2975_v53 = vadd.f32 %v2974_v44, %v4785_v27  ;;  %v3102_v27 = vld [vmem:[%s4885_s0 + $0x178] sm:$0xff] }
0x3590   :  { %v3106_v40 = vpack.c.bf16 %v3102_v27, %v3102_v27 }
0x3591   :  { %3113 = vrot.lane.b32.xlu1 %v3111_v47, %s3698_s30  ;;  %v3082_v1 = vmul.f32 %v3079_v3, %v2975_v53 }
0x3592   :  { %v3142_v48 = vunpack.c.l.b16 %v3106_v40 }
0x3594   :  { %v3144_v14 = vpack.c.b16 %v3143_v0, %v3142_v48 }
0x3596   :  { %3156 = vmatpush.bf16.msrb.mxu3 %v3144_v14 }
0x35ea   :  { %v3090_v25 = vpop.permute.xlu1 %3089 }
0x35eb   :  { %v3092_v38 = vadd.f32 %v3090_v25, %v3082_v1 }
0x35ed   :  { %3692 = vtanh.f32 %v3092_v38 }
0x35f3   :  { %v3693_v60 = vpop.eup %3692 }
0x35f4   :  { %3095 = vrot.lane.b32.xlu0 %v3693_v60, %s3697_s17 }
0x3603   :  { %v3114_v20 = vpop.permute.xlu1 %3113 }
0x3604   :  { %3349 = vmatmul.msk.bf16.vlgmr.msra.gmra.mxu2 %vm36_vm0, %v3114_v20 }
0x3666   :  { %v3096_v2 = vpop.permute.xlu0 %3095 }
0x3667   :  { %v3098_v43 = vmul.f32 %v3096_v2, %v3079_v3 }
0x3669   :  { %v3099_v8 = vsub.f32 %v3098_v43, %v4809_v17 }
0x366b   :  { %v3100_v52 = vmul.f32 %v3099_v8, %v4056_v46 }
0x366d   :  { %v3101_v58 = vadd.f32 %v3100_v52, %v4809_v17  ;;  %v3170_v17 = vld [vmem:[%s4885_s0 + $0x1c8] sm:$0xff] }
0x366e   :  { %3234 = vmatpush.msrb.mxu2 %v3170_v17 }
0x366f   :  { %v3110_v63 = vpack.c.bf16 %v3101_v58, %v3101_v58 }
0x3670   :  { %3235 = vmatpush.msrb.mxu2 %v3169_v32 }
0x3671   :  { %3138 = vrot.lane.b32.xlu2 %v3110_v63, %s3696_s16 }
0x3687   :  { %v3133_v46 = vpop.f32.mrf.mxu2 }
0x368f   :  { %v3135_v24 = vpop.f32.mrf.mxu2 }
0x36cb   :  { %v3139_v9 = vpop.permute.xlu2 %3138 }
0x36cc   :  { %3350 = vmatmul.msk.bf16.vlgmr.msrb.gmra.mxu3 %vm36_vm0, %v3139_v9 }
0x374f   :  { %v3158_v39 = vpop.f32.mrf.mxu3 }
0x3750   :  { %v3159_v49 = vadd.f32 %v3158_v39, %v3133_v46 }
0x3752   :  { %v3164_v34 = vadd.f32 %v3372_v51, %v3159_v49 }
0x3754   :  { %3353 = vmatmul.msk.f32.vlgmr.msrb.gmra.mxu2 %vm36_vm0, %v3164_v34 }
0x3757   :  { %v3160_v54 = vpop.f32.mrf.mxu3 }
0x37d7   :  { %v3237_v4 = vpop.f32.mrf.mxu2 }
0x37d8   :  { %v3240_v45 = vadd.f32 %v3237_v4, %v3215_v10 }
0x37da   :  { %v3243_v56 = vadd.f32 %v3373_v18, %v3240_v45 }
0x37dc   :  { %3245 = vst.msk [vmem:[%s4886_s2] sm:$0xff] %vm3244_vm5, %v3243_v56 }

</bundles_post_ra>
